<compile_context>
chip_gen: v7x
topology: tpu7x:2x2x1
jax: 0.10.0
libtpu: 0.0.40
codegen_flags: <defaults>
</compile_context>

<pallas_src>
import numpy as np
import jax
import jax.numpy as jnp
from jax.experimental import pallas as pl
from jax.experimental.pallas import tpu as pltpu


# ----------------------------------------------------------------------------
# Static helper matrices (numpy, wrapper-side glue)
# ----------------------------------------------------------------------------
def _pool_matrix_T(H, W):
    """AvgPool2d(kernel=(2,2), stride=(2,2), padding=1, count_include_pad=True)
    as a linear map.  Returns (H*W, Hp*Wp) so that pooled = x_flat @ P."""
    Hp, Wp = H // 2 + 1, W // 2 + 1
    P = np.zeros((H * W, Hp * Wp), np.float32)
    for oi in range(Hp):
        for oj in range(Wp):
            for di in range(2):
                for dj in range(2):
                    i = 2 * oi - 1 + di
                    j = 2 * oj - 1 + dj
                    if 0 <= i < H and 0 <= j < W:
                        P[i * W + j, oi * Wp + oj] += 0.25
    return P


def _upsample_matrix_T(H, W):
    """F.interpolate(mode='nearest') from (Hp,Wp) back to (H,W) as a linear map.
    Returns (Hp*Wp, H*W) so that up = small_flat @ U."""
    Hp, Wp = H // 2 + 1, W // 2 + 1
    idx_h = (np.arange(H) * Hp) // H          # PyTorch nearest: floor(dst*in/out)
    idx_w = (np.arange(W) * Wp) // W
    U = np.zeros((Hp * Wp, H * W), np.float32)
    for i in range(H):
        for j in range(W):
            U[idx_h[i] * Wp + idx_w[j], i * W + j] = 1.0
    return U


def _conv3x3_masks(H, W):
    """Validity masks (9, 1, H*W) for the 9 taps of a padded 3x3 conv on the
    flattened spatial axis (kills zero-padding, row-wrap and image-wrap)."""
    masks = np.zeros((9, 1, H * W), np.float32)
    ii, jj = np.meshgrid(np.arange(H), np.arange(W), indexing="ij")
    for k in range(9):
        ki, kj = k // 3, k % 3
        si, sj = ii + ki - 1, jj + kj - 1
        valid = (si >= 0) & (si < H) & (sj >= 0) & (sj < W)
        masks[k, 0] = valid.reshape(-1).astype(np.float32)
    return masks


def _tap_weight(w):
    """(cout, cin, 3, 3) -> (cout, 9*cin) matching the stacked-tap layout."""
    cout, cin = w.shape[0], w.shape[1]
    return jnp.transpose(w, (0, 2, 3, 1)).reshape(cout, 9 * cin)


# ----------------------------------------------------------------------------
# The fused Pallas kernel
# ----------------------------------------------------------------------------
def make_sc_net_kernel(C, H, W, Nb):
    c = C // 2
    HW = H * W
    L = Nb * HW           # lane width of one grid step (multiple of 128)

    def kernel(x_ref, w1_ref, b1_ref, wk2a_ref, wk2b_ref, wc2_ref, bc2_ref,
               w31_ref, wk4_ref, w2_ref, b2_ref,
               poolT_ref, upT_ref, mask_ref, out_ref, tap_ref, cat_ref):
        x = x_ref[...]                        # (C, L)
        masks = mask_ref[...]                 # (9, 1, L)

        def fill_taps(xf):
            # write the 9 rolled+masked taps of xf (c, L) into tap_ref (9c, L)
            for k in range(9):
                ki, kj = k // 3, k % 3
                d = (ki - 1) * W + (kj - 1)
                if d == 0:
                    xs = xf
                else:
                    xs = pltpu.roll(xf, (-d) % L, axis=1)   # XLU lane rotation
                tap_ref[k * c:(k + 1) * c, :] = xs * masks[k]

        # ---- conv1x1_block1 (with bias) ----
        x1 = jnp.dot(w1_ref[...], x, preferred_element_type=jnp.float32) + b1_ref[...]

        # ---- shared 3x3 taps of x1 -> fused k3 (up) + k1 (down) conv, one matmul ----
        fill_taps(x1)
        y = jnp.dot(w31_ref[...], tap_ref[...],
                    preferred_element_type=jnp.float32)      # (2c, L)
        x_up_4 = y[:c]                                        # k3(x1)
        x_k1 = jnp.maximum(y[c:], 0.0)                        # relu(k1(x1))
        cat_ref[c:, :] = x_k1                                 # down half of concat

        # ---- k2 gating branch (pool -> 1x1 -> relu -> 1x1 -> upsample) ----
        # 1x1 convs commute with the spatial pool/upsample, so they run once on
        # the full-width activation; pooled intermediates are lane-padded to 128.
        x1a = jnp.dot(wk2a_ref[...], x1, preferred_element_type=jnp.float32)  # (c, L)
        ups = []
        for b in range(Nb):                                   # static per-image loop
            pb = jnp.dot(x1a[:, b * HW:(b + 1) * HW], poolT_ref[...],
                         preferred_element_type=jnp.float32)  # (c, Kp)
            rb = jnp.maximum(pb, 0.0)
            ups.append(jnp.dot(rb, upT_ref[...],
                               preferred_element_type=jnp.float32))  # (c, HW)
        up = ups[0] if Nb == 1 else jnp.concatenate(ups, axis=1)     # (c, L)
        t = jnp.dot(wk2b_ref[...], up, preferred_element_type=jnp.float32)
        s1 = jax.nn.sigmoid(t)
        x_up_2 = x1 * s1
        x_up_3 = jax.nn.sigmoid(
            jnp.dot(wc2_ref[...], x_up_2, preferred_element_type=jnp.float32)
            + bc2_ref[...])

        # ---- second 3x3 conv (k4), again one K=9c matmul ----
        x_up_5 = x_up_4 * x_up_3
        fill_taps(x_up_5)                                     # tap scratch reused
        cat_ref[0:c, :] = jnp.dot(wk4_ref[...], tap_ref[...],
                                  preferred_element_type=jnp.float32)  # x_up_6

        # ---- conv1x1_block2 on concat([up, down]) + residual, one matmul ----
        x9 = jnp.dot(w2_ref[...], cat_ref[...],
                     preferred_element_type=jnp.float32) + b2_ref[...]
        out_ref[...] = (x + x9).astype(out_ref.dtype)

    return kernel


def _whole_spec(shape):
    nd = len(shape)
    return pl.BlockSpec(shape, lambda n: (0,) * nd)


def sc_net_forward(x, p, lane_target=2048):
    """x: (N, C, H, W) float32, NCHW like the PyTorch module."""
    N, C, H, W = x.shape
    assert C % 2 == 0 and H % 2 == 0 and W % 2 == 0
    c = C // 2
    HW = H * W
    assert HW % 128 == 0, "flattened spatial dim must be lane-aligned"

    # batch elements per grid step (lane dim = Nb*HW), Nb | N
    Nb = 1
    for cand in range(N, 0, -1):
        if N % cand == 0 and cand * HW <= max(HW, lane_target):
            Nb = cand
            break
    L = Nb * HW

    # channels-major, batch folded into the lane axis
    xt = jnp.transpose(x.reshape(N, C, HW), (1, 0, 2)).reshape(C, N * HW)

    # static spatial operators, lane-padded to a multiple of 128
    HpWp = (H // 2 + 1) * (W // 2 + 1)
    Kp = ((HpWp + 127) // 128) * 128
    poolT = np.zeros((HW, Kp), np.float32)
    poolT[:, :HpWp] = _pool_matrix_T(H, W)
    upT = np.zeros((Kp, HW), np.float32)
    upT[:HpWp, :] = _upsample_matrix_T(H, W)
    masks = np.tile(_conv3x3_masks(H, W), (1, 1, Nb))        # (9, 1, L)

    # fused tap weights: k3 and k1 stacked (shared taps), k4 alone
    w31 = jnp.concatenate([_tap_weight(p["wk3"]), _tap_weight(p["wk1"])], axis=0)
    wk4f = _tap_weight(p["wk4"])

    inputs = (xt,
              p["w1"], p["b1"].reshape(c, 1),
              p["wk2a"], p["wk2b"],
              p["wc2"], p["bc2"].reshape(c, 1),
              w31, wk4f,
              p["w2"], p["b2"].reshape(C, 1),
              jnp.asarray(poolT), jnp.asarray(upT), jnp.asarray(masks))

    in_specs = ([pl.BlockSpec((C, L), lambda n: (0, n))]
                + [_whole_spec(a.shape) for a in inputs[1:]])

    out = pl.pallas_call(
        make_sc_net_kernel(C, H, W, Nb),
        out_shape=jax.ShapeDtypeStruct((C, N * HW), jnp.float32),
        grid=(N // Nb,),
        in_specs=in_specs,
        out_specs=pl.BlockSpec((C, L), lambda n: (0, n)),
        scratch_shapes=[pltpu.VMEM((9 * c, L), jnp.float32),   # stacked 3x3 taps
                        pltpu.VMEM((C, L), jnp.float32)],      # [up; down] concat
        compiler_params=pltpu.CompilerParams(dimension_semantics=("parallel",)),
    )(*inputs)
    return jnp.transpose(out.reshape(C, N, HW), (1, 0, 2)).reshape(N, C, H, W)


# ----------------------------------------------------------------------------
# Pure-JAX reference (mirrors the PyTorch forward op-by-op, NCHW)
# ----------------------------------------------------------------------------
def _conv1x1_ref(x, w, b=None):
    y = jnp.einsum("oc,nchw->nohw", w, x)
    if b is not None:
        y = y + b.reshape(1, -1, 1, 1)
    return y


def _conv3x3_ref(x, w):
    return jax.lax.conv_general_dilated(
        x, w, (1, 1), ((1, 1), (1, 1)),
        dimension_numbers=("NCHW", "OIHW", "NCHW"))


def _avgpool_ref(x):
    xp = jnp.pad(x, ((0, 0), (0, 0), (1, 1), (1, 1)))
    N, C, H2, W2 = xp.shape
    return xp.reshape(N, C, H2 // 2, 2, W2 // 2, 2).mean(axis=(3, 5))


def _nearest_ref(x, H, W):
    Hp, Wp = x.shape[2], x.shape[3]
    idx_h = (np.arange(H) * Hp) // H
    idx_w = (np.arange(W) * Wp) // W
    return x[:, :, idx_h][:, :, :, idx_w]


def sc_net_ref(x, p):
    H, W = x.shape[2], x.shape[3]
    identity = x
    x1 = _conv1x1_ref(x, p["w1"], p["b1"])
    # up branch
    t = _avgpool_ref(x1)
    t = _conv1x1_ref(t, p["wk2a"])
    t = jax.nn.relu(t)
    t = _conv1x1_ref(t, p["wk2b"])
    t = _nearest_ref(t, H, W)
    s1 = jax.nn.sigmoid(t)
    x_up_2 = x1 * s1
    x_up_3 = jax.nn.sigmoid(_conv1x1_ref(x_up_2, p["wc2"], p["bc2"]))
    x_up_4 = _conv3x3_ref(x1, p["wk3"])
    x_up_5 = x_up_4 * x_up_3
    x_up_6 = _conv3x3_ref(x_up_5, p["wk4"])
    # down branch
    x_k1 = jax.nn.relu(_conv3x3_ref(x1, p["wk1"]))
    cat = jnp.concatenate([x_up_6, x_k1], axis=1)
    x9 = _conv1x1_ref(cat, p["w2"], p["b2"])
    return identity + x9


# ----------------------------------------------------------------------------
if __name__ == "__main__":
    jax.config.update("jax_default_matmul_precision", "highest")

    N, C, H, W = 2, 8, 16, 16
    c = C // 2

    key = jax.random.PRNGKey(0)
    ks = jax.random.split(key, 12)

    def rnd(k, shape, scale=0.2):
        return scale * jax.random.normal(k, shape, dtype=jnp.float32)

    params = {
        "w1": rnd(ks[0], (c, C)),          # conv1x1_block1 weight (Cout, Cin)
        "b1": rnd(ks[1], (c,)),            # conv1x1_block1 bias
        "wk2a": rnd(ks[2], (c, c)),        # k2 first Conv1x1 (no bias)
        "wk2b": rnd(ks[3], (c, c)),        # k2 second Conv1x1 (no bias)
        "wc2": rnd(ks[4], (c, c)),         # conv1x1_k2 weight
        "bc2": rnd(ks[5], (c,)),           # conv1x1_k2 bias
        "wk3": rnd(ks[6], (c, c, 3, 3)),   # k3 Conv3x3 (no bias)
        "wk4": rnd(ks[7], (c, c, 3, 3)),   # k4 Conv3x3 (no bias)
        "wk1": rnd(ks[8], (c, c, 3, 3)),   # down-branch Conv3x3 (no bias)
        "w2": rnd(ks[9], (C, C)),          # conv1x1_block2 weight
        "b2": rnd(ks[10], (C,)),           # conv1x1_block2 bias
    }

    x = jax.random.normal(ks[11], (N, C, H, W), dtype=jnp.float32)

    out = sc_net_forward(x, params)
    out = jax.block_until_ready(out)

    ref = jax.block_until_ready(sc_net_ref(x, params))
    assert out.shape == x.shape and out.dtype == jnp.float32
    np.testing.assert_allclose(np.asarray(out), np.asarray(ref),
                               rtol=1e-3, atol=1e-3)
    print("KERNEL_OK")
</pallas_src>

<mosaic_0001>
module attributes {stable_mosaic.version = 11 : i64} {
  func.func @kernel(%arg0: i32, %arg1: memref<8x512xf32, #tpu.memory_space<vmem>>, %arg2: memref<4x8xf32, #tpu.memory_space<vmem>>, %arg3: memref<4x1xf32, #tpu.memory_space<vmem>>, %arg4: memref<4x4xf32, #tpu.memory_space<vmem>>, %arg5: memref<4x4xf32, #tpu.memory_space<vmem>>, %arg6: memref<4x4xf32, #tpu.memory_space<vmem>>, %arg7: memref<4x1xf32, #tpu.memory_space<vmem>>, %arg8: memref<8x36xf32, #tpu.memory_space<vmem>>, %arg9: memref<4x36xf32, #tpu.memory_space<vmem>>, %arg10: memref<8x8xf32, #tpu.memory_space<vmem>>, %arg11: memref<8x1xf32, #tpu.memory_space<vmem>>, %arg12: memref<256x128xf32, #tpu.memory_space<vmem>>, %arg13: memref<128x256xf32, #tpu.memory_space<vmem>>, %arg14: memref<9x1x512xf32, #tpu.memory_space<vmem>>, %arg15: memref<8x512xf32, #tpu.memory_space<vmem>>, %arg16: memref<36x512xf32, #tpu.memory_space<vmem>>, %arg17: memref<8x512xf32, #tpu.memory_space<vmem>>) attributes {dimension_semantics = [#tpu.dimension_semantics<parallel>], iteration_bounds = array<i64: 1>, scalar_prefetch = 0 : i64, scratch_operands = 2 : i64, tpu.core_type = #tpu.core_type<tc>, window_params = [{transform_indices = @transform_0, window_bounds = array<i64: 8, 512>}, {pipeline_mode = #tpu.pipeline_mode<synchronous>, transform_indices = @transform_1, window_bounds = array<i64: 4, 8>}, {pipeline_mode = #tpu.pipeline_mode<synchronous>, transform_indices = @transform_2, window_bounds = array<i64: 4, 1>}, {pipeline_mode = #tpu.pipeline_mode<synchronous>, transform_indices = @transform_3, window_bounds = array<i64: 4, 4>}, {pipeline_mode = #tpu.pipeline_mode<synchronous>, transform_indices = @transform_4, window_bounds = array<i64: 4, 4>}, {pipeline_mode = #tpu.pipeline_mode<synchronous>, transform_indices = @transform_5, window_bounds = array<i64: 4, 4>}, {pipeline_mode = #tpu.pipeline_mode<synchronous>, transform_indices = @transform_6, window_bounds = array<i64: 4, 1>}, {pipeline_mode = #tpu.pipeline_mode<synchronous>, transform_indices = @transform_7, window_bounds = array<i64: 8, 36>}, {pipeline_mode = #tpu.pipeline_mode<synchronous>, transform_indices = @transform_8, window_bounds = array<i64: 4, 36>}, {pipeline_mode = #tpu.pipeline_mode<synchronous>, transform_indices = @transform_9, window_bounds = array<i64: 8, 8>}, {pipeline_mode = #tpu.pipeline_mode<synchronous>, transform_indices = @transform_10, window_bounds = array<i64: 8, 1>}, {pipeline_mode = #tpu.pipeline_mode<synchronous>, transform_indices = @transform_11, window_bounds = array<i64: 256, 128>}, {pipeline_mode = #tpu.pipeline_mode<synchronous>, transform_indices = @transform_12, window_bounds = array<i64: 128, 256>}, {pipeline_mode = #tpu.pipeline_mode<synchronous>, transform_indices = @transform_13, window_bounds = array<i64: 9, 1, 512>}, {transform_indices = @transform_14, window_bounds = array<i64: 8, 512>}]} {
    %c0 = arith.constant 0 : index
    %c0_0 = arith.constant 0 : index
    %0 = vector.load %arg1[%c0, %c0_0] : memref<8x512xf32, #tpu.memory_space<vmem>>, vector<8x512xf32>
    %c0_1 = arith.constant 0 : index
    %c0_2 = arith.constant 0 : index
    %c0_3 = arith.constant 0 : index
    %1 = vector.load %arg14[%c0_1, %c0_2, %c0_3] : memref<9x1x512xf32, #tpu.memory_space<vmem>>, vector<9x1x512xf32>
    %c0_4 = arith.constant 0 : index
    %c0_5 = arith.constant 0 : index
    %2 = vector.load %arg2[%c0_4, %c0_5] : memref<4x8xf32, #tpu.memory_space<vmem>>, vector<4x8xf32>
    %cst = arith.constant dense<0.000000e+00> : vector<4x512xf32>
    %3 = tpu.matmul %2, %0, %cst {dimension_numbers = #tpu.dot_dimension_numbers<[1], [0], [0], [1], [0, 0, 1, 1], [], []>, precision = #tpu.contract_precision<fp32>} : vector<4x8xf32>, vector<8x512xf32>, vector<4x512xf32> -> vector<4x512xf32>
    %c0_6 = arith.constant 0 : index
    %c0_7 = arith.constant 0 : index
    %4 = vector.load %arg3[%c0_6, %c0_7] : memref<4x1xf32, #tpu.memory_space<vmem>>, vector<4x1xf32>
    %5 = vector.broadcast %4 : vector<4x1xf32> to vector<4x512xf32>
    %6 = arith.addf %3, %5 : vector<4x512xf32>
    %c17_i32 = arith.constant 17 : i32
    %7 = tpu.dynamic_rotate %6 by %c17_i32 dim 1 : vector<4x512xf32>, i32 -> vector<4x512xf32>
    %8 = vector.extract_strided_slice %1 {offsets = [0, 0, 0], sizes = [1, 1, 512], strides = [1, 1, 1]} : vector<9x1x512xf32> to vector<1x1x512xf32>
    %9 = vector.shape_cast %8 : vector<1x1x512xf32> to vector<1x512xf32>
    %10 = vector.broadcast %9 : vector<1x512xf32> to vector<4x512xf32>
    %11 = arith.mulf %7, %10 : vector<4x512xf32>
    %c0_8 = arith.constant 0 : index
    %c0_9 = arith.constant 0 : index
    %12 = vector.load %arg16[%c0_8, %c0_9] : memref<36x512xf32, #tpu.memory_space<vmem>>, vector<4x512xf32>
    tpu.vector_store %arg16[%c0_8, %c0_9], %11 {strides = array<i32>} : memref<36x512xf32, #tpu.memory_space<vmem>>, vector<4x512xf32>,
    %c16_i32 = arith.constant 16 : i32
    %13 = tpu.dynamic_rotate %6 by %c16_i32 dim 1 : vector<4x512xf32>, i32 -> vector<4x512xf32>
    %14 = vector.extract_strided_slice %1 {offsets = [1, 0, 0], sizes = [1, 1, 512], strides = [1, 1, 1]} : vector<9x1x512xf32> to vector<1x1x512xf32>
    %15 = vector.shape_cast %14 : vector<1x1x512xf32> to vector<1x512xf32>
    %16 = vector.broadcast %15 : vector<1x512xf32> to vector<4x512xf32>
    %17 = arith.mulf %13, %16 : vector<4x512xf32>
    %c4 = arith.constant 4 : index
    %c0_10 = arith.constant 0 : index
    %18 = vector.load %arg16[%c4, %c0_10] : memref<36x512xf32, #tpu.memory_space<vmem>>, vector<4x512xf32>
    tpu.vector_store %arg16[%c4, %c0_10], %17 {strides = array<i32>} : memref<36x512xf32, #tpu.memory_space<vmem>>, vector<4x512xf32>,
    %c15_i32 = arith.constant 15 : i32
    %19 = tpu.dynamic_rotate %6 by %c15_i32 dim 1 : vector<4x512xf32>, i32 -> vector<4x512xf32>
    %20 = vector.extract_strided_slice %1 {offsets = [2, 0, 0], sizes = [1, 1, 512], strides = [1, 1, 1]} : vector<9x1x512xf32> to vector<1x1x512xf32>
    %21 = vector.shape_cast %20 : vector<1x1x512xf32> to vector<1x512xf32>
    %22 = vector.broadcast %21 : vector<1x512xf32> to vector<4x512xf32>
    %23 = arith.mulf %19, %22 : vector<4x512xf32>
    %c8 = arith.constant 8 : index
    %c0_11 = arith.constant 0 : index
    %24 = vector.load %arg16[%c8, %c0_11] : memref<36x512xf32, #tpu.memory_space<vmem>>, vector<4x512xf32>
    tpu.vector_store %arg16[%c8, %c0_11], %23 {strides = array<i32>} : memref<36x512xf32, #tpu.memory_space<vmem>>, vector<4x512xf32>,
    %c1_i32 = arith.constant 1 : i32
    %25 = tpu.dynamic_rotate %6 by %c1_i32 dim 1 : vector<4x512xf32>, i32 -> vector<4x512xf32>
    %26 = vector.extract_strided_slice %1 {offsets = [3, 0, 0], sizes = [1, 1, 512], strides = [1, 1, 1]} : vector<9x1x512xf32> to vector<1x1x512xf32>
    %27 = vector.shape_cast %26 : vector<1x1x512xf32> to vector<1x512xf32>
    %28 = vector.broadcast %27 : vector<1x512xf32> to vector<4x512xf32>
    %29 = arith.mulf %25, %28 : vector<4x512xf32>
    %c12 = arith.constant 12 : index
    %c0_12 = arith.constant 0 : index
    %30 = vector.load %arg16[%c12, %c0_12] : memref<36x512xf32, #tpu.memory_space<vmem>>, vector<4x512xf32>
    tpu.vector_store %arg16[%c12, %c0_12], %29 {strides = array<i32>} : memref<36x512xf32, #tpu.memory_space<vmem>>, vector<4x512xf32>,
    %31 = vector.extract_strided_slice %1 {offsets = [4, 0, 0], sizes = [1, 1, 512], strides = [1, 1, 1]} : vector<9x1x512xf32> to vector<1x1x512xf32>
    %32 = vector.shape_cast %31 : vector<1x1x512xf32> to vector<1x512xf32>
    %33 = vector.broadcast %32 : vector<1x512xf32> to vector<4x512xf32>
    %34 = arith.mulf %6, %33 : vector<4x512xf32>
    %c16 = arith.constant 16 : index
    %c0_13 = arith.constant 0 : index
    %35 = vector.load %arg16[%c16, %c0_13] : memref<36x512xf32, #tpu.memory_space<vmem>>, vector<4x512xf32>
    tpu.vector_store %arg16[%c16, %c0_13], %34 {strides = array<i32>} : memref<36x512xf32, #tpu.memory_space<vmem>>, vector<4x512xf32>,
    %c511_i32 = arith.constant 511 : i32
    %36 = tpu.dynamic_rotate %6 by %c511_i32 dim 1 : vector<4x512xf32>, i32 -> vector<4x512xf32>
    %37 = vector.extract_strided_slice %1 {offsets = [5, 0, 0], sizes = [1, 1, 512], strides = [1, 1, 1]} : vector<9x1x512xf32> to vector<1x1x512xf32>
    %38 = vector.shape_cast %37 : vector<1x1x512xf32> to vector<1x512xf32>
    %39 = vector.broadcast %38 : vector<1x512xf32> to vector<4x512xf32>
    %40 = arith.mulf %36, %39 : vector<4x512xf32>
    %c20 = arith.constant 20 : index
    %c0_14 = arith.constant 0 : index
    %41 = vector.load %arg16[%c20, %c0_14] : memref<36x512xf32, #tpu.memory_space<vmem>>, vector<4x512xf32>
    tpu.vector_store %arg16[%c20, %c0_14], %40 {strides = array<i32>} : memref<36x512xf32, #tpu.memory_space<vmem>>, vector<4x512xf32>,
    %c497_i32 = arith.constant 497 : i32
    %42 = tpu.dynamic_rotate %6 by %c497_i32 dim 1 : vector<4x512xf32>, i32 -> vector<4x512xf32>
    %43 = vector.extract_strided_slice %1 {offsets = [6, 0, 0], sizes = [1, 1, 512], strides = [1, 1, 1]} : vector<9x1x512xf32> to vector<1x1x512xf32>
    %44 = vector.shape_cast %43 : vector<1x1x512xf32> to vector<1x512xf32>
    %45 = vector.broadcast %44 : vector<1x512xf32> to vector<4x512xf32>
    %46 = arith.mulf %42, %45 : vector<4x512xf32>
    %c24 = arith.constant 24 : index
    %c0_15 = arith.constant 0 : index
    %47 = vector.load %arg16[%c24, %c0_15] : memref<36x512xf32, #tpu.memory_space<vmem>>, vector<4x512xf32>
    tpu.vector_store %arg16[%c24, %c0_15], %46 {strides = array<i32>} : memref<36x512xf32, #tpu.memory_space<vmem>>, vector<4x512xf32>,
    %c496_i32 = arith.constant 496 : i32
    %48 = tpu.dynamic_rotate %6 by %c496_i32 dim 1 : vector<4x512xf32>, i32 -> vector<4x512xf32>
    %49 = vector.extract_strided_slice %1 {offsets = [7, 0, 0], sizes = [1, 1, 512], strides = [1, 1, 1]} : vector<9x1x512xf32> to vector<1x1x512xf32>
    %50 = vector.shape_cast %49 : vector<1x1x512xf32> to vector<1x512xf32>
    %51 = vector.broadcast %50 : vector<1x512xf32> to vector<4x512xf32>
    %52 = arith.mulf %48, %51 : vector<4x512xf32>
    %c28 = arith.constant 28 : index
    %c0_16 = arith.constant 0 : index
    %53 = vector.load %arg16[%c28, %c0_16] : memref<36x512xf32, #tpu.memory_space<vmem>>, vector<4x512xf32>
    tpu.vector_store %arg16[%c28, %c0_16], %52 {strides = array<i32>} : memref<36x512xf32, #tpu.memory_space<vmem>>, vector<4x512xf32>,
    %c495_i32 = arith.constant 495 : i32
    %54 = tpu.dynamic_rotate %6 by %c495_i32 dim 1 : vector<4x512xf32>, i32 -> vector<4x512xf32>
    %55 = vector.extract_strided_slice %1 {offsets = [8, 0, 0], sizes = [1, 1, 512], strides = [1, 1, 1]} : vector<9x1x512xf32> to vector<1x1x512xf32>
    %56 = vector.shape_cast %55 : vector<1x1x512xf32> to vector<1x512xf32>
    %57 = vector.broadcast %56 : vector<1x512xf32> to vector<4x512xf32>
    %58 = arith.mulf %54, %57 : vector<4x512xf32>
    %c32 = arith.constant 32 : index
    %c0_17 = arith.constant 0 : index
    %59 = vector.load %arg16[%c32, %c0_17] : memref<36x512xf32, #tpu.memory_space<vmem>>, vector<4x512xf32>
    tpu.vector_store %arg16[%c32, %c0_17], %58 {strides = array<i32>} : memref<36x512xf32, #tpu.memory_space<vmem>>, vector<4x512xf32>,
    %c0_18 = arith.constant 0 : index
    %c0_19 = arith.constant 0 : index
    %60 = vector.load %arg8[%c0_18, %c0_19] : memref<8x36xf32, #tpu.memory_space<vmem>>, vector<8x36xf32>
    %c0_20 = arith.constant 0 : index
    %c0_21 = arith.constant 0 : index
    %61 = vector.load %arg16[%c0_20, %c0_21] : memref<36x512xf32, #tpu.memory_space<vmem>>, vector<36x512xf32>
    %cst_22 = arith.constant dense<0.000000e+00> : vector<8x512xf32>
    %62 = tpu.matmul %60, %61, %cst_22 {dimension_numbers = #tpu.dot_dimension_numbers<[1], [0], [0], [1], [0, 0, 1, 1], [], []>, precision = #tpu.contract_precision<fp32>} : vector<8x36xf32>, vector<36x512xf32>, vector<8x512xf32> -> vector<8x512xf32>
    %63 = vector.extract_strided_slice %62 {offsets = [0, 0], sizes = [4, 512], strides = [1, 1]} : vector<8x512xf32> to vector<4x512xf32>
    %64 = vector.extract_strided_slice %62 {offsets = [4, 0], sizes = [4, 512], strides = [1, 1]} : vector<8x512xf32> to vector<4x512xf32>
    %cst_23 = arith.constant 0.000000e+00 : f32
    %65 = vector.broadcast %cst_23 : f32 to vector<4x512xf32>
    %66 = arith.maximumf %64, %65 : vector<4x512xf32>
    %c4_24 = arith.constant 4 : index
    %c0_25 = arith.constant 0 : index
    %67 = vector.load %arg17[%c4_24, %c0_25] : memref<8x512xf32, #tpu.memory_space<vmem>>, vector<4x512xf32>
    tpu.vector_store %arg17[%c4_24, %c0_25], %66 {strides = array<i32>} : memref<8x512xf32, #tpu.memory_space<vmem>>, vector<4x512xf32>,
    %c0_26 = arith.constant 0 : index
    %c0_27 = arith.constant 0 : index
    %68 = vector.load %arg4[%c0_26, %c0_27] : memref<4x4xf32, #tpu.memory_space<vmem>>, vector<4x4xf32>
    %cst_28 = arith.constant dense<0.000000e+00> : vector<4x512xf32>
    %69 = tpu.matmul %68, %6, %cst_28 {dimension_numbers = #tpu.dot_dimension_numbers<[1], [0], [0], [1], [0, 0, 1, 1], [], []>, precision = #tpu.contract_precision<fp32>} : vector<4x4xf32>, vector<4x512xf32>, vector<4x512xf32> -> vector<4x512xf32>
    %70 = vector.extract_strided_slice %69 {offsets = [0, 0], sizes = [4, 256], strides = [1, 1]} : vector<4x512xf32> to vector<4x256xf32>
    %c0_29 = arith.constant 0 : index
    %c0_30 = arith.constant 0 : index
    %71 = vector.load %arg12[%c0_29, %c0_30] : memref<256x128xf32, #tpu.memory_space<vmem>>, vector<256x128xf32>
    %cst_31 = arith.constant dense<0.000000e+00> : vector<4x128xf32>
    %72 = tpu.matmul %70, %71, %cst_31 {dimension_numbers = #tpu.dot_dimension_numbers<[1], [0], [0], [1], [0, 0, 1, 1], [], []>, precision = #tpu.contract_precision<fp32>} : vector<4x256xf32>, vector<256x128xf32>, vector<4x128xf32> -> vector<4x128xf32>
    %cst_32 = arith.constant 0.000000e+00 : f32
    %73 = vector.broadcast %cst_32 : f32 to vector<4x128xf32>
    %74 = arith.maximumf %72, %73 : vector<4x128xf32>
    %c0_33 = arith.constant 0 : index
    %c0_34 = arith.constant 0 : index
    %75 = vector.load %arg13[%c0_33, %c0_34] : memref<128x256xf32, #tpu.memory_space<vmem>>, vector<128x256xf32>
    %cst_35 = arith.constant dense<0.000000e+00> : vector<4x256xf32>
    %76 = tpu.matmul %74, %75, %cst_35 {dimension_numbers = #tpu.dot_dimension_numbers<[1], [0], [0], [1], [0, 0, 1, 1], [], []>, precision = #tpu.contract_precision<fp32>} : vector<4x128xf32>, vector<128x256xf32>, vector<4x256xf32> -> vector<4x256xf32>
    %77 = vector.extract_strided_slice %69 {offsets = [0, 256], sizes = [4, 256], strides = [1, 1]} : vector<4x512xf32> to vector<4x256xf32>
    %c0_36 = arith.constant 0 : index
    %c0_37 = arith.constant 0 : index
    %78 = vector.load %arg12[%c0_36, %c0_37] : memref<256x128xf32, #tpu.memory_space<vmem>>, vector<256x128xf32>
    %cst_38 = arith.constant dense<0.000000e+00> : vector<4x128xf32>
    %79 = tpu.matmul %77, %78, %cst_38 {dimension_numbers = #tpu.dot_dimension_numbers<[1], [0], [0], [1], [0, 0, 1, 1], [], []>, precision = #tpu.contract_precision<fp32>} : vector<4x256xf32>, vector<256x128xf32>, vector<4x128xf32> -> vector<4x128xf32>
    %cst_39 = arith.constant 0.000000e+00 : f32
    %80 = vector.broadcast %cst_39 : f32 to vector<4x128xf32>
    %81 = arith.maximumf %79, %80 : vector<4x128xf32>
    %c0_40 = arith.constant 0 : index
    %c0_41 = arith.constant 0 : index
    %82 = vector.load %arg13[%c0_40, %c0_41] : memref<128x256xf32, #tpu.memory_space<vmem>>, vector<128x256xf32>
    %cst_42 = arith.constant dense<0.000000e+00> : vector<4x256xf32>
    %83 = tpu.matmul %81, %82, %cst_42 {dimension_numbers = #tpu.dot_dimension_numbers<[1], [0], [0], [1], [0, 0, 1, 1], [], []>, precision = #tpu.contract_precision<fp32>} : vector<4x128xf32>, vector<128x256xf32>, vector<4x256xf32> -> vector<4x256xf32>
    %84 = tpu.concatenate %76, %83 in 1 : vector<4x256xf32>, vector<4x256xf32> -> vector<4x512xf32>
    %c0_43 = arith.constant 0 : index
    %c0_44 = arith.constant 0 : index
    %85 = vector.load %arg5[%c0_43, %c0_44] : memref<4x4xf32, #tpu.memory_space<vmem>>, vector<4x4xf32>
    %cst_45 = arith.constant dense<0.000000e+00> : vector<4x512xf32>
    %86 = tpu.matmul %85, %84, %cst_45 {dimension_numbers = #tpu.dot_dimension_numbers<[1], [0], [0], [1], [0, 0, 1, 1], [], []>, precision = #tpu.contract_precision<fp32>} : vector<4x4xf32>, vector<4x512xf32>, vector<4x512xf32> -> vector<4x512xf32>
    %87 = arith.negf %86 : vector<4x512xf32>
    %88 = math.exp %87 : vector<4x512xf32>
    %cst_46 = arith.constant 1.000000e+00 : f32
    %89 = vector.broadcast %cst_46 : f32 to vector<4x512xf32>
    %90 = arith.addf %89, %88 : vector<4x512xf32>
    %91 = arith.divf %89, %90 : vector<4x512xf32>
    %92 = arith.mulf %6, %91 : vector<4x512xf32>
    %c0_47 = arith.constant 0 : index
    %c0_48 = arith.constant 0 : index
    %93 = vector.load %arg6[%c0_47, %c0_48] : memref<4x4xf32, #tpu.memory_space<vmem>>, vector<4x4xf32>
    %cst_49 = arith.constant dense<0.000000e+00> : vector<4x512xf32>
    %94 = tpu.matmul %93, %92, %cst_49 {dimension_numbers = #tpu.dot_dimension_numbers<[1], [0], [0], [1], [0, 0, 1, 1], [], []>, precision = #tpu.contract_precision<fp32>} : vector<4x4xf32>, vector<4x512xf32>, vector<4x512xf32> -> vector<4x512xf32>
    %c0_50 = arith.constant 0 : index
    %c0_51 = arith.constant 0 : index
    %95 = vector.load %arg7[%c0_50, %c0_51] : memref<4x1xf32, #tpu.memory_space<vmem>>, vector<4x1xf32>
    %96 = vector.broadcast %95 : vector<4x1xf32> to vector<4x512xf32>
    %97 = arith.addf %94, %96 : vector<4x512xf32>
    %98 = arith.negf %97 : vector<4x512xf32>
    %99 = math.exp %98 : vector<4x512xf32>
    %cst_52 = arith.constant 1.000000e+00 : f32
    %100 = vector.broadcast %cst_52 : f32 to vector<4x512xf32>
    %101 = arith.addf %100, %99 : vector<4x512xf32>
    %102 = arith.divf %100, %101 : vector<4x512xf32>
    %103 = arith.mulf %63, %102 : vector<4x512xf32>
    %c17_i32_53 = arith.constant 17 : i32
    %104 = tpu.dynamic_rotate %103 by %c17_i32_53 dim 1 : vector<4x512xf32>, i32 -> vector<4x512xf32>
    %105 = vector.extract_strided_slice %1 {offsets = [0, 0, 0], sizes = [1, 1, 512], strides = [1, 1, 1]} : vector<9x1x512xf32> to vector<1x1x512xf32>
    %106 = vector.shape_cast %105 : vector<1x1x512xf32> to vector<1x512xf32>
    %107 = vector.broadcast %106 : vector<1x512xf32> to vector<4x512xf32>
    %108 = arith.mulf %104, %107 : vector<4x512xf32>
    %c0_54 = arith.constant 0 : index
    %c0_55 = arith.constant 0 : index
    %109 = vector.load %arg16[%c0_54, %c0_55] : memref<36x512xf32, #tpu.memory_space<vmem>>, vector<4x512xf32>
    tpu.vector_store %arg16[%c0_54, %c0_55], %108 {strides = array<i32>} : memref<36x512xf32, #tpu.memory_space<vmem>>, vector<4x512xf32>,
    %c16_i32_56 = arith.constant 16 : i32
    %110 = tpu.dynamic_rotate %103 by %c16_i32_56 dim 1 : vector<4x512xf32>, i32 -> vector<4x512xf32>
    %111 = vector.extract_strided_slice %1 {offsets = [1, 0, 0], sizes = [1, 1, 512], strides = [1, 1, 1]} : vector<9x1x512xf32> to vector<1x1x512xf32>
    %112 = vector.shape_cast %111 : vector<1x1x512xf32> to vector<1x512xf32>
    %113 = vector.broadcast %112 : vector<1x512xf32> to vector<4x512xf32>
    %114 = arith.mulf %110, %113 : vector<4x512xf32>
    %c4_57 = arith.constant 4 : index
    %c0_58 = arith.constant 0 : index
    %115 = vector.load %arg16[%c4_57, %c0_58] : memref<36x512xf32, #tpu.memory_space<vmem>>, vector<4x512xf32>
    tpu.vector_store %arg16[%c4_57, %c0_58], %114 {strides = array<i32>} : memref<36x512xf32, #tpu.memory_space<vmem>>, vector<4x512xf32>,
    %c15_i32_59 = arith.constant 15 : i32
    %116 = tpu.dynamic_rotate %103 by %c15_i32_59 dim 1 : vector<4x512xf32>, i32 -> vector<4x512xf32>
    %117 = vector.extract_strided_slice %1 {offsets = [2, 0, 0], sizes = [1, 1, 512], strides = [1, 1, 1]} : vector<9x1x512xf32> to vector<1x1x512xf32>
    %118 = vector.shape_cast %117 : vector<1x1x512xf32> to vector<1x512xf32>
    %119 = vector.broadcast %118 : vector<1x512xf32> to vector<4x512xf32>
    %120 = arith.mulf %116, %119 : vector<4x512xf32>
    %c8_60 = arith.constant 8 : index
    %c0_61 = arith.constant 0 : index
    %121 = vector.load %arg16[%c8_60, %c0_61] : memref<36x512xf32, #tpu.memory_space<vmem>>, vector<4x512xf32>
    tpu.vector_store %arg16[%c8_60, %c0_61], %120 {strides = array<i32>} : memref<36x512xf32, #tpu.memory_space<vmem>>, vector<4x512xf32>,
    %c1_i32_62 = arith.constant 1 : i32
    %122 = tpu.dynamic_rotate %103 by %c1_i32_62 dim 1 : vector<4x512xf32>, i32 -> vector<4x512xf32>
    %123 = vector.extract_strided_slice %1 {offsets = [3, 0, 0], sizes = [1, 1, 512], strides = [1, 1, 1]} : vector<9x1x512xf32> to vector<1x1x512xf32>
    %124 = vector.shape_cast %123 : vector<1x1x512xf32> to vector<1x512xf32>
    %125 = vector.broadcast %124 : vector<1x512xf32> to vector<4x512xf32>
    %126 = arith.mulf %122, %125 : vector<4x512xf32>
    %c12_63 = arith.constant 12 : index
    %c0_64 = arith.constant 0 : index
    %127 = vector.load %arg16[%c12_63, %c0_64] : memref<36x512xf32, #tpu.memory_space<vmem>>, vector<4x512xf32>
    tpu.vector_store %arg16[%c12_63, %c0_64], %126 {strides = array<i32>} : memref<36x512xf32, #tpu.memory_space<vmem>>, vector<4x512xf32>,
    %128 = vector.extract_strided_slice %1 {offsets = [4, 0, 0], sizes = [1, 1, 512], strides = [1, 1, 1]} : vector<9x1x512xf32> to vector<1x1x512xf32>
    %129 = vector.shape_cast %128 : vector<1x1x512xf32> to vector<1x512xf32>
    %130 = vector.broadcast %129 : vector<1x512xf32> to vector<4x512xf32>
    %131 = arith.mulf %103, %130 : vector<4x512xf32>
    %c16_65 = arith.constant 16 : index
    %c0_66 = arith.constant 0 : index
    %132 = vector.load %arg16[%c16_65, %c0_66] : memref<36x512xf32, #tpu.memory_space<vmem>>, vector<4x512xf32>
    tpu.vector_store %arg16[%c16_65, %c0_66], %131 {strides = array<i32>} : memref<36x512xf32, #tpu.memory_space<vmem>>, vector<4x512xf32>,
    %c511_i32_67 = arith.constant 511 : i32
    %133 = tpu.dynamic_rotate %103 by %c511_i32_67 dim 1 : vector<4x512xf32>, i32 -> vector<4x512xf32>
    %134 = vector.extract_strided_slice %1 {offsets = [5, 0, 0], sizes = [1, 1, 512], strides = [1, 1, 1]} : vector<9x1x512xf32> to vector<1x1x512xf32>
    %135 = vector.shape_cast %134 : vector<1x1x512xf32> to vector<1x512xf32>
    %136 = vector.broadcast %135 : vector<1x512xf32> to vector<4x512xf32>
    %137 = arith.mulf %133, %136 : vector<4x512xf32>
    %c20_68 = arith.constant 20 : index
    %c0_69 = arith.constant 0 : index
    %138 = vector.load %arg16[%c20_68, %c0_69] : memref<36x512xf32, #tpu.memory_space<vmem>>, vector<4x512xf32>
    tpu.vector_store %arg16[%c20_68, %c0_69], %137 {strides = array<i32>} : memref<36x512xf32, #tpu.memory_space<vmem>>, vector<4x512xf32>,
    %c497_i32_70 = arith.constant 497 : i32
    %139 = tpu.dynamic_rotate %103 by %c497_i32_70 dim 1 : vector<4x512xf32>, i32 -> vector<4x512xf32>
    %140 = vector.extract_strided_slice %1 {offsets = [6, 0, 0], sizes = [1, 1, 512], strides = [1, 1, 1]} : vector<9x1x512xf32> to vector<1x1x512xf32>
    %141 = vector.shape_cast %140 : vector<1x1x512xf32> to vector<1x512xf32>
    %142 = vector.broadcast %141 : vector<1x512xf32> to vector<4x512xf32>
    %143 = arith.mulf %139, %142 : vector<4x512xf32>
    %c24_71 = arith.constant 24 : index
    %c0_72 = arith.constant 0 : index
    %144 = vector.load %arg16[%c24_71, %c0_72] : memref<36x512xf32, #tpu.memory_space<vmem>>, vector<4x512xf32>
    tpu.vector_store %arg16[%c24_71, %c0_72], %143 {strides = array<i32>} : memref<36x512xf32, #tpu.memory_space<vmem>>, vector<4x512xf32>,
    %c496_i32_73 = arith.constant 496 : i32
    %145 = tpu.dynamic_rotate %103 by %c496_i32_73 dim 1 : vector<4x512xf32>, i32 -> vector<4x512xf32>
    %146 = vector.extract_strided_slice %1 {offsets = [7, 0, 0], sizes = [1, 1, 512], strides = [1, 1, 1]} : vector<9x1x512xf32> to vector<1x1x512xf32>
    %147 = vector.shape_cast %146 : vector<1x1x512xf32> to vector<1x512xf32>
    %148 = vector.broadcast %147 : vector<1x512xf32> to vector<4x512xf32>
    %149 = arith.mulf %145, %148 : vector<4x512xf32>
    %c28_74 = arith.constant 28 : index
    %c0_75 = arith.constant 0 : index
    %150 = vector.load %arg16[%c28_74, %c0_75] : memref<36x512xf32, #tpu.memory_space<vmem>>, vector<4x512xf32>
    tpu.vector_store %arg16[%c28_74, %c0_75], %149 {strides = array<i32>} : memref<36x512xf32, #tpu.memory_space<vmem>>, vector<4x512xf32>,
    %c495_i32_76 = arith.constant 495 : i32
    %151 = tpu.dynamic_rotate %103 by %c495_i32_76 dim 1 : vector<4x512xf32>, i32 -> vector<4x512xf32>
    %152 = vector.extract_strided_slice %1 {offsets = [8, 0, 0], sizes = [1, 1, 512], strides = [1, 1, 1]} : vector<9x1x512xf32> to vector<1x1x512xf32>
    %153 = vector.shape_cast %152 : vector<1x1x512xf32> to vector<1x512xf32>
    %154 = vector.broadcast %153 : vector<1x512xf32> to vector<4x512xf32>
    %155 = arith.mulf %151, %154 : vector<4x512xf32>
    %c32_77 = arith.constant 32 : index
    %c0_78 = arith.constant 0 : index
    %156 = vector.load %arg16[%c32_77, %c0_78] : memref<36x512xf32, #tpu.memory_space<vmem>>, vector<4x512xf32>
    tpu.vector_store %arg16[%c32_77, %c0_78], %155 {strides = array<i32>} : memref<36x512xf32, #tpu.memory_space<vmem>>, vector<4x512xf32>,
    %c0_79 = arith.constant 0 : index
    %c0_80 = arith.constant 0 : index
    %157 = vector.load %arg9[%c0_79, %c0_80] : memref<4x36xf32, #tpu.memory_space<vmem>>, vector<4x36xf32>
    %c0_81 = arith.constant 0 : index
    %c0_82 = arith.constant 0 : index
    %158 = vector.load %arg16[%c0_81, %c0_82] : memref<36x512xf32, #tpu.memory_space<vmem>>, vector<36x512xf32>
    %cst_83 = arith.constant dense<0.000000e+00> : vector<4x512xf32>
    %159 = tpu.matmul %157, %158, %cst_83 {dimension_numbers = #tpu.dot_dimension_numbers<[1], [0], [0], [1], [0, 0, 1, 1], [], []>, precision = #tpu.contract_precision<fp32>} : vector<4x36xf32>, vector<36x512xf32>, vector<4x512xf32> -> vector<4x512xf32>
    %c0_84 = arith.constant 0 : index
    %c0_85 = arith.constant 0 : index
    %160 = vector.load %arg17[%c0_84, %c0_85] : memref<8x512xf32, #tpu.memory_space<vmem>>, vector<4x512xf32>
    tpu.vector_store %arg17[%c0_84, %c0_85], %159 {strides = array<i32>} : memref<8x512xf32, #tpu.memory_space<vmem>>, vector<4x512xf32>,
    %c0_86 = arith.constant 0 : index
    %c0_87 = arith.constant 0 : index
    %161 = vector.load %arg10[%c0_86, %c0_87] : memref<8x8xf32, #tpu.memory_space<vmem>>, vector<8x8xf32>
    %c0_88 = arith.constant 0 : index
    %c0_89 = arith.constant 0 : index
    %162 = vector.load %arg17[%c0_88, %c0_89] : memref<8x512xf32, #tpu.memory_space<vmem>>, vector<8x512xf32>
    %cst_90 = arith.constant dense<0.000000e+00> : vector<8x512xf32>
    %163 = tpu.matmul %161, %162, %cst_90 {dimension_numbers = #tpu.dot_dimension_numbers<[1], [0], [0], [1], [0, 0, 1, 1], [], []>, precision = #tpu.contract_precision<fp32>} : vector<8x8xf32>, vector<8x512xf32>, vector<8x512xf32> -> vector<8x512xf32>
    %c0_91 = arith.constant 0 : index
    %c0_92 = arith.constant 0 : index
    %164 = vector.load %arg11[%c0_91, %c0_92] : memref<8x1xf32, #tpu.memory_space<vmem>>, vector<8x1xf32>
    %165 = vector.broadcast %164 : vector<8x1xf32> to vector<8x512xf32>
    %166 = arith.addf %163, %165 : vector<8x512xf32>
    %167 = arith.addf %0, %166 : vector<8x512xf32>
    %c0_93 = arith.constant 0 : index
    %c0_94 = arith.constant 0 : index
    %168 = vector.load %arg15[%c0_93, %c0_94] : memref<8x512xf32, #tpu.memory_space<vmem>>, vector<8x512xf32>
    tpu.vector_store %arg15[%c0_93, %c0_94], %167 {strides = array<i32>} : memref<8x512xf32, #tpu.memory_space<vmem>>, vector<8x512xf32>,
    return
  }
  func.func @transform_0(%arg0: i32) -> (i32, i32) {
    %c0_i32 = arith.constant 0 : i32
    %c0_i32_0 = arith.constant 0 : i32
    return %c0_i32, %arg0 : i32, i32
  }
  func.func @transform_1(%arg0: i32) -> (i32, i32) {
    %c0_i32 = arith.constant 0 : i32
    %c0_i32_0 = arith.constant 0 : i32
    %c0_i32_1 = arith.constant 0 : i32
    return %c0_i32, %c0_i32_0 : i32, i32
  }
  func.func @transform_2(%arg0: i32) -> (i32, i32) {
    %c0_i32 = arith.constant 0 : i32
    %c0_i32_0 = arith.constant 0 : i32
    %c0_i32_1 = arith.constant 0 : i32
    return %c0_i32, %c0_i32_0 : i32, i32
  }
  func.func @transform_3(%arg0: i32) -> (i32, i32) {
    %c0_i32 = arith.constant 0 : i32
    %c0_i32_0 = arith.constant 0 : i32
    %c0_i32_1 = arith.constant 0 : i32
    return %c0_i32, %c0_i32_0 : i32, i32
  }
  func.func @transform_4(%arg0: i32) -> (i32, i32) {
    %c0_i32 = arith.constant 0 : i32
    %c0_i32_0 = arith.constant 0 : i32
    %c0_i32_1 = arith.constant 0 : i32
    return %c0_i32, %c0_i32_0 : i32, i32
  }
  func.func @transform_5(%arg0: i32) -> (i32, i32) {
    %c0_i32 = arith.constant 0 : i32
    %c0_i32_0 = arith.constant 0 : i32
    %c0_i32_1 = arith.constant 0 : i32
    return %c0_i32, %c0_i32_0 : i32, i32
  }
  func.func @transform_6(%arg0: i32) -> (i32, i32) {
    %c0_i32 = arith.constant 0 : i32
    %c0_i32_0 = arith.constant 0 : i32
    %c0_i32_1 = arith.constant 0 : i32
    return %c0_i32, %c0_i32_0 : i32, i32
  }
  func.func @transform_7(%arg0: i32) -> (i32, i32) {
    %c0_i32 = arith.constant 0 : i32
    %c0_i32_0 = arith.constant 0 : i32
    %c0_i32_1 = arith.constant 0 : i32
    return %c0_i32, %c0_i32_0 : i32, i32
  }
  func.func @transform_8(%arg0: i32) -> (i32, i32) {
    %c0_i32 = arith.constant 0 : i32
    %c0_i32_0 = arith.constant 0 : i32
    %c0_i32_1 = arith.constant 0 : i32
    return %c0_i32, %c0_i32_0 : i32, i32
  }
  func.func @transform_9(%arg0: i32) -> (i32, i32) {
    %c0_i32 = arith.constant 0 : i32
    %c0_i32_0 = arith.constant 0 : i32
    %c0_i32_1 = arith.constant 0 : i32
    return %c0_i32, %c0_i32_0 : i32, i32
  }
  func.func @transform_10(%arg0: i32) -> (i32, i32) {
    %c0_i32 = arith.constant 0 : i32
    %c0_i32_0 = arith.constant 0 : i32
    %c0_i32_1 = arith.constant 0 : i32
    return %c0_i32, %c0_i32_0 : i32, i32
  }
  func.func @transform_11(%arg0: i32) -> (i32, i32) {
    %c0_i32 = arith.constant 0 : i32
    %c0_i32_0 = arith.constant 0 : i32
    %c0_i32_1 = arith.constant 0 : i32
    return %c0_i32, %c0_i32_0 : i32, i32
  }
  func.func @transform_12(%arg0: i32) -> (i32, i32) {
    %c0_i32 = arith.constant 0 : i32
    %c0_i32_0 = arith.constant 0 : i32
    %c0_i32_1 = arith.constant 0 : i32
    return %c0_i32, %c0_i32_0 : i32, i32
  }
  func.func @transform_13(%arg0: i32) -> (i32, i32, i32) {
    %c0_i32 = arith.constant 0 : i32
    %c0_i32_0 = arith.constant 0 : i32
    %c0_i32_1 = arith.constant 0 : i32
    %c0_i32_2 = arith.constant 0 : i32
    return %c0_i32, %c0_i32_0, %c0_i32_1 : i32, i32, i32
  }
  func.func @transform_14(%arg0: i32) -> (i32, i32) {
    %c0_i32 = arith.constant 0 : i32
    %c0_i32_0 = arith.constant 0 : i32
    return %c0_i32, %arg0 : i32, i32
  }
}

</mosaic_0001>

<bundles_post_ra>
// kernel: tpu_custom_call.1
= control target key start
LH: loop header
LB: loop body
LE: loop exit
PB: predicated region body
PF: predicated region fallthrough
CT: control target
= control target key end

     0   :  { %19 = vsyncpa [#allocation5], 0  ;;  %s16392_s0 = inlined_call_operand.hbm [shape: f32[8,512], index: 0, kind: input, shape index: {}]   ;;  %s16393_s1 = inlined_call_operand.vmem [shape: f32[4,8], index: 1, kind: input, shape index: {}]   ;;  %s16394_s2 = inlined_call_operand.vmem [shape: f32[4,1], index: 2, kind: input, shape index: {}]   ;;  %s16395_s3 = inlined_call_operand.vmem [shape: f32[4,4], index: 3, kind: input, shape index: {}]   ;;  %s16396_s4 = inlined_call_operand.vmem [shape: f32[4,4], index: 4, kind: input, shape index: {}]   ;;  %s16397_s5 = inlined_call_operand.vmem [shape: f32[4,4], index: 5, kind: input, shape index: {}]   ;;  %s16398_s6 = inlined_call_operand.vmem [shape: f32[4,1], index: 6, kind: input, shape index: {}]   ;;  %s16399_s7 = inlined_call_operand.vmem [shape: f32[8,36], index: 7, kind: input, shape index: {}]   ;;  %s16400_s8 = inlined_call_operand.hbm [shape: f32[4,36], index: 8, kind: input, shape index: {}]   ;;  %s16401_s9 = inlined_call_operand.vmem [shape: f32[8,8], index: 9, kind: input, shape index: {}]   ;;  %s16402_s10 = inlined_call_operand.vmem [shape: f32[8,1], index: 10, kind: input, shape index: {}]   ;;  %s16403_s11 = inlined_call_operand.hbm [shape: f32[256,128], index: 11, kind: input, shape index: {}]   ;;  %s16404_s12 = inlined_call_operand.hbm [shape: f32[128,256], index: 12, kind: input, shape index: {}]   ;;  %s16405_s13 = inlined_call_operand.vmem [shape: f32[9,1,512], index: 13, kind: input, shape index: {}]   ;;  %s16406_s14 = inlined_call_operand.hbm [shape: f32[8,512], index: 14, kind: output, shape index: {}]  }
   0x1   :  { %20 = vsyncpa [#allocation8], 0 }
   0x2   :  { %21 = vsyncpa [#allocation11], 0 }
   0x3   :  { %22 = vsyncpa [#allocation6], 0  ;;  %s13150_s29 = smov [#allocation7]   ;;  %s13151_s15 = smov [#allocation4]  }
   0x4   :  { %s53_s30 = sshll.u32 %s13150_s29, 4  ;;  %s29_s16 = sshll.u32 %s13151_s15, 4  ;;  %s54_s30 = int_to_ptr.vmem [resolvable:$true] %s53_s30  ;;  %s30_s16 = int_to_ptr.vmem [resolvable:$true] %s29_s16 }
   0x5   :  { %s13032_s19 = scalar_lea.hbm %s16400_s8, 64 }
   0x6   :  { %p13033_p0 = scmp.ne.s32.totalorder %s16400_s8, %s13032_s19  ;;  %p13036_p1 = scmp.lt.u32.totalorder %s13032_s19, %s16400_s8 }
   0x8   :  { %p13038_p2 = pnand %p13036_p1, %p13033_p0 }
   0xa   :  { %13041 = shalt.err (!%p13038_p2)
}
   0xb   :  { %s13042_s24 = scalar_lea.vmem %s54_s30, 64  ;;  %p13047_p4 = scmp.lt.s32.totalorder %s54_s30, %s54_s30 }
   0xc   :  { %p13043_p3 = scmp.ne.s32.totalorder %s54_s30, %s13042_s24  ;;  %p13048_p5 = scmp.lt.s32.totalorder %s13042_s24, %s13042_s24 }
   0xe   :  { %p13049_p6 = por %p13048_p5, %p13047_p4 }
  0x10   :  { %p13050_p7 = pnand %p13049_p6, %p13043_p3 }
  0x12   :  { %13053 = shalt.err (!%p13050_p7)
}
  0x13   :  { %56 = dma.hbm_to_vmem [thread:$0]  %s16400_s8, 64, %s54_s30, [#allocation8]  }
  0x14   :  { %s13054_s29 = scalar_lea.hbm %s16392_s0, 512 }
  0x15   :  { %p13055_p8 = scmp.ne.s32.totalorder %s16392_s0, %s13054_s29  ;;  %p13058_p9 = scmp.lt.u32.totalorder %s13054_s29, %s16392_s0 }
  0x17   :  { %p13060_p10 = pnand %p13058_p9, %p13055_p8 }
  0x19   :  { %13063 = shalt.err (!%p13060_p10)
}
  0x1a   :  { %s13064_s20 = scalar_lea.vmem %s30_s16, 512  ;;  %p13069_p12 = scmp.lt.s32.totalorder %s30_s16, %s30_s16 }
  0x1b   :  { %p13065_p11 = scmp.ne.s32.totalorder %s30_s16, %s13064_s20  ;;  %p13070_p13 = scmp.lt.s32.totalorder %s13064_s20, %s13064_s20 }
  0x1d   :  { %p13071_p0 = por %p13070_p13, %p13069_p12 }
  0x1f   :  { %p13072_p1 = pnand %p13071_p0, %p13065_p11 }
  0x21   :  { %13075 = shalt.err (!%p13072_p1)
}
  0x22   :  { %32 = dma.hbm_to_vmem [thread:$0]  %s16392_s0, 512, %s30_s16, [#allocation5]  }
  0x23   :  { %s13152_s21 = smov [#allocation9]   ;;  %s13076_s25 = scalar_lea.hbm %s16403_s11, 4096 }
  0x24   :  { %s66_s22 = sshll.u32 %s13152_s21, 4  ;;  %p13077_p2 = scmp.ne.s32.totalorder %s16403_s11, %s13076_s25  ;;  %s67_s22 = int_to_ptr.vmem [resolvable:$true] %s66_s22 }
  0x25   :  { %p13080_p3 = scmp.lt.u32.totalorder %s13076_s25, %s16403_s11 }
  0x27   :  { %p13082_p4 = pnand %p13080_p3, %p13077_p2 }
  0x29   :  { %13085 = shalt.err (!%p13082_p4)
}
  0x2a   :  { %s13086_s15 = scalar_lea.vmem %s67_s22, 4096  ;;  %p13091_p6 = scmp.lt.s32.totalorder %s67_s22, %s67_s22 }
  0x2b   :  { %p13087_p5 = scmp.ne.s32.totalorder %s67_s22, %s13086_s15  ;;  %p13092_p7 = scmp.lt.s32.totalorder %s13086_s15, %s13086_s15 }
  0x2d   :  { %p13093_p8 = por %p13092_p7, %p13091_p6 }
  0x2f   :  { %p13094_p9 = pnand %p13093_p8, %p13087_p5 }
  0x31   :  { %13097 = shalt.err (!%p13094_p9)
}
  0x32   :  { %s13153_s0 = smov 128   ;;  %s13154_s16 = smov 8  }
  0x33   :  { %72 = dma.hbm_to_vmem [thread:$0]  %s16403_s11, 4096, %s67_s22, [#allocation8], %s13153_s0, %s13153_s0, %s13154_s16  }
  0x34   :  { %s13155_s19 = smov [#allocation10]   ;;  %s13098_s21 = scalar_lea.hbm %s16404_s12, 4096 }
  0x35   :  { %s78_s20 = sshll.u32 %s13155_s19, 4  ;;  %p13099_p10 = scmp.ne.s32.totalorder %s16404_s12, %s13098_s21  ;;  %s79_s20 = int_to_ptr.vmem [resolvable:$true] %s78_s20 }
  0x36   :  { %p13102_p11 = scmp.lt.u32.totalorder %s13098_s21, %s16404_s12 }
  0x38   :  { %p13104_p12 = pnand %p13102_p11, %p13099_p10 }
  0x3a   :  { %13107 = shalt.err (!%p13104_p12)
}
  0x3b   :  { %s13108_s27 = scalar_lea.vmem %s79_s20, 4096  ;;  %p13113_p0 = scmp.lt.s32.totalorder %s79_s20, %s79_s20 }
  0x3c   :  { %p13109_p13 = scmp.ne.s32.totalorder %s79_s20, %s13108_s27  ;;  %p13114_p1 = scmp.lt.s32.totalorder %s13108_s27, %s13108_s27 }
  0x3e   :  { %p13115_p2 = por %p13114_p1, %p13113_p0 }
  0x40   :  { %p13116_p3 = pnand %p13115_p2, %p13109_p13 }
  0x42   :  { %13119 = shalt.err (!%p13116_p3)
}
  0x43   :  { %s13156_s11 = smov 256   ;;  %s13157_s22 = smov 16  }
  0x44   :  { %84 = dma.hbm_to_vmem [thread:$0]  %s16404_s12, 4096, %s79_s20, [#allocation11], %s13156_s11, %s13156_s11, %s13157_s22  }
  0x45   :  { %13142 = dma.done.wait [#allocation5], 512  }
  0x46   :  { %13143 = vsyncadd [#allocation5], 4294966784 }
  0x47   :  { %13144 = dma.done.wait [#allocation8], 4160  }
  0x48   :  { %13145 = vsyncadd [#allocation8], 4294963136 }
  0x49   :  { %13146 = dma.done.wait [#allocation11], 4096  }
  0x4a   :  { %13147 = vsyncadd [#allocation11], 4294963200  ;;  %v16407_v0 = vmov 0.0   ;;  %v13159_v1 = vmov 0   ;;  %vm119_vm0 = vcmask 64512   ;;  %v100_v2 = vld [vmem:[#allocation4 + $0x8] sm:$0xff]  ;;  %v1061_v34 = vlaneseq }
  0x4b   :  { %189 = vmatprep.mubr.f32.mxu0 %v16407_v0  ;;  %654 = vmatprep.mubr.f32.mxu1 %v16407_v0  ;;  %v102_v3 = vld [vmem:[#allocation4 + $0x18] sm:$0xff]  ;;  %v99_v4 = vld [vmem:[#allocation4] sm:$0xff]  ;;  %v13294_v5 = vand.u32 4294901760, %v100_v2  ;;  %v101_v8 = vld [vmem:[#allocation4 + $0x10] sm:$0xff]  ;;  %s13160_s17 = smov 1   ;;  %s13161_s18 = smov 17  }
  0x4c   :  { %12994 = vset.pattern.permute.xlu0 %v13159_v1  ;;  %12995 = vset.pattern.permute.xlu1 %v13159_v1  ;;  %v13296_v6 = vand.u32 4294901760, %v102_v3  ;;  %v13298_v7 = vand.u32 4294901760, %v99_v4  ;;  %v112_v9 = vld [vmem:[%s16393_s1] sm:$0xf]  ;;  %v13303_v10 = vand.u32 4294901760, %v101_v8  ;;  %v1070_v35 = vshrl.u32 %v1061_v34, 7 }
  0x4d   :  { %v121_v11 = vsel %vm119_vm0, %v112_v9, 0  ;;  %v113_v12 = vld [vmem:[%s16394_s2] sm:$0xf]  ;;  %124 = vmatprep.subr.mxu0 %v13294_v5  ;;  %v202_v15 = vsub.f32 %v100_v2, %v13294_v5  ;;  %v107_v40 = vld [vmem:[%s16405_s13 + $0x10] sm:$0xf]  ;;  %s13162_s19 = smov 127  }
  0x4e   :  { %589 = vmatprep.subr.mxu1 %v13296_v6  ;;  %v208_v13 = vsub.f32 %v99_v4, %v13298_v7  ;;  %v13312_v14 = vand.u32 4294901760, %v121_v11  ;;  %126 = vmatpush1.msra.mxu0 %v13298_v7  ;;  %v673_v16 = vsub.f32 %v101_v8, %v13303_v10  ;;  %v667_v17 = vsub.f32 %v102_v3, %v13296_v6  ;;  %s13163_s20 = smov 15   ;;  %s13164_s8 = smov 112   ;;  %v13462_v2 = vld [vmem:[%s16405_s13 + $0x4] sm:$0xf] }
  0x4f   :  { %591 = vmatpush1.msra.mxu1 %v13303_v10  ;;  %v203_v19 = vand.u32 4294901760, %v202_v15  ;;  %116 = vperm.xlu0 %12994, %v113_v12   ;;  %v13347_v36 = vsub.s32 0, %v1070_v35  ;;  %v13349_v37 = vsub.s32 2, %v1070_v35  ;;  %v13351_v38 = vsub.s32 1, %v1070_v35  ;;  %s13165_s30 = smov 113   ;;  %s13166_s21 = smov 111  }
  0x50   :  { %v191_v18 = vsub.f32 %v121_v11, %v13312_v14  ;;  %v209_v20 = vand.u32 4294901760, %v208_v13  ;;  %v668_v21 = vand.u32 4294901760, %v667_v17  ;;  %v674_v22 = vand.u32 4294901760, %v673_v16  ;;  %v13467_v3 = vld [vmem:[%s16405_s13 + $0xc] sm:$0xf] }
  0x51   :  { %v204_v24 = vsub.f32 %v202_v15, %v203_v19  ;;  %v13353_v39 = vsub.s32 3, %v1070_v35  ;;  %v13359_v42 = vrot.slane %v107_v40, %v13347_v36  ;;  %v13362_v43 = vrot.slane %v107_v40, %v13349_v37 }
  0x52   :  { %v192_v23 = vand.u32 4294901760, %v191_v18  ;;  %v210_v25 = vsub.f32 %v208_v13, %v209_v20  ;;  %v669_v26 = vsub.f32 %v667_v17, %v668_v21  ;;  %v675_v27 = vsub.f32 %v673_v16, %v674_v22 }
  0x53   :  { %v205_v29 = vand.u32 4294901760, %v204_v24  ;;  %16665 = vst [vmem:[#allocation17_spill] sm:$0xff] %v13359_v42  ;;  %16666 = vst [vmem:[#allocation18_spill] sm:$0xff] %v13362_v43  ;;  %v13365_v46 = vrot.slane %v107_v40, %v13351_v38  ;;  %v13368_v47 = vrot.slane %v107_v40, %v13353_v39  ;;  %v13457_v1 = vand.u32 127, %v1061_v34 }
  0x54   :  { %v193_v28 = vsub.f32 %v191_v18, %v192_v23  ;;  %v670_v30 = vand.u32 4294901760, %v669_v26  ;;  %v211_v31 = vand.u32 4294901760, %v210_v25  ;;  %v676_v33 = vand.u32 4294901760, %v675_v27 }
  0x55   :  { %206 = vmatprep.subr.mxu0 %v205_v29  ;;  %16667 = vst [vmem:[#allocation19_spill] sm:$0xff] %v13365_v46  ;;  %16668 = vst [vmem:[#allocation20_spill] sm:$0xff] %v13368_v47  ;;  %vm1105_vm1 = vcmp.lt.s32.totalorder %v13457_v1, 16  ;;  %vm1201_vm2 = vcmp.lt.s32.totalorder %v13457_v1, 1  ;;  %vm1063_vm3 = vcmp.lt.s32.totalorder %v13457_v1, 17  ;;  %vm1284_vm4 = vcmp.lt.s32.totalorder %v13457_v1, 127 }
  0x56   :  { %v194_v32 = vand.u32 4294901760, %v193_v28  ;;  %671 = vmatprep.subr.mxu1 %v670_v30  ;;  %16673 = vst [vmem:[#allocation25_spill] sm:$0xff] %v13457_v1  ;;  %v13537_v28 = vld [vmem:[%s16405_s13 + $0x8] sm:$0xf]  ;;  %vm1489_vm5 = vcmask 293888   ;;  %vm1159_vm6 = vcmp.lt.s32.totalorder %v13457_v1, 15 }
  0x57   :  { %vm1380_vm7 = vcmp.lt.s32.totalorder %v13457_v1, 112  ;;  %vm1338_vm8 = vcmp.lt.s32.totalorder %v13457_v1, 113  ;;  %vm1434_vm9 = vcmp.lt.s32.totalorder %v13457_v1, 111  ;;  %vm1493_vm10 = vcmask 1043456  }
  0x58   :  { %195 = vmatmul.mubr.f32.vlgmr.msra.gmra.mrb[0].mxu0 %v194_v32  ;;  %660 = vmatmul.mubr.f32.vlgmr.msra.gmra.mrb[0].mxu1 %v194_v32  ;;  %vm2653_vm11 = vcmask 31744  }
  0x59   :  { %212 = vmatpush1.msra.mxu0 %v211_v31  ;;  %275 = vmatprep.mubr.f32.mxu0 %v16407_v0 }
  0x5a   :  { %677 = vmatpush1.msra.mxu1 %v676_v33  ;;  %740 = vmatprep.mubr.f32.mxu1 %v16407_v0 }
  0x5b   :  { %285 = vmatprep.subr.mxu0 %v202_v15  ;;  %750 = vmatprep.subr.mxu1 %v667_v17  ;;  %v13501_v15 = vrot.slane %v13467_v3, %v13347_v36 }
  0x5d   :  { %16677 = vst [vmem:[#allocation29_spill] sm:$0xff] %v13501_v15 }
  0x60   :  { %277 = vmatmul.mubr.f32.vlgmr.msra.gmra.mrb[0].mxu0 %v13312_v14  ;;  %742 = vmatmul.mubr.f32.vlgmr.msra.gmra.mrb[0].mxu1 %v13312_v14 }
  0x61   :  { %288 = vmatpush1.msra.mxu0 %v208_v13  ;;  %351 = vmatprep.mubr.f32.mxu0 %v16407_v0 }
  0x62   :  { %753 = vmatpush1.msra.mxu1 %v673_v16  ;;  %816 = vmatprep.mubr.f32.mxu1 %v16407_v0  ;;  %v13506_v16 = vld [vmem:[%s16405_s13] sm:$0xf] }
  0x63   :  { %361 = vmatprep.subr.mxu0 %v13294_v5  ;;  %826 = vmatprep.subr.mxu1 %v13296_v6  ;;  %v13528_v26 = vrot.slane %v13506_v16, %v13347_v36  ;;  %v13532_v27 = vrot.slane %v13506_v16, %v13351_v38 }
  0x65   :  { %16678 = vst [vmem:[#allocation30_spill] sm:$0xff] %v13528_v26  ;;  %16679 = vst [vmem:[#allocation31_spill] sm:$0xff] %v13532_v27 }
  0x68   :  { %354 = vmatmul.mubr.f32.vlgmr.msra.gmra.mrb[0].mxu0 %v191_v18  ;;  %819 = vmatmul.mubr.f32.vlgmr.msra.gmra.mrb[0].mxu1 %v191_v18 }
  0x69   :  { %363 = vmatpush1.msra.mxu0 %v13298_v7  ;;  %426 = vmatprep.mubr.f32.mxu0 %v16407_v0 }
  0x6a   :  { %828 = vmatpush1.msra.mxu1 %v13303_v10  ;;  %891 = vmatprep.mubr.f32.mxu1 %v16407_v0 }
  0x6b   :  { %439 = vmatprep.subr.mxu0 %v203_v19  ;;  %904 = vmatprep.subr.mxu1 %v668_v21 }
  0x70   :  { %430 = vmatmul.mubr.f32.vlgmr.msra.gmra.mrb[0].mxu0 %v192_v23  ;;  %895 = vmatmul.mubr.f32.vlgmr.msra.gmra.mrb[0].mxu1 %v192_v23  ;;  %v13522_v23 = vld [vmem:[%s16405_s13 + $0x14] sm:$0xf] }
  0x71   :  { %443 = vmatpush1.msra.mxu0 %v209_v20  ;;  %506 = vmatprep.mubr.f32.mxu0 %v16407_v0  ;;  %v13546_v33 = vrot.slane %v13522_v23, %v13347_v36  ;;  %v13556_v40 = vrot.slane %v13522_v23, %v13351_v38 }
  0x72   :  { %908 = vmatpush1.msra.mxu1 %v674_v22  ;;  %971 = vmatprep.mubr.f32.mxu1 %v16407_v0 }
  0x73   :  { %515 = vmatprep.subr.mxu0 %v13294_v5  ;;  %980 = vmatprep.subr.mxu1 %v13296_v6  ;;  %v13476_v6 = vrot.slane %v13462_v2, %v13351_v38  ;;  %16680 = vst [vmem:[#allocation32_spill] sm:$0xff] %v13546_v33  ;;  %16681 = vst [vmem:[#allocation33_spill] sm:$0xff] %v13556_v40 }
  0x75   :  { %16674 = vst [vmem:[#allocation26_spill] sm:$0xff] %v13476_v6 }
  0x78   :  { %508 = vmatmul.mubr.f32.vlgmr.msra.gmra.mrb[0].mxu0 %v13312_v14  ;;  %973 = vmatmul.mubr.f32.vlgmr.msra.gmra.mrb[0].mxu1 %v13312_v14 }
  0x79   :  { %517 = vmatpush1.msra.mxu0 %v13298_v7  ;;  %580 = vmatprep.mubr.f32.mxu0 %v16407_v0  ;;  %v13481_v7 = vrot.slane %v13467_v3, %v13351_v38 }
  0x7a   :  { %982 = vmatpush1.msra.mxu1 %v13303_v10  ;;  %1045 = vmatprep.mubr.f32.mxu1 %v16407_v0 }
  0x7b   :  { %16675 = vst [vmem:[#allocation27_spill] sm:$0xff] %v13481_v7 }
  0x80   :  { %582 = vmatmul.mubr.f32.vlgmr.msra.gmra.mrb[0].mxu0 %v13312_v14  ;;  %1047 = vmatmul.mubr.f32.vlgmr.msra.gmra.mrb[0].mxu1 %v13312_v14  ;;  %v13497_v14 = vrot.slane %v13462_v2, %v13347_v36 }
  0x81   :  { %1580 = vmatprep.mubr.f32.mxu1 %v16407_v0  ;;  %1706 = vmatprep.mubr.f32.mxu0 %v16407_v0 }
  0x82   :  { %16676 = vst [vmem:[#allocation28_spill] sm:$0xff] %v13497_v14 }
  0xce   :  { %v117_v41 = vpop.permute.xlu0 %116 }
 0x153   :  { %v583_v44 = vpop.f32.mrb[0].mxu0  ;;  %v1048_v45 = vpop.f32.mrb[0].mxu1 }
 0x154   :  { %v13370_v48 = vadd.f32 %v583_v44, %v117_v41  ;;  %v13372_v49 = vadd.f32 %v1048_v45, %v117_v41  ;;  %v585_v50 = vpop.f32.mrb[1].mxu0  ;;  %v1050_v51 = vpop.f32.mrb[1].mxu1  ;;  %v1468_v44 = vld [vmem:[%s16399_s7] sm:$0xff] }
 0x155   :  { %v13374_v52 = vadd.f32 %v585_v50, %v117_v41  ;;  %v13376_v53 = vadd.f32 %v1050_v51, %v117_v41  ;;  %v13561_v41 = vld [vmem:[%s16405_s13 + $0x1c] sm:$0xf]  ;;  %v13571_v51 = vrot.slane %v13537_v28, %v13351_v38 }
 0x156   :  { %16669 = vst [vmem:[#allocation21_spill] sm:$0xff] %v13370_v48  ;;  %16670 = vst [vmem:[#allocation22_spill] sm:$0xff] %v13372_v49  ;;  %1193 = vrot.lane.b32.xlu1 %v13370_v48, %s13160_s17  ;;  %1097 = vrot.lane.b32.xlu0 %v13370_v48, %s13157_s22  ;;  %v1268_v54 = vmul.f32 %v13370_v48, %v13359_v42  ;;  %v1270_v55 = vmul.f32 %v13372_v49, %v13362_v43 }
 0x157   :  { %16671 = vst [vmem:[#allocation23_spill] sm:$0xff] %v13374_v52  ;;  %16672 = vst [vmem:[#allocation24_spill] sm:$0xff] %v13376_v53  ;;  %v1269_v56 = vmul.f32 %v13374_v52, %v13365_v46  ;;  %v1271_v57 = vmul.f32 %v13376_v53, %v13368_v47  ;;  %v13716_v47 = vrot.slane %v13561_v41, %v13353_v39 }
 0x158   :  { %1272 = vst [vmem:[#allocation2 + $0x40] sm:$0xf] %v1268_v54  ;;  %1274 = vst [vmem:[#allocation2 + $0x50] sm:$0xf] %v1270_v55 }
 0x159   :  { %1273 = vst [vmem:[#allocation2 + $0x48] sm:$0xf] %v1269_v56  ;;  %1275 = vst [vmem:[#allocation2 + $0x58] sm:$0xf] %v1271_v57  ;;  %v13578_v56 = vrot.slane %v13561_v41, %v13347_v36  ;;  %v1491_v57 = vsel %vm1489_vm5, %v1468_v44, 0 }
 0x15a   :  { %1053 = vrot.lane.b32.xlu1 %v13370_v48, %s13161_s18  ;;  %1280 = vrot.lane.b32.xlu0 %v13372_v49, %s13162_s19  ;;  %16682 = vst [vmem:[#allocation34_spill] sm:$0xff] %v13571_v51  ;;  %16702 = vst [vmem:[#allocation54_spill] sm:$0xff] %v13716_v47 }
 0x15b   :  { %16683 = vst [vmem:[#allocation35_spill] sm:$0xff] %v13578_v56 }
 0x15e   :  { %1151 = vrot.lane.b32.xlu1 %v13370_v48, %s13163_s20  ;;  %1376 = vrot.lane.b32.xlu0 %v13372_v49, %s13164_s8 }
 0x162   :  { %1276 = vrot.lane.b32.xlu1 %v13370_v48, %s13162_s19  ;;  %1372 = vrot.lane.b32.xlu0 %v13370_v48, %s13164_s8 }
 0x166   :  { %1099 = vrot.lane.b32.xlu1 %v13374_v52, %s13157_s22  ;;  %1195 = vrot.lane.b32.xlu0 %v13374_v52, %s13160_s17 }
 0x16a   :  { %1103 = vrot.lane.b32.xlu1 %v13376_v53, %s13157_s22  ;;  %1199 = vrot.lane.b32.xlu0 %v13376_v53, %s13160_s17 }
 0x16e   :  { %1059 = vrot.lane.b32.xlu1 %v13376_v53, %s13161_s18  ;;  %1055 = vrot.lane.b32.xlu0 %v13374_v52, %s13161_s18 }
 0x172   :  { %1278 = vrot.lane.b32.xlu1 %v13374_v52, %s13162_s19  ;;  %1153 = vrot.lane.b32.xlu0 %v13374_v52, %s13163_s20 }
 0x176   :  { %1374 = vrot.lane.b32.xlu1 %v13374_v52, %s13164_s8  ;;  %1157 = vrot.lane.b32.xlu0 %v13376_v53, %s13163_s20 }
 0x17a   :  { %1332 = vrot.lane.b32.xlu1 %v13374_v52, %s13165_s30  ;;  %1334 = vrot.lane.b32.xlu0 %v13372_v49, %s13165_s30 }
 0x17e   :  { %1330 = vrot.lane.b32.xlu1 %v13370_v48, %s13165_s30  ;;  %1428 = vrot.lane.b32.xlu0 %v13374_v52, %s13166_s21 }
 0x182   :  { %1430 = vrot.lane.b32.xlu1 %v13372_v49, %s13166_s21  ;;  %1426 = vrot.lane.b32.xlu0 %v13370_v48, %s13166_s21 }
 0x186   :  { %1101 = vrot.lane.b32.xlu1 %v13372_v49, %s13157_s22  ;;  %1197 = vrot.lane.b32.xlu0 %v13372_v49, %s13160_s17 }
 0x18a   :  { %1057 = vrot.lane.b32.xlu1 %v13372_v49, %s13161_s18  ;;  %1155 = vrot.lane.b32.xlu0 %v13372_v49, %s13163_s20 }
 0x18e   :  { %1282 = vrot.lane.b32.xlu1 %v13376_v53, %s13162_s19  ;;  %1378 = vrot.lane.b32.xlu0 %v13376_v53, %s13164_s8 }
 0x192   :  { %1336 = vrot.lane.b32.xlu1 %v13376_v53, %s13165_s30  ;;  %1432 = vrot.lane.b32.xlu0 %v13376_v53, %s13166_s21 }
 0x1c8   :  { %v1194_v58 = vpop.permute.xlu1 %1193  ;;  %v1098_v59 = vpop.permute.xlu0 %1097 }
 0x1cc   :  { %v1054_v60 = vpop.permute.xlu1 %1053  ;;  %v13450_v61 = vpop.permute.xlu0 %1280 }
 0x1d0   :  { %v13452_v62 = vpop.permute.xlu1 %1151  ;;  %v13454_v63 = vpop.permute.xlu0 %1376 }
 0x1d4   :  { %v13469_v4 = vpop.permute.xlu1 %1276  ;;  %v13471_v5 = vpop.permute.xlu0 %1372 }
 0x1d8   :  { %v13483_v8 = vpop.permute.xlu1 %1099  ;;  %v13485_v9 = vpop.permute.xlu0 %1195 }
 0x1d9   :  { %v1108_v10 = vsel %vm1105_vm1, %v1098_v59, %v13483_v8  ;;  %v1204_v11 = vsel %vm1201_vm2, %v1194_v58, %v13485_v9 }
 0x1da   :  { %v1132_v12 = vmul.f32 %v13476_v6, %v1108_v10  ;;  %v1228_v13 = vmul.f32 %v13481_v7, %v1204_v11  ;;  %v13593_v10 = vrot.slane %v13561_v41, %v13351_v38  ;;  %v13598_v11 = vld [vmem:[%s16405_s13 + $0x18] sm:$0xf] }
 0x1db   :  { %v13739_v6 = vrot.slane %v13598_v11, %v13353_v39 }
 0x1dc   :  { %v1140_v17 = vrot.slane %v1132_v12, 4  ;;  %v1236_v18 = vrot.slane %v1228_v13, 4  ;;  %v13508_v19 = vpop.permute.xlu1 %1103  ;;  %v13510_v20 = vpop.permute.xlu0 %1199  ;;  %16684 = vst [vmem:[#allocation36_spill] sm:$0xff] %v13593_v10 }
 0x1dd   :  { %v1109_v21 = vsel %vm1105_vm1, %v13508_v19, %v1098_v59  ;;  %v1205_v22 = vsel %vm1201_vm2, %v13510_v20, %v1194_v58  ;;  %16706 = vst [vmem:[#allocation56_spill] sm:$0xff] %v13739_v6 }
 0x1de   :  { %1148 = vst [vmem:[#allocation2 + $0x8] sm:$0xf0] %v1140_v17  ;;  %1244 = vst [vmem:[#allocation2 + $0x28] sm:$0xf0] %v1236_v18  ;;  %v1131_v24 = vmul.f32 %v13497_v14, %v1109_v21  ;;  %v1227_v25 = vmul.f32 %v13501_v15, %v1205_v22  ;;  %v13605_v18 = vrot.slane %v13537_v28, %v13347_v36  ;;  %v13610_v21 = vld [vmem:[%s16405_s13 + $0x20] sm:$0xf] }
 0x1df   :  { %v13612_v22 = vand.u32 4294901760, %v1491_v57  ;;  %v13682_v15 = vrot.slane %v13506_v16, %v13353_v39  ;;  %v13760_v46 = vrot.slane %v13610_v21, %v13349_v37 }
 0x1e0   :  { %v1139_v29 = vrot.slane %v1131_v24, 4  ;;  %v1235_v30 = vrot.slane %v1227_v25, 4  ;;  %v13539_v31 = vpop.permute.xlu1 %1059  ;;  %v13541_v32 = vpop.permute.xlu0 %1055  ;;  %16685 = vst [vmem:[#allocation37_spill] sm:$0xff] %v13605_v18 }
 0x1e1   :  { %v1067_v34 = vsel %vm1063_vm3, %v13539_v31, %v1054_v60  ;;  %v1066_v35 = vsel %vm1063_vm3, %v1054_v60, %v13541_v32  ;;  %16695 = vst [vmem:[#allocation47_spill] sm:$0xff] %v13682_v15  ;;  %16707 = vst [vmem:[#allocation57_spill] sm:$0xff] %v13760_v46 }
 0x1e2   :  { %1147 = vst [vmem:[#allocation2] sm:$0xf0] %v1139_v29  ;;  %1243 = vst [vmem:[#allocation2 + $0x20] sm:$0xf0] %v1235_v30  ;;  %v1089_v45 = vmul.f32 %v13528_v26, %v1067_v34  ;;  %v1090_v50 = vmul.f32 %v13532_v27, %v1066_v35  ;;  %v13619_v34 = vrot.slane %v13598_v11, %v13351_v38 }
 0x1e4   :  { %1093 = vst [vmem:[#allocation2] sm:$0xf] %v1089_v45  ;;  %1094 = vst [vmem:[#allocation2 + $0x8] sm:$0xf] %v1090_v50  ;;  %v1279_v54 = vpop.permute.xlu1 %1278  ;;  %v13573_v55 = vpop.permute.xlu0 %1153  ;;  %v13633_v50 = vrot.slane %v13598_v11, %v13347_v36 }
 0x1e5   :  { %v1286_v58 = vsel %vm1284_vm4, %v1279_v54, %v13450_v61  ;;  %v1287_v59 = vsel %vm1284_vm4, %v13469_v4, %v1279_v54  ;;  %v1162_v60 = vsel %vm1159_vm6, %v13452_v62, %v13573_v55  ;;  %16686 = vst [vmem:[#allocation38_spill] sm:$0xff] %v13619_v34 }
 0x1e6   :  { %v1310_v12 = vmul.f32 %v13546_v33, %v1287_v59  ;;  %v1311_v13 = vmul.f32 %v13556_v40, %v1286_v58  ;;  %v1186_v17 = vmul.f32 %v13571_v51, %v1162_v60  ;;  %16687 = vst [vmem:[#allocation39_spill] sm:$0xff] %v13633_v50  ;;  %v13641_v60 = vrot.slane %v13610_v21, %v13351_v38 }
 0x1e8   :  { %v1318_v24 = vrot.slane %v1310_v12, 4  ;;  %v1319_v25 = vrot.slane %v1311_v13, 4  ;;  %1190 = vst [vmem:[#allocation2 + $0x28] sm:$0xf] %v1186_v17  ;;  %v1375_v29 = vpop.permute.xlu1 %1374  ;;  %v13614_v30 = vpop.permute.xlu0 %1157  ;;  %16688 = vst [vmem:[#allocation40_spill] sm:$0xff] %v13641_v60  ;;  %v13649_v13 = vrot.slane %v13462_v2, %v13349_v37  ;;  %v13653_v17 = vrot.slane %v13462_v2, %v13353_v39 }
 0x1e9   :  { %v1382_v35 = vsel %vm1380_vm7, %v1375_v29, %v13454_v63  ;;  %v1383_v44 = vsel %vm1380_vm7, %v13471_v5, %v1375_v29  ;;  %v1163_v45 = vsel %vm1159_vm6, %v13614_v30, %v13452_v62  ;;  %v13645_v62 = vrot.slane %v13610_v21, %v13347_v36 }
 0x1ea   :  { %1326 = vst [vmem:[#allocation2 + $0x40] sm:$0xf0] %v1318_v24  ;;  %1327 = vst [vmem:[#allocation2 + $0x48] sm:$0xf0] %v1319_v25  ;;  %v1406_v54 = vmul.f32 %v13578_v56, %v1383_v44  ;;  %v1407_v58 = vmul.f32 %v13593_v10, %v1382_v35  ;;  %v1185_v59 = vmul.f32 %v13605_v18, %v1163_v45 }
 0x1eb   :  { %v1470_v12 = vld [vmem:[#allocation2 + $0x8] sm:$0xff]  ;;  %16689 = vst [vmem:[#allocation41_spill] sm:$0xff] %v13645_v62  ;;  %16690 = vst [vmem:[#allocation42_spill] sm:$0xff] %v13649_v13  ;;  %v1469_v24 = vld [vmem:[#allocation2] sm:$0xff]  ;;  %v13656_v25 = vsub.f32 %v1491_v57, %v13612_v22  ;;  %v13665_v2 = vrot.slane %v13467_v3, %v13349_v37  ;;  %v13669_v57 = vrot.slane %v13467_v3, %v13353_v39 }
 0x1ec   :  { %16691 = vst [vmem:[#allocation43_spill] sm:$0xff] %v13653_v17  ;;  %v1414_v29 = vrot.slane %v1406_v54, 4  ;;  %v1415_v38 = vrot.slane %v1407_v58, 4  ;;  %1189 = vst [vmem:[#allocation2 + $0x20] sm:$0xf] %v1185_v59  ;;  %v1333_v35 = vpop.permute.xlu1 %1332  ;;  %v13658_v44 = vpop.permute.xlu0 %1334  ;;  %v1506_v36 = vand.u32 4294901760, %v1470_v12  ;;  %v13673_v54 = vrot.slane %v13506_v16, %v13349_v37 }
 0x1ed   :  { %v1508_v45 = vand.u32 4294901760, %v1469_v24  ;;  %v1340_v0 = vsel %vm1338_vm8, %v1333_v35, %v13658_v44  ;;  %16692 = vst [vmem:[#allocation44_spill] sm:$0xff] %v13665_v2  ;;  %16693 = vst [vmem:[#allocation45_spill] sm:$0xff] %v13669_v57  ;;  %v13686_v3 = vrot.slane %v13537_v28, %v13349_v37  ;;  %v13690_v10 = vrot.slane %v13537_v28, %v13353_v39 }
 0x1ee   :  { %16694 = vst [vmem:[#allocation46_spill] sm:$0xff] %v13673_v54  ;;  %1422 = vst [vmem:[#allocation2 + $0x60] sm:$0xf0] %v1414_v29  ;;  %v1365_v58 = vmul.f32 %v13619_v34, %v1340_v0  ;;  %v13676_v59 = vsub.f32 %v1470_v12, %v1506_v36  ;;  %v13694_v0 = vrot.slane %v13522_v23, %v13349_v37  ;;  %v13697_v12 = vand.u32 4294901760, %v13656_v25 }
 0x1ef   :  { %1423 = vst [vmem:[#allocation2 + $0x68] sm:$0xf0] %v1415_v38  ;;  %v13678_v18 = vsub.f32 %v1469_v24, %v1508_v45  ;;  %v1474_v26 = vld [vmem:[#allocation2 + $0x28] sm:$0xff]  ;;  %16696 = vst [vmem:[#allocation48_spill] sm:$0xff] %v13686_v3  ;;  %v13704_v34 = vrot.slane %v13522_v23, %v13353_v39  ;;  %v13722_v23 = vrot.slane %v13598_v11, %v13349_v37 }
 0x1f0   :  { %16697 = vst [vmem:[#allocation49_spill] sm:$0xff] %v13690_v10  ;;  %16698 = vst [vmem:[#allocation50_spill] sm:$0xff] %v13694_v0  ;;  %v13699_v24 = vpop.permute.xlu1 %1330  ;;  %v1429_v16 = vpop.permute.xlu0 %1428  ;;  %v1510_v29 = vand.u32 4294901760, %v1474_v26  ;;  %v16704_v51 = vand.u32 4294901760, %v13676_v59 }
 0x1f1   :  { %16699 = vst [vmem:[#allocation51_spill] sm:$0xff] %v13697_v12  ;;  %1369 = vst [vmem:[#allocation2 + $0x68] sm:$0xf] %v1365_v58  ;;  %v1341_v14 = vsel %vm1338_vm8, %v13699_v24, %v1333_v35  ;;  %v1478_v40 = vld [vmem:[#allocation2 + $0x48] sm:$0xff]  ;;  %v13712_v58 = vrot.slane %v13561_v41, %v13349_v37  ;;  %v13718_v38 = vld [vmem:[#allocation2 + $0x40] sm:$0xff]  ;;  %v16705_v41 = vand.u32 4294901760, %v13678_v18 }
 0x1f2   :  { %16700 = vst [vmem:[#allocation52_spill] sm:$0xff] %v13704_v34  ;;  %16703 = vst [vmem:[#allocation55_spill] sm:$0xff] %v13722_v23  ;;  %v1364_v28 = vmul.f32 %v13633_v50, %v1341_v14  ;;  %v13725_v43 = vpack.c.bf16 %v1510_v29, %v1506_v36  ;;  %v13727_v35 = vsub.f32 %v1474_v26, %v1510_v29  ;;  %v1514_v56 = vand.u32 4294901760, %v1478_v40 }
 0x1f3   :  { %16701 = vst [vmem:[#allocation53_spill] sm:$0xff] %v13712_v58  ;;  %v1473_v33 = vld [vmem:[#allocation2 + $0x20] sm:$0xff]  ;;  %v1595_v27 = vsub.f32 %v13676_v59, %v16704_v51  ;;  %v13735_v7 = vsub.f32 %v13678_v18, %v16705_v41  ;;  %v1584_v14 = vsub.f32 %v13656_v25, %v13697_v12 }
 0x1f4   :  { %1368 = vst [vmem:[#allocation2 + $0x60] sm:$0xf] %v1364_v28  ;;  %v13743_v26 = vpop.permute.xlu1 %1430  ;;  %11845 = vmatprep.subr.bf16.mxu1 %v13725_v43  ;;  %v13746_v36 = vpop.permute.xlu0 %1426  ;;  %v1512_v51 = vand.u32 4294901760, %v1473_v33  ;;  %v13748_v29 = vsub.f32 %v1478_v40, %v1514_v56  ;;  %v13764_v40 = vrot.slane %v13610_v21, %v13353_v39 }
 0x1f5   :  { %v1436_v11 = vsel %vm1434_vm9, %v1429_v16, %v13743_v26  ;;  %v1437_v28 = vsel %vm1434_vm9, %v13746_v36, %v1429_v16  ;;  %v1596_v48 = vand.u32 4294901760, %v1595_v27  ;;  %v16709_v16 = vand.u32 4294901760, %v13727_v35 }
 0x1f6   :  { %16708 = vst [vmem:[#allocation58_spill] sm:$0xff] %v13764_v40  ;;  %v1461_v41 = vmul.f32 %v13641_v60, %v1436_v11  ;;  %v1460_v50 = vmul.f32 %v13645_v62, %v1437_v28  ;;  %v13768_v42 = vpack.c.bf16 %v1512_v51, %v1508_v45  ;;  %v13770_v49 = vsub.f32 %v1473_v33, %v1512_v51 }
 0x1f7   :  { %v1607_v52 = vsub.f32 %v13727_v35, %v16709_v16  ;;  %v13776_v12 = vand.u32 4294901760, %v1584_v14  ;;  %v16710_v27 = vand.u32 4294901760, %v13718_v38 }
 0x1f8   :  { %v1482_v53 = vld [vmem:[#allocation2 + $0x68] sm:$0xff]  ;;  %1465 = vst [vmem:[#allocation2 + $0x88] sm:$0xf] %v1461_v41  ;;  %1464 = vst [vmem:[#allocation2 + $0x80] sm:$0xf] %v1460_v50  ;;  %v1102_v39 = vpop.permute.xlu1 %1101  ;;  %11847 = vmatpush1.bf16.msra.mxu1 %v13768_v42  ;;  %v1198_v21 = vpop.permute.xlu0 %1197 }
 0x1f9   :  { %v1518_v45 = vand.u32 4294901760, %v1482_v53  ;;  %v13783_v51 = vsub.f32 %v13718_v38, %v16710_v27  ;;  %v1106_v14 = vsel %vm1105_vm1, %v1102_v39, %v13508_v19  ;;  %v1107_v50 = vsel %vm1105_vm1, %v13483_v8, %v1102_v39 }
 0x1fa   :  { %v1202_v41 = vsel %vm1201_vm2, %v1198_v21, %v13510_v20  ;;  %v1203_v28 = vsel %vm1201_vm2, %v13485_v9, %v1198_v21  ;;  %v1133_v16 = vmul.f32 %v13649_v13, %v1107_v50  ;;  %v1134_v27 = vmul.f32 %v13653_v17, %v1106_v14  ;;  %v3628_v17 = vld [vmem:[#allocation9 + $0xe8] sm:$0xff] }
 0x1fb   :  { %v1229_v37 = vmul.f32 %v13665_v2, %v1203_v28  ;;  %v1230_v19 = vmul.f32 %v13669_v57, %v1202_v41  ;;  %v13802_v11 = vpack.c.bf16 %v1518_v45, %v1514_v56  ;;  %v13804_v33 = vsub.f32 %v1482_v53, %v1518_v45  ;;  %v1481_v14 = vld [vmem:[#allocation2 + $0x60] sm:$0xff]  ;;  %v14358_v2 = vld [vmem:[#allocation9 + $0x50] sm:$0xff] }
 0x1fc   :  { %v1608_v8 = vand.u32 4294901760, %v1607_v52  ;;  %v16711_v39 = vand.u32 4294901760, %v13770_v49  ;;  %v1141_v62 = vrot.slane %v1133_v16, 4  ;;  %v1142_v60 = vrot.slane %v1134_v27, 4  ;;  %v1058_v50 = vpop.permute.xlu1 %1057  ;;  %v1156_v13 = vpop.permute.xlu0 %1155 }
 0x1fd   :  { %v1237_v9 = vrot.slane %v1229_v37, 4  ;;  %v1238_v21 = vrot.slane %v1230_v19, 4  ;;  %v1064_v41 = vsel %vm1063_vm3, %v1058_v50, %v13539_v31  ;;  %v1065_v53 = vsel %vm1063_vm3, %v13541_v32, %v1058_v50  ;;  %11849 = vmatprep.subr.bf16.mxu1 %v13802_v11 }
 0x1fe   :  { %v1613_v20 = vsub.f32 %v13770_v49, %v16711_v39  ;;  %v11852_v52 = vpack.c.bf16 %v1608_v8, %v1596_v48  ;;  %v1160_v56 = vsel %vm1159_vm6, %v1156_v13, %v13614_v30  ;;  %1149 = vst [vmem:[#allocation2 + $0x10] sm:$0xf0] %v1141_v62  ;;  %1150 = vst [vmem:[#allocation2 + $0x18] sm:$0xf0] %v1142_v60  ;;  %v1520_v16 = vand.u32 4294901760, %v1481_v14 }
 0x1ff   :  { %1245 = vst [vmem:[#allocation2 + $0x30] sm:$0xf0] %v1237_v9  ;;  %1246 = vst [vmem:[#allocation2 + $0x38] sm:$0xf0] %v1238_v21  ;;  %v1091_v37 = vmul.f32 %v13673_v54, %v1065_v53  ;;  %v1092_v45 = vmul.f32 %v13682_v15, %v1064_v41  ;;  %v1161_v31 = vsel %vm1159_vm6, %v13573_v55, %v1156_v13  ;;  %v1486_v30 = vld [vmem:[#allocation2 + $0x88] sm:$0xf] }
 0x200   :  { %v1188_v32 = vmul.f32 %v13690_v10, %v1160_v56  ;;  %11853 = vmatprep.subr.bf16.mxu0 %v11852_v52  ;;  %v1187_v48 = vmul.f32 %v13686_v3, %v1161_v31  ;;  %v1614_v28 = vand.u32 4294901760, %v1613_v20  ;;  %v16712_v60 = vand.u32 4294901760, %v13748_v29  ;;  %v1485_v27 = vld [vmem:[#allocation2 + $0x80] sm:$0xf]  ;;  %v1283_v19 = vpop.permute.xlu1 %1282  ;;  %v1379_v8 = vpop.permute.xlu0 %1378 }
 0x201   :  { %1095 = vst [vmem:[#allocation2 + $0x10] sm:$0xf] %v1091_v37  ;;  %1096 = vst [vmem:[#allocation2 + $0x18] sm:$0xf] %v1092_v45  ;;  %v1498_v55 = vsel %vm1493_vm10, %v1486_v30, 0  ;;  %v16444_v13 = vand.u32 4294901760, %v13804_v33  ;;  %v1285_v9 = vsel %vm1284_vm4, %v13450_v61, %v1283_v19  ;;  %v1288_v21 = vsel %vm1284_vm4, %v1283_v19, %v13469_v4 }
 0x202   :  { %v1619_v62 = vsub.f32 %v13748_v29, %v16712_v60  ;;  %1192 = vst [vmem:[#allocation2 + $0x38] sm:$0xf] %v1188_v32  ;;  %v1495_v39 = vsel %vm1493_vm10, %v1485_v27, 0  ;;  %v16443_v20 = vand.u32 4294901760, %v13783_v51  ;;  %1191 = vst [vmem:[#allocation2 + $0x30] sm:$0xf] %v1187_v48  ;;  %v1381_v53 = vsel %vm1380_vm7, %v13454_v63, %v1379_v8 }
 0x203   :  { %v16713_v50 = vand.u32 4294901760, %v13735_v7  ;;  %v1312_v52 = vmul.f32 %v13694_v0, %v1285_v9  ;;  %v1313_v56 = vmul.f32 %v13704_v34, %v1288_v21  ;;  %v1384_v37 = vsel %vm1380_vm7, %v1379_v8, %v13471_v5  ;;  %v14362_v34 = vld [vmem:[#allocation9 + $0xe0] sm:$0xff] }
 0x204   :  { %v1408_v61 = vmul.f32 %v13712_v58, %v1381_v53  ;;  %v1409_v4 = vmul.f32 %v13716_v47, %v1384_v37  ;;  %v16714_v7 = vand.u32 4294901760, %v13718_v38  ;;  %v13855_v31 = vsub.f32 %v1481_v14, %v1520_v16  ;;  %v1337_v30 = vpop.permute.xlu1 %1336  ;;  %v1433_v27 = vpop.permute.xlu0 %1432 }
 0x205   :  { %v11854_v41 = vpack.c.bf16 %v1614_v28, %v16713_v50  ;;  %v13857_v63 = vand.u32 4294901760, %v1498_v55  ;;  %v1320_v32 = vrot.slane %v1312_v52, 4  ;;  %v1321_v48 = vrot.slane %v1313_v56, 4 }
 0x206   :  { %v13853_v45 = vpack.c.bf16 %v1520_v16, %v16714_v7  ;;  %v1416_v28 = vrot.slane %v1408_v61, 4  ;;  %v1620_v60 = vand.u32 4294901760, %v1619_v62  ;;  %v1417_v5 = vrot.slane %v1409_v4, 4 }
 0x207   :  { %11855 = vmatpush1.bf16.msra.mxu0 %v11854_v41  ;;  %v1339_v19 = vsel %vm1338_vm8, %v13658_v44, %v1337_v30  ;;  %v1342_v38 = vsel %vm1338_vm8, %v1337_v30, %v13699_v24  ;;  %v1631_v14 = vsub.f32 %v13804_v33, %v16444_v13  ;;  %1328 = vst [vmem:[#allocation2 + $0x50] sm:$0xf0] %v1320_v32  ;;  %1329 = vst [vmem:[#allocation2 + $0x58] sm:$0xf0] %v1321_v48 }
 0x208   :  { %11851 = vmatpush1.bf16.msra.mxu1 %v13853_v45  ;;  %1424 = vst [vmem:[#allocation2 + $0x70] sm:$0xf0] %v1416_v28  ;;  %v1366_v16 = vmul.f32 %v13722_v23, %v1339_v19  ;;  %v1367_v62 = vmul.f32 %v13739_v6, %v1342_v38  ;;  %v1435_v44 = vsel %vm1434_vm9, %v13743_v26, %v1433_v27  ;;  %1425 = vst [vmem:[#allocation2 + $0x78] sm:$0xf0] %v1417_v5  ;;  %v1472_v41 = vld [vmem:[#allocation2 + $0x18] sm:$0xff]  ;;  %v1471_v52 = vld [vmem:[#allocation2 + $0x10] sm:$0xff] }
 0x209   :  { %1523 = vmatprep.subr.mxu1 %v13857_v63  ;;  %v1438_v24 = vsel %vm1434_vm9, %v1433_v27, %v13746_v36  ;;  %v1632_v8 = vand.u32 4294901760, %v1631_v14  ;;  %v1462_v9 = vmul.f32 %v13760_v46, %v1435_v44  ;;  %v13880_v50 = vand.u32 4294901760, %v1495_v39  ;;  %v1476_v53 = vld [vmem:[#allocation2 + $0x38] sm:$0xff]  ;;  %v1475_v61 = vld [vmem:[#allocation2 + $0x30] sm:$0xff] }
 0x20a   :  { %v1463_v21 = vmul.f32 %v13764_v40, %v1438_v24  ;;  %1370 = vst [vmem:[#allocation2 + $0x70] sm:$0xf] %v1366_v16  ;;  %1371 = vst [vmem:[#allocation2 + $0x78] sm:$0xf] %v1367_v62  ;;  %v1625_v26 = vsub.f32 %v13783_v51, %v16443_v20  ;;  %v16442_v56 = vand.u32 4294901760, %v13855_v31  ;;  %v13887_v36 = vsub.f32 %v1498_v55, %v13857_v63  ;;  %v3625_v6 = vld [vmem:[#allocation9 + $0xd0] sm:$0xff] }
 0x20b   :  { %v2075_v37 = vand.u32 4294901760, %v1472_v41  ;;  %v11856_v4 = vpack.c.bf16 %v1632_v8, %v1620_v60  ;;  %1466 = vst [vmem:[#allocation2 + $0x90] sm:$0xf] %v1462_v9  ;;  %v13891_v7 = vsub.f32 %v1495_v39, %v13880_v50  ;;  %v2079_v32 = vand.u32 4294901760, %v1476_v53  ;;  %v3626_v23 = vld [vmem:[#allocation9 + $0xd8] sm:$0xff] }
 0x20c   :  { %1467 = vst [vmem:[#allocation2 + $0x98] sm:$0xf] %v1463_v21  ;;  %1525 = vmatpush1.msra.mxu1 %v13880_v50  ;;  %v2077_v48 = vand.u32 4294901760, %v1471_v52  ;;  %v1637_v28 = vsub.f32 %v13855_v31, %v16442_v56  ;;  %v16441_v30 = vand.u32 4294901760, %v13887_v36  ;;  %v2081_v39 = vand.u32 4294901760, %v1475_v61 }
 0x20d   :  { %v13897_v55 = vsub.f32 %v1472_v41, %v2075_v37  ;;  %1586 = vmatmul.mubr.f32.vlgmr.msra.gmra.mrb[2].mxu1 %v13776_v12  ;;  %11857 = vmatprep.subr.bf16.mxu0 %v11856_v4  ;;  %v16440_v60 = vand.u32 4294901760, %v13891_v7  ;;  %v13901_v27 = vpack.c.bf16 %v2079_v32, %v2075_v37  ;;  %v13903_v5 = vsub.f32 %v1476_v53, %v2079_v32 }
 0x20e   :  { %v16715_v19 = vmov 0.0   ;;  %v1626_v38 = vand.u32 4294901760, %v1625_v26  ;;  %v1638_v14 = vand.u32 4294901760, %v1637_v28  ;;  %v1643_v16 = vsub.f32 %v13887_v36, %v16441_v30  ;;  %v1480_v21 = vld [vmem:[#allocation2 + $0x58] sm:$0xff]  ;;  %v1479_v41 = vld [vmem:[#allocation2 + $0x50] sm:$0xff] }
 0x20f   :  { %2149 = vmatprep.mubr.f32.mxu1 %v16715_v19  ;;  %v13909_v62 = vsub.f32 %v1471_v52, %v2077_v48  ;;  %v1649_v44 = vsub.f32 %v13891_v7, %v16440_v60  ;;  %11893 = vmatprep.subr.bf16.mxu1 %v13901_v27  ;;  %v11860_v24 = vpack.c.bf16 %v13727_v35, %v13676_v59  ;;  %v2083_v37 = vand.u32 4294901760, %v1480_v21 }
 0x210   :  { %v13917_v8 = vpack.c.bf16 %v2081_v39, %v2077_v48  ;;  %v13919_v9 = vsub.f32 %v1475_v61, %v2081_v39  ;;  %v11858_v53 = vpack.c.bf16 %v1638_v14, %v1626_v38  ;;  %v1644_v26 = vand.u32 4294901760, %v1643_v16 }
 0x211   :  { %v2085_v52 = vand.u32 4294901760, %v1479_v41  ;;  %v1650_v4 = vand.u32 4294901760, %v1649_v44  ;;  %v1484_v32 = vld [vmem:[#allocation2 + $0x78] sm:$0xff]  ;;  %v1483_v28 = vld [vmem:[#allocation2 + $0x70] sm:$0xff]  ;;  %v16446_v60 = vand.u32 4294901760, %v13897_v55  ;;  %v16447_v30 = vand.u32 4294901760, %v13903_v5 }
 0x212   :  { %11895 = vmatpush1.bf16.msra.mxu1 %v13917_v8  ;;  %11859 = vmatpush1.bf16.msra.mxu0 %v11858_v53  ;;  %v2087_v61 = vand.u32 4294901760, %v1484_v32  ;;  %v13925_v39 = vsub.f32 %v1480_v21, %v2083_v37  ;;  %v2089_v56 = vand.u32 4294901760, %v1483_v28  ;;  %v1487_v16 = vld [vmem:[#allocation2 + $0x90] sm:$0xf] }
 0x213   :  { %v13927_v38 = vsub.f32 %v1479_v41, %v2085_v52  ;;  %v1488_v14 = vld [vmem:[#allocation2 + $0x98] sm:$0xf]  ;;  %1645 = vmatprep.subr.mxu0 %v1644_v26  ;;  %v1501_v20 = vsel %vm1493_vm10, %v1487_v16, 0  ;;  %v2164_v13 = vsub.f32 %v13897_v55, %v16446_v60  ;;  %v2176_v53 = vsub.f32 %v13903_v5, %v16447_v30 }
 0x214   :  { %v1504_v44 = vsel %vm1493_vm10, %v1488_v14, 0  ;;  %v13937_v21 = vpack.c.bf16 %v2087_v61, %v2083_v37  ;;  %v13939_v48 = vsub.f32 %v1484_v32, %v2087_v61  ;;  %v13941_v41 = vpack.c.bf16 %v2089_v56, %v2085_v52 }
 0x215   :  { %v13943_v40 = vsub.f32 %v1483_v28, %v2089_v56  ;;  %v11862_v26 = vpack.c.bf16 %v13770_v49, %v13678_v18  ;;  %v11864_v14 = vpack.c.bf16 %v13804_v33, %v13748_v29  ;;  %v13949_v16 = vand.u32 4294901760, %v1504_v44 }
 0x216   :  { %v13951_v60 = vand.u32 4294901760, %v1501_v20  ;;  %1651 = vmatpush1.msra.mxu0 %v1650_v4  ;;  %11897 = vmatprep.subr.bf16.mxu1 %v13937_v21  ;;  %v16716_v37 = vand.u32 4294901760, %v13909_v62  ;;  %v16449_v56 = vand.u32 4294901760, %v13919_v9  ;;  %v16450_v32 = vand.u32 4294901760, %v13925_v39 }
 0x217   :  { %11861 = vmatprep.subr.bf16.mxu0 %v11860_v24  ;;  %1708 = vmatmul.mubr.f32.vlgmr.msra.gmra.mrb[2].mxu0 %v13612_v22  ;;  %v2165_v61 = vand.u32 4294901760, %v2164_v13  ;;  %v2177_v30 = vand.u32 4294901760, %v2176_v53  ;;  %v16454_v4 = vand.u32 4294901760, %v13943_v40  ;;  %v16717_v24 = vand.u32 4294901760, %v13939_v48 }
 0x218   :  { %v2170_v52 = vsub.f32 %v13909_v62, %v16716_v37  ;;  %11863 = vmatpush1.bf16.msra.mxu0 %v11862_v26  ;;  %11899 = vmatpush1.bf16.msra.mxu1 %v13941_v41  ;;  %v2182_v37 = vsub.f32 %v13919_v9, %v16449_v56  ;;  %v2188_v28 = vsub.f32 %v13925_v39, %v16450_v32 }
 0x219   :  { %v2200_v13 = vsub.f32 %v13939_v48, %v16717_v24  ;;  %11865 = vmatprep.subr.bf16.mxu0 %v11864_v14  ;;  %2092 = vmatprep.subr.mxu1 %v13949_v16  ;;  %v13975_v53 = vsub.f32 %v1501_v20, %v13951_v60  ;;  %v2206_v46 = vsub.f32 %v13943_v40, %v16454_v4  ;;  %v16718_v20 = vand.u32 4294901760, %v13927_v38 }
 0x21a   :  { %v2171_v26 = vand.u32 4294901760, %v2170_v52  ;;  %v13981_v56 = vsub.f32 %v1504_v44, %v13949_v16  ;;  %v11866_v32 = vpack.c.bf16 %v13855_v31, %v13783_v51  ;;  %1798 = vmatprep.mubr.f32.mxu0 %v16715_v19  ;;  %v2183_v24 = vand.u32 4294901760, %v2182_v37 }
 0x21b   :  { %v2189_v14 = vand.u32 4294901760, %v2188_v28  ;;  %v2201_v47 = vand.u32 4294901760, %v2200_v13  ;;  %v11900_v58 = vpack.c.bf16 %v2177_v30, %v2165_v61  ;;  %v2194_v52 = vsub.f32 %v13927_v38, %v16718_v20 }
 0x21c   :  { %v2211_v10 = vand.u32 4294901760, %v13981_v56  ;;  %11867 = vmatpush1.bf16.msra.mxu0 %v11866_v32  ;;  %2094 = vmatpush1.msra.mxu1 %v13951_v60  ;;  %v11902_v4 = vpack.c.bf16 %v2183_v24, %v2171_v26  ;;  %v2207_v3 = vand.u32 4294901760, %v2206_v46  ;;  %v2217_v37 = vand.u32 4294901760, %v13975_v53  ;;  %v2652_v24 = vld [vmem:[%s16395_s3] sm:$0xf] }
 0x21d   :  { %v11904_v44 = vpack.c.bf16 %v2201_v47, %v2189_v14  ;;  %1740 = vmatprep.subr.mxu0 %v13887_v36  ;;  %11901 = vmatprep.subr.bf16.mxu1 %v11900_v58  ;;  %v2195_v28 = vand.u32 4294901760, %v2194_v52  ;;  %v11908_v32 = vpack.c.bf16 %v13903_v5, %v13897_v55  ;;  %v11912_v61 = vpack.c.bf16 %v13939_v48, %v13925_v39 }
 0x21e   :  { %2155 = vmatmul.mubr.f32.vlgmr.msra.gmra.mrb[4].mxu1 %v13776_v12  ;;  %v2212_v30 = vsub.f32 %v13981_v56, %v2211_v10  ;;  %v2218_v47 = vsub.f32 %v13975_v53, %v2217_v37  ;;  %v16720_v13 = vand.u32 4294901760, %v13727_v35  ;;  %v16721_v14 = vand.u32 4294901760, %v13678_v18 }
 0x21f   :  { %11903 = vmatpush1.bf16.msra.mxu1 %v11902_v4  ;;  %2275 = vmatprep.mubr.f32.mxu1 %v16715_v19  ;;  %v11906_v46 = vpack.c.bf16 %v2207_v3, %v2195_v28  ;;  %v11910_v3 = vpack.c.bf16 %v13919_v9, %v13909_v62  ;;  %v16719_v4 = vand.u32 4294901760, %v13676_v59  ;;  %v16722_v20 = vand.u32 4294901760, %v13770_v49  ;;  %v16723_v59 = vld [vmem:[#allocation51_spill] sm:$0xff] }
 0x220   :  { %1743 = vmatpush1.msra.mxu0 %v13891_v7  ;;  %11905 = vmatprep.subr.bf16.mxu1 %v11904_v44  ;;  %v2213_v12 = vand.u32 4294901760, %v2212_v30  ;;  %v2219_v58 = vand.u32 4294901760, %v2218_v47  ;;  %v16724_v35 = vand.u32 4294901760, %v13748_v29  ;;  %v16725_v44 = vand.u32 4294901760, %v13804_v33 }
 0x221   :  { %11869 = vmatprep.subr.bf16.mxu0 %v13725_v43  ;;  %1801 = vmatmul.mubr.f32.vlgmr.msra.gmra.mrb[2].mxu0 %v13656_v25  ;;  %v11876_v26 = vpack.c.bf16 %v16720_v13, %v16719_v4  ;;  %v11878_v52 = vpack.c.bf16 %v16722_v20, %v16721_v14  ;;  %v11914_v28 = vpack.c.bf16 %v13943_v40, %v13927_v38  ;;  %v2655_v49 = vsel %vm2653_vm11, %v2652_v24, 0 }
 0x222   :  { %11871 = vmatpush1.bf16.msra.mxu0 %v13768_v42  ;;  %1881 = vmatprep.mubr.f32.mxu0 %v16715_v19  ;;  %v11880_v30 = vpack.c.bf16 %v16725_v44, %v16724_v35  ;;  %v16727_v47 = vand.u32 4294901760, %v13783_v51  ;;  %v16728_v29 = vand.u32 4294901760, %v13855_v31  ;;  %v16734_v14 = vand.u32 4294901760, %v13909_v62  ;;  %v16738_v35 = vld [vmem:[#allocation24_spill] sm:$0xff] }
 0x223   :  { %11873 = vmatprep.subr.bf16.mxu0 %v13802_v11  ;;  %11907 = vmatpush1.bf16.msra.mxu1 %v11906_v46  ;;  %v16726_v46 = vld [vmem:[#allocation23_spill] sm:$0xff]  ;;  %v16735_v20 = vand.u32 4294901760, %v13919_v9  ;;  %v2667_v62 = vsel %vm1493_vm10, %v16738_v35, 0  ;;  %v16740_v44 = vand.u32 4294901760, %v13943_v40 }
 0x224   :  { %2214 = vmatprep.subr.mxu1 %v2213_v12  ;;  %v2661_v18 = vsel %vm1493_vm10, %v16726_v46, 0  ;;  %v11882_v12 = vpack.c.bf16 %v16728_v29, %v16727_v47  ;;  %v3600_v29 = vld [vmem:[#allocation9 + $0x8] sm:$0xff] }
 0x225   :  { %v14045_v33 = vand.u32 4294901760, %v2661_v18 }
 0x226   :  { %11875 = vmatpush1.bf16.msra.mxu0 %v13853_v45 }
 0x227   :  { %1824 = vmatprep.subr.mxu0 %v13857_v63  ;;  %2220 = vmatpush1.msra.mxu1 %v2219_v58  ;;  %v16729_v58 = vld [vmem:[#allocation21_spill] sm:$0xff]  ;;  %v14060_v31 = vsub.f32 %v2661_v18, %v14045_v33 }
 0x228   :  { %11909 = vmatprep.subr.bf16.mxu1 %v11908_v32  ;;  %2277 = vmatmul.mubr.f32.vlgmr.msra.gmra.mrb[4].mxu1 %v13612_v22  ;;  %v2658_v32 = vsel %vm1493_vm10, %v16729_v58, 0  ;;  %v3719_v58 = vand.u32 4294901760, %v3628_v17 }
 0x229   :  { %11911 = vmatpush1.bf16.msra.mxu1 %v11910_v3  ;;  %2367 = vmatprep.mubr.f32.mxu1 %v16715_v19  ;;  %v14049_v3 = vand.u32 4294901760, %v2655_v49  ;;  %v14056_v51 = vand.u32 4294901760, %v2658_v32 }
 0x22a   :  { %1826 = vmatpush1.msra.mxu0 %v13880_v50  ;;  %11913 = vmatprep.subr.bf16.mxu1 %v11912_v61  ;;  %v16730_v61 = vand.u32 4294901760, %v13887_v36  ;;  %v16731_v36 = vand.u32 4294901760, %v13891_v7  ;;  %v2749_v7 = vand.u32 4294901760, %v14060_v31 }
 0x22b   :  { %11877 = vmatprep.subr.bf16.mxu0 %v11876_v26  ;;  %1885 = vmatmul.mubr.f32.vlgmr.msra.gmra.mrb[2].mxu0 %v16723_v59  ;;  %v14064_v4 = vsub.f32 %v2655_v49, %v14049_v3 }
 0x22c   :  { %11879 = vmatpush1.bf16.msra.mxu0 %v11878_v52  ;;  %1985 = vmatprep.mubr.f32.mxu0 %v16715_v19 }
 0x22d   :  { %11881 = vmatprep.subr.bf16.mxu0 %v11880_v30  ;;  %11915 = vmatpush1.bf16.msra.mxu1 %v11914_v28  ;;  %v14080_v13 = vand.u32 4294901760, %v14064_v4  ;;  %v16741_v28 = vld [vmem:[#allocation22_spill] sm:$0xff] }
 0x22e   :  { %2309 = vmatprep.subr.mxu1 %v13981_v56  ;;  %v2664_v18 = vsel %vm1493_vm10, %v16741_v28, 0 }
 0x22f   :  { %v3136_v40 = vand.u32 4294901760, %v2664_v18 }
 0x230   :  { %11883 = vmatpush1.bf16.msra.mxu0 %v11882_v12 }
 0x231   :  { %1926 = vmatprep.subr.mxu0 %v16730_v61  ;;  %2312 = vmatpush1.msra.mxu1 %v13975_v53  ;;  %v3635_v61 = vand.u32 4294901760, %v3600_v29 }
 0x232   :  { %11917 = vmatprep.subr.bf16.mxu1 %v13901_v27  ;;  %2370 = vmatmul.mubr.f32.vlgmr.msra.gmra.mrb[4].mxu1 %v13656_v25  ;;  %v14074_v25 = vsub.f32 %v2658_v32, %v14056_v51  ;;  %v3618_v32 = vld [vmem:[#allocation9 + $0x98] sm:$0xff] }
 0x233   :  { %11919 = vmatpush1.bf16.msra.mxu1 %v13917_v8  ;;  %2450 = vmatprep.mubr.f32.mxu1 %v16715_v19 }
 0x234   :  { %1930 = vmatpush1.msra.mxu0 %v16731_v36  ;;  %11921 = vmatprep.subr.bf16.mxu1 %v13937_v21  ;;  %v2755_v24 = vand.u32 4294901760, %v14074_v25 }
 0x235   :  { %11885 = vmatprep.subr.bf16.mxu0 %v13725_v43  ;;  %1987 = vmatmul.mubr.f32.vlgmr.msra.gmra.mrb[2].mxu0 %v13612_v22  ;;  %v16733_v43 = vand.u32 4294901760, %v13903_v5  ;;  %v16736_v5 = vand.u32 4294901760, %v13925_v39 }
 0x236   :  { %11887 = vmatpush1.bf16.msra.mxu0 %v13768_v42  ;;  %2067 = vmatprep.mubr.f32.mxu0 %v16715_v19  ;;  %v16732_v42 = vand.u32 4294901760, %v13897_v55  ;;  %v2739_v55 = vsub.f32 %v14064_v4, %v14080_v13  ;;  %v2756_v9 = vsub.f32 %v14074_v25, %v2755_v24 }
 0x237   :  { %11889 = vmatprep.subr.bf16.mxu0 %v13802_v11  ;;  %11923 = vmatpush1.bf16.msra.mxu1 %v13941_v41  ;;  %v2750_v11 = vsub.f32 %v14060_v31, %v2749_v7 }
 0x238   :  { %2393 = vmatprep.subr.mxu1 %v13949_v16  ;;  %v11924_v26 = vpack.c.bf16 %v16733_v43, %v16732_v42  ;;  %v2757_v49 = vand.u32 4294901760, %v2756_v9  ;;  %v14182_v42 = vsub.f32 %v3600_v29, %v3635_v61  ;;  %v3621_v29 = vld [vmem:[#allocation9 + $0xb0] sm:$0xff] }
 0x239   :  { %v2751_v39 = vand.u32 4294901760, %v2750_v11 }
 0x23a   :  { %11891 = vmatpush1.bf16.msra.mxu0 %v13853_v45  ;;  %v11926_v45 = vpack.c.bf16 %v16735_v20, %v16734_v14  ;;  %16743 = vst [vmem:[#allocation59_spill] sm:$0xff] %v14182_v42 }
 0x23b   :  { %2010 = vmatprep.subr.mxu0 %v13857_v63  ;;  %2395 = vmatpush1.msra.mxu1 %v13951_v60  ;;  %v16737_v63 = vand.u32 4294901760, %v13939_v48  ;;  %v2740_v48 = vand.u32 4294901760, %v2739_v55  ;;  %v16463_v55 = vand.u32 4294901760, %v14182_v42 }
 0x23c   :  { %11925 = vmatprep.subr.bf16.mxu1 %v11924_v26  ;;  %2454 = vmatmul.mubr.f32.vlgmr.msra.gmra.mrb[4].mxu1 %v16723_v59  ;;  %v16739_v59 = vand.u32 4294901760, %v13927_v38 }
 0x23d   :  { %v11928_v52 = vpack.c.bf16 %v16737_v63, %v16736_v5  ;;  %11927 = vmatpush1.bf16.msra.mxu1 %v11926_v45  ;;  %2554 = vmatprep.mubr.f32.mxu1 %v16715_v19 }
 0x23e   :  { %2012 = vmatpush1.msra.mxu0 %v13880_v50  ;;  %v11930_v30 = vpack.c.bf16 %v16740_v44, %v16739_v59  ;;  %v14120_v50 = vand.u32 4294901760, %v2667_v62  ;;  %v3754_v59 = vsub.f32 %v14182_v42, %v16463_v55  ;;  %v14311_v55 = vld [vmem:[#allocation9 + $0x40] sm:$0xff] }
 0x23f   :  { %11929 = vmatprep.subr.bf16.mxu1 %v11928_v52  ;;  %2069 = vmatmul.mubr.f32.vlgmr.msra.gmra.mrb[2].mxu0 %v13612_v22 }
 0x240   :  { %2670 = vmatprep.subr.mxu0 %v14045_v33  ;;  %2735 = vmatprep.mubr.f32.mxu0 %v16715_v19  ;;  %v3213_v38 = vsub.f32 %v2667_v62, %v14120_v50 }
 0x241   :  { %2672 = vmatpush1.msra.mxu0 %v14056_v51  ;;  %11931 = vmatpush1.bf16.msra.mxu1 %v11930_v30 }
 0x242   :  { %2752 = vmatprep.subr.mxu0 %v2751_v39  ;;  %2495 = vmatprep.subr.mxu1 %v2211_v10  ;;  %v3219_v10 = vsub.f32 %v2664_v18, %v3136_v40  ;;  %v3214_v56 = vand.u32 4294901760, %v3213_v38  ;;  %v3619_v18 = vld [vmem:[#allocation9 + $0xa0] sm:$0xff] }
 0x243   :  { %2741 = vmatmul.mubr.f32.vlgmr.msra.gmra.mrb[4].mxu0 %v2740_v48 }
 0x244   :  { %2758 = vmatpush1.msra.mxu0 %v2757_v49  ;;  %2821 = vmatprep.mubr.f32.mxu0 %v16715_v19  ;;  %v3215_v53 = vsub.f32 %v3213_v38, %v3214_v56  ;;  %v3620_v49 = vld [vmem:[#allocation9 + $0xa8] sm:$0xff] }
 0x245   :  { %2831 = vmatprep.subr.mxu0 %v14060_v31  ;;  %2499 = vmatpush1.msra.mxu1 %v2217_v37  ;;  %v3689_v31 = vand.u32 4294901760, %v3618_v32 }
 0x246   :  { %11933 = vmatprep.subr.bf16.mxu1 %v13901_v27  ;;  %2556 = vmatmul.mubr.f32.vlgmr.msra.gmra.mrb[4].mxu1 %v13612_v22  ;;  %v3220_v27 = vand.u32 4294901760, %v3219_v10 }
 0x247   :  { %11935 = vmatpush1.bf16.msra.mxu1 %v13917_v8  ;;  %2636 = vmatprep.mubr.f32.mxu1 %v16715_v19  ;;  %v3216_v8 = vand.u32 4294901760, %v3215_v53  ;;  %v3755_v53 = vand.u32 4294901760, %v3754_v59 }
 0x248   :  { %11937 = vmatprep.subr.bf16.mxu1 %v13937_v21  ;;  %v3221_v21 = vsub.f32 %v3219_v10, %v3220_v27 }
 0x24b   :  { %2823 = vmatmul.mubr.f32.vlgmr.msra.gmra.mrb[4].mxu0 %v14049_v3  ;;  %11939 = vmatpush1.bf16.msra.mxu1 %v13941_v41  ;;  %v3222_v41 = vand.u32 4294901760, %v3221_v21 }
 0x24c   :  { %2834 = vmatpush1.msra.mxu0 %v14074_v25  ;;  %2579 = vmatprep.subr.mxu1 %v13949_v16  ;;  %v3599_v16 = vld [vmem:[#allocation9] sm:$0xff] }
 0x24d   :  { %2907 = vmatprep.subr.mxu0 %v14045_v33  ;;  %2897 = vmatprep.mubr.f32.mxu0 %v16715_v19  ;;  %v3632_v12 = vand.u32 4294901760, %v3599_v16 }
 0x24f   :  { %2581 = vmatpush1.msra.mxu1 %v13951_v60  ;;  %v3616_v60 = vld [vmem:[#allocation9 + $0x88] sm:$0xff] }
 0x250   :  { %2638 = vmatmul.mubr.f32.vlgmr.msra.gmra.mrb[4].mxu1 %v13612_v22  ;;  %3135 = vmatprep.subr.mxu1 %v14120_v50  ;;  %v3615_v22 = vld [vmem:[#allocation9 + $0x80] sm:$0xff]  ;;  %v3683_v47 = vand.u32 4294901760, %v3616_v60 }
 0x251   :  { %3137 = vmatpush1.msra.mxu1 %v3136_v40  ;;  %3200 = vmatprep.mubr.f32.mxu1 %v16715_v19  ;;  %v3680_v37 = vand.u32 4294901760, %v3615_v22 }
 0x252   :  { %3217 = vmatprep.subr.mxu1 %v3216_v8 }
 0x253   :  { %2900 = vmatmul.mubr.f32.vlgmr.msra.gmra.mrb[4].mxu0 %v14064_v4  ;;  %v14174_v36 = vpack.c.bf16 %v3683_v47, %v3680_v37  ;;  %v14176_v25 = vsub.f32 %v3615_v22, %v3680_v37  ;;  %v14228_v37 = vld [vmem:[#allocation9 + $0x20] sm:$0xff] }
 0x254   :  { %2909 = vmatpush1.msra.mxu0 %v14056_v51  ;;  %2972 = vmatprep.mubr.f32.mxu0 %v16715_v19 }
 0x255   :  { %2985 = vmatprep.subr.mxu0 %v2749_v7  ;;  %3206 = vmatmul.mubr.f32.vlgmr.msra.gmra.mrb[6].mxu1 %v2740_v48  ;;  %16742 = vst [vmem:[#allocation51_spill] sm:$0xff] %v14174_v36  ;;  %v14178_v7 = vsub.f32 %v3616_v60, %v3683_v47  ;;  %v16468_v11 = vand.u32 4294901760, %v14176_v25  ;;  %v3692_v60 = vand.u32 4294901760, %v3619_v18  ;;  %v14230_v47 = vld [vmem:[#allocation9 + $0x28] sm:$0xff] }
 0x256   :  { %3223 = vmatpush1.msra.mxu1 %v3222_v41  ;;  %3286 = vmatprep.mubr.f32.mxu1 %v16715_v19 }
 0x257   :  { %3296 = vmatprep.subr.mxu1 %v3213_v38  ;;  %v16466_v14 = vand.u32 4294901760, %v14178_v7  ;;  %v3859_v62 = vsub.f32 %v14176_v25, %v16468_v11 }
 0x259   :  { %v3866_v9 = vsub.f32 %v14178_v7, %v16466_v14 }
 0x25b   :  { %2976 = vmatmul.mubr.f32.vlgmr.msra.gmra.mrb[4].mxu0 %v14080_v13  ;;  %v3867_v38 = vand.u32 4294901760, %v3866_v9  ;;  %v14244_v9 = vsub.f32 %v3619_v18, %v3692_v60 }
 0x25c   :  { %2989 = vmatpush1.msra.mxu0 %v2755_v24  ;;  %3052 = vmatprep.mubr.f32.mxu0 %v16715_v19  ;;  %v14188_v24 = vsub.f32 %v3618_v32, %v3689_v31 }
 0x25d   :  { %3061 = vmatprep.subr.mxu0 %v14045_v33  ;;  %3288 = vmatmul.mubr.f32.vlgmr.msra.gmra.mrb[6].mxu1 %v14049_v3  ;;  %v3617_v33 = vld [vmem:[#allocation9 + $0x90] sm:$0xff] }
 0x25e   :  { %3299 = vmatpush1.msra.mxu1 %v3219_v10  ;;  %3362 = vmatprep.mubr.f32.mxu1 %v16715_v19  ;;  %16746 = vst [vmem:[#allocation62_spill] sm:$0xff] %v14188_v24  ;;  %v16460_v63 = vand.u32 4294901760, %v14188_v24 }
 0x25f   :  { %3372 = vmatprep.subr.mxu1 %v14120_v50 }
 0x260   :  { %v3880_v30 = vsub.f32 %v14188_v24, %v16460_v63 }
 0x262   :  { %v3881_v8 = vand.u32 4294901760, %v3880_v30  ;;  %v16456_v30 = vand.u32 4294901760, %v14244_v9 }
 0x263   :  { %3054 = vmatmul.mubr.f32.vlgmr.msra.gmra.mrb[4].mxu0 %v14049_v3 }
 0x264   :  { %3063 = vmatpush1.msra.mxu0 %v14056_v51  ;;  %3126 = vmatprep.mubr.f32.mxu0 %v16715_v19  ;;  %v3686_v51 = vand.u32 4294901760, %v3617_v33 }
 0x265   :  { %3365 = vmatmul.mubr.f32.vlgmr.msra.gmra.mrb[6].mxu1 %v14064_v4  ;;  %v14172_v4 = vld [vmem:[#allocation9 + $0x10] sm:$0xff]  ;;  %11941 = vmatprep.subr.bf16.mxu0 %v14174_v36 }
 0x266   :  { %3374 = vmatpush1.msra.mxu1 %v3136_v40  ;;  %3437 = vmatprep.mubr.f32.mxu1 %v16715_v19  ;;  %v14184_v43 = vpack.c.bf16 %v3689_v31, %v3686_v51  ;;  %v14186_v26 = vsub.f32 %v3617_v33, %v3686_v51  ;;  %v3638_v45 = vand.u32 4294901760, %v14172_v4  ;;  %v14239_v31 = vpack.c.bf16 %v3635_v61, %v3632_v12 }
 0x267   :  { %3450 = vmatprep.subr.mxu1 %v3214_v56  ;;  %v3698_v61 = vand.u32 4294901760, %v3621_v29 }
 0x268   :  { %16744 = vst [vmem:[#allocation60_spill] sm:$0xff] %v14184_v43  ;;  %16745 = vst [vmem:[#allocation61_spill] sm:$0xff] %v14186_v26  ;;  %v16462_v5 = vand.u32 4294901760, %v14186_v26  ;;  %v14208_v48 = vsub.f32 %v14172_v4, %v3638_v45  ;;  %v3622_v4 = vld [vmem:[#allocation9 + $0xb8] sm:$0xff] }
 0x269   :  { %16751 = vst [vmem:[#allocation67_spill] sm:$0xff] %v14239_v31  ;;  %v3701_v18 = vand.u32 4294901760, %v3622_v4 }
 0x26a   :  { %v3873_v44 = vsub.f32 %v14186_v26, %v16462_v5  ;;  %v16459_v56 = vand.u32 4294901760, %v14208_v48 }
 0x26b   :  { %3128 = vmatmul.mubr.f32.vlgmr.msra.gmra.mrb[4].mxu0 %v14049_v3 }
 0x26c   :  { %v3761_v22 = vsub.f32 %v14208_v48, %v16459_v56  ;;  %11943 = vmatpush3.bf16.msra.mxu0 %v14239_v31 }
 0x26d   :  { %3441 = vmatmul.mubr.f32.vlgmr.msra.gmra.mrb[6].mxu1 %v14080_v13  ;;  %v3602_v13 = vld [vmem:[#allocation9 + $0x18] sm:$0xff]  ;;  %11945 = vmatprep.subr.bf16.mxu0 %v14184_v43 }
 0x26e   :  { %3454 = vmatpush1.msra.mxu1 %v3220_v27  ;;  %3517 = vmatprep.mubr.f32.mxu1 %v16715_v19  ;;  %v3641_v52 = vand.u32 4294901760, %v3602_v13  ;;  %v3874_v27 = vand.u32 4294901760, %v3873_v44  ;;  %v3644_v44 = vand.u32 4294901760, %v14228_v37 }
 0x26f   :  { %3526 = vmatprep.subr.mxu1 %v14120_v50 }
 0x270   :  { %v14219_v50 = vsub.f32 %v3602_v13, %v3641_v52  ;;  %v14234_v32 = vpack.c.bf16 %v3881_v8, %v3874_v27  ;;  %v3762_v13 = vand.u32 4294901760, %v3761_v22  ;;  %v14268_v8 = vsub.f32 %v3621_v29, %v3698_v61  ;;  %v14270_v22 = vld [vmem:[#allocation9 + $0x38] sm:$0xff] }
 0x272   :  { %16747 = vst [vmem:[#allocation63_spill] sm:$0xff] %v14219_v50  ;;  %v16458_v21 = vand.u32 4294901760, %v14219_v50  ;;  %16750 = vst [vmem:[#allocation66_spill] sm:$0xff] %v14234_v32  ;;  %v16467_v29 = vand.u32 4294901760, %v14268_v8 }
 0x274   :  { %v3768_v51 = vsub.f32 %v14219_v50, %v16458_v21  ;;  %v3901_v21 = vsub.f32 %v14268_v8, %v16467_v29 }
 0x275   :  { %3519 = vmatmul.mubr.f32.vlgmr.msra.gmra.mrb[6].mxu1 %v14049_v3 }
 0x276   :  { %3528 = vmatpush1.msra.mxu1 %v3136_v40  ;;  %3591 = vmatprep.mubr.f32.mxu1 %v16715_v19  ;;  %v3860_v40 = vand.u32 4294901760, %v3859_v62  ;;  %v3769_v59 = vand.u32 4294901760, %v3768_v51  ;;  %v3902_v14 = vand.u32 4294901760, %v3901_v21  ;;  %v16475_v21 = vand.u32 4294901760, %v14311_v55 }
 0x278   :  { %v14223_v41 = vpack.c.bf16 %v3867_v38, %v3860_v40  ;;  %v14258_v38 = vld [vmem:[#allocation9 + $0x30] sm:$0xff] }
 0x279   :  { %v3650_v51 = vand.u32 4294901760, %v14258_v38 }
 0x27a   :  { %16748 = vst [vmem:[#allocation64_spill] sm:$0xff] %v14223_v41  ;;  %11973 = vmatprep.subr.bf16.mxu1 %v14223_v41 }
 0x27d   :  { %3593 = vmatmul.mubr.f32.vlgmr.msra.gmra.mrb[6].mxu1 %v14049_v3  ;;  %v14180_v3 = vsub.f32 %v3599_v16, %v3632_v12  ;;  %v3695_v16 = vand.u32 4294901760, %v3620_v49  ;;  %v3647_v12 = vand.u32 4294901760, %v14230_v47 }
 0x27f   :  { %v16465_v20 = vand.u32 4294901760, %v14180_v3  ;;  %v14242_v62 = vpack.c.bf16 %v3695_v16, %v3692_v60  ;;  %v14266_v27 = vsub.f32 %v14230_v47, %v3647_v12  ;;  %v3887_v60 = vsub.f32 %v14244_v9, %v16456_v30 }
 0x281   :  { %v3747_v39 = vsub.f32 %v14180_v3, %v16465_v20  ;;  %16752 = vst [vmem:[#allocation68_spill] sm:$0xff] %v14242_v62  ;;  %v16464_v47 = vand.u32 4294901760, %v14266_v27 }
 0x283   :  { %v3748_v10 = vand.u32 4294901760, %v3747_v39  ;;  %v14246_v39 = vsub.f32 %v3620_v49, %v3695_v16  ;;  %v14256_v49 = vpack.c.bf16 %v3641_v52, %v3638_v45  ;;  %v14278_v52 = vpack.c.bf16 %v3701_v18, %v3698_v61 }
 0x284   :  { %v14280_v16 = vsub.f32 %v3622_v4, %v3701_v18  ;;  %v3653_v4 = vand.u32 4294901760, %v14270_v22 }
 0x285   :  { %v14232_v33 = vpack.c.bf16 %v3755_v53, %v3748_v10  ;;  %v16457_v40 = vand.u32 4294901760, %v14246_v39  ;;  %16753 = vst [vmem:[#allocation69_spill] sm:$0xff] %v14256_v49  ;;  %v14260_v10 = vpack.c.bf16 %v3769_v59, %v3762_v13  ;;  %v14263_v53 = vsub.f32 %v14228_v37, %v3644_v44  ;;  %16755 = vst [vmem:[#allocation71_spill] sm:$0xff] %v14278_v52  ;;  %v3623_v13 = vld [vmem:[#allocation9 + $0xc0] sm:$0xff] }
 0x286   :  { %11947 = vmatpush3.bf16.msra.mxu0 %v14256_v49  ;;  %v3888_v59 = vand.u32 4294901760, %v3887_v60  ;;  %v16469_v61 = vand.u32 4294901760, %v14280_v16  ;;  %v14301_v60 = vsub.f32 %v14258_v38, %v3650_v51  ;;  %v3704_v5 = vand.u32 4294901760, %v3623_v13 }
 0x287   :  { %16749 = vst [vmem:[#allocation65_spill] sm:$0xff] %v14232_v33  ;;  %11975 = vmatpush3.bf16.msra.mxu1 %v14232_v33  ;;  %16754 = vst [vmem:[#allocation70_spill] sm:$0xff] %v14260_v10  ;;  %v3894_v45 = vsub.f32 %v14246_v39, %v16457_v40  ;;  %v16461_v37 = vand.u32 4294901760, %v14263_v53  ;;  %11949 = vmatprep.subr.bf16.mxu0 %v14242_v62  ;;  %v3782_v40 = vsub.f32 %v14266_v27, %v16464_v47 }
 0x288   :  { %11977 = vmatprep.subr.bf16.mxu1 %v14234_v32  ;;  %v3908_v63 = vsub.f32 %v14280_v16, %v16469_v61  ;;  %v16473_v29 = vand.u32 4294901760, %v14301_v60  ;;  %v14316_v11 = vsub.f32 %v3623_v13, %v3704_v5  ;;  %v14318_v61 = vld [vmem:[#allocation9 + $0x48] sm:$0xff]  ;;  %v14491_v19 = vpack.c.bf16 %v14246_v39, %v14244_v9 }
 0x289   :  { %v3895_v30 = vand.u32 4294901760, %v3894_v45  ;;  %v3775_v18 = vsub.f32 %v14263_v53, %v16461_v37  ;;  %v3624_v45 = vld [vmem:[#allocation9 + $0xc8] sm:$0xff]  ;;  %v14309_v37 = vsub.f32 %v14270_v22, %v3653_v4  ;;  %v3783_v20 = vand.u32 4294901760, %v3782_v40 }
 0x28a   :  { %v3909_v38 = vand.u32 4294901760, %v3908_v63  ;;  %v14325_v40 = vpack.c.bf16 %v3647_v12, %v3644_v44  ;;  %v3659_v44 = vand.u32 4294901760, %v14318_v61 }
 0x28b   :  { %11979 = vmatpush3.bf16.msra.mxu1 %v14260_v10  ;;  %v14303_v56 = vpack.c.bf16 %v3895_v30, %v3888_v59  ;;  %v3776_v47 = vand.u32 4294901760, %v3775_v18  ;;  %v16474_v30 = vand.u32 4294901760, %v14309_v37  ;;  %v3707_v59 = vand.u32 4294901760, %v3624_v45 }
 0x28c   :  { %v3789_v18 = vsub.f32 %v14301_v60, %v16473_v29  ;;  %16758 = vst [vmem:[#allocation74_spill] sm:$0xff] %v14325_v40  ;;  %v14328_v63 = vpack.c.bf16 %v3909_v38, %v3902_v14  ;;  %11951 = vmatpush3.bf16.msra.mxu0 %v14325_v40  ;;  %v14344_v14 = vsub.f32 %v14311_v55, %v16475_v21  ;;  %v3713_v38 = vand.u32 4294901760, %v3626_v23 }
 0x28d   :  { %16756 = vst [vmem:[#allocation72_spill] sm:$0xff] %v14303_v56  ;;  %11981 = vmatprep.subr.bf16.mxu1 %v14303_v56  ;;  %v14320_v22 = vpack.c.bf16 %v3783_v20, %v3776_v47  ;;  %v3796_v13 = vsub.f32 %v14309_v37, %v16474_v30  ;;  %v14333_v57 = vpack.c.bf16 %v3707_v59, %v3704_v5  ;;  %v16478_v20 = vand.u32 4294901760, %v14316_v11  ;;  %v3612_v56 = vld [vmem:[#allocation9 + $0x68] sm:$0xff] }
 0x28e   :  { %16759 = vst [vmem:[#allocation75_spill] sm:$0xff] %v14328_v63  ;;  %v3790_v47 = vand.u32 4294901760, %v3789_v18  ;;  %v14337_v29 = vsub.f32 %v3624_v45, %v3707_v59  ;;  %16762 = vst [vmem:[#allocation78_spill] sm:$0xff] %v14344_v14  ;;  %11953 = vmatprep.subr.bf16.mxu0 %v14278_v52  ;;  %v3710_v45 = vand.u32 4294901760, %v3625_v6  ;;  %v14354_v30 = vsub.f32 %v14318_v61, %v3659_v44 }
 0x28f   :  { %16757 = vst [vmem:[#allocation73_spill] sm:$0xff] %v14320_v22  ;;  %16760 = vst [vmem:[#allocation76_spill] sm:$0xff] %v14333_v57  ;;  %11983 = vmatpush3.bf16.msra.mxu1 %v14320_v22  ;;  %v3797_v5 = vand.u32 4294901760, %v3796_v13  ;;  %v3915_v12 = vsub.f32 %v14316_v11, %v16478_v20  ;;  %v14356_v21 = vpack.c.bf16 %v3653_v4, %v3650_v51  ;;  %v14360_v13 = vld [vmem:[#allocation9 + $0x58] sm:$0xff]  ;;  %v16767_v61 = vand.u32 4294901760, %v14344_v14 }
 0x290   :  { %16761 = vst [vmem:[#allocation77_spill] sm:$0xff] %v14337_v29  ;;  %11985 = vmatprep.subr.bf16.mxu1 %v14328_v63  ;;  %v16483_v59 = vand.u32 4294901760, %v14337_v29  ;;  %16763 = vst [vmem:[#allocation79_spill] sm:$0xff] %v14354_v30  ;;  %v14366_v15 = vsub.f32 %v3625_v6, %v3710_v45  ;;  %v16487_v4 = vand.u32 4294901760, %v14354_v30  ;;  %v14375_v54 = vsub.f32 %v3626_v23, %v3713_v38  ;;  %v3611_v63 = vld [vmem:[#allocation9 + $0x60] sm:$0xff] }
 0x291   :  { %16764 = vst [vmem:[#allocation80_spill] sm:$0xff] %v14356_v21  ;;  %v14364_v20 = vpack.c.bf16 %v3797_v5, %v3790_v47  ;;  %v3916_v0 = vand.u32 4294901760, %v3915_v12  ;;  %v3803_v51 = vsub.f32 %v14344_v14, %v16767_v61  ;;  %11955 = vmatpush3.bf16.msra.mxu0 %v14356_v21  ;;  %v3662_v47 = vand.u32 4294901760, %v14358_v2 }
 0x292   :  { %16766 = vst [vmem:[#allocation82_spill] sm:$0xff] %v14366_v15  ;;  %v3922_v18 = vsub.f32 %v14337_v29, %v16483_v59  ;;  %16768 = vst [vmem:[#allocation83_spill] sm:$0xff] %v14375_v54  ;;  %v16490_v6 = vand.u32 4294901760, %v14366_v15  ;;  %v3665_v5 = vand.u32 4294901760, %v14360_v13  ;;  %11957 = vmatprep.subr.bf16.mxu0 %v14333_v57  ;;  %v3716_v12 = vand.u32 4294901760, %v14362_v34 }
 0x293   :  { %16765 = vst [vmem:[#allocation81_spill] sm:$0xff] %v14364_v20  ;;  %11987 = vmatpush3.bf16.msra.mxu1 %v14364_v20  ;;  %v3804_v59 = vand.u32 4294901760, %v3803_v51  ;;  %v3810_v23 = vsub.f32 %v14354_v30, %v16487_v4  ;;  %v16492_v1 = vand.u32 4294901760, %v14375_v54  ;;  %v14392_v28 = vsub.f32 %v14358_v2, %v3662_v47 }
 0x294   :  { %v3923_v61 = vand.u32 4294901760, %v3922_v18  ;;  %v3929_v35 = vsub.f32 %v14366_v15, %v16490_v6  ;;  %v14395_v46 = vsub.f32 %v14360_v13, %v3665_v5  ;;  %v14403_v4 = vsub.f32 %v14362_v34, %v3716_v12 }
 0x295   :  { %16769 = vst [vmem:[#allocation84_spill] sm:$0xff] %v14392_v28  ;;  %v3811_v18 = vand.u32 4294901760, %v3810_v23  ;;  %v3936_v51 = vsub.f32 %v14375_v54, %v16492_v1  ;;  %v14405_v22 = vpack.c.bf16 %v3713_v38, %v3710_v45  ;;  %v16494_v2 = vand.u32 4294901760, %v14392_v28 }
 0x296   :  { %16770 = vst [vmem:[#allocation85_spill] sm:$0xff] %v14395_v46  ;;  %v14397_v20 = vpack.c.bf16 %v3923_v61, %v3916_v0  ;;  %16772 = vst [vmem:[#allocation87_spill] sm:$0xff] %v14403_v4  ;;  %v3930_v6 = vand.u32 4294901760, %v3929_v35  ;;  %v16496_v13 = vand.u32 4294901760, %v14395_v46  ;;  %v16498_v23 = vand.u32 4294901760, %v14403_v4 }
 0x297   :  { %16773 = vst [vmem:[#allocation88_spill] sm:$0xff] %v14405_v22  ;;  %v14410_v0 = vpack.c.bf16 %v3811_v18, %v3804_v59  ;;  %v3937_v61 = vand.u32 4294901760, %v3936_v51  ;;  %v14413_v1 = vsub.f32 %v3628_v17, %v3719_v58  ;;  %v3817_v34 = vsub.f32 %v14392_v28, %v16494_v2 }
 0x298   :  { %16771 = vst [vmem:[#allocation86_spill] sm:$0xff] %v14397_v20  ;;  %11989 = vmatprep.subr.bf16.mxu1 %v14397_v20  ;;  %v3824_v35 = vsub.f32 %v14395_v46, %v16496_v13  ;;  %v16776_v45 = vand.u32 4294901760, %v14311_v55  ;;  %v3668_v20 = vand.u32 4294901760, %v3611_v63  ;;  %v3943_v17 = vsub.f32 %v14403_v4, %v16498_v23  ;;  %v3630_v23 = vld [vmem:[#allocation9 + $0xf8] sm:$0xff] }
 0x299   :  { %16774 = vst [vmem:[#allocation89_spill] sm:$0xff] %v14410_v0  ;;  %16775 = vst [vmem:[#allocation90_spill] sm:$0xff] %v14413_v1  ;;  %11991 = vmatpush3.bf16.msra.mxu1 %v14410_v0  ;;  %v14426_v59 = vpack.c.bf16 %v3937_v61, %v3930_v6  ;;  %v16497_v18 = vand.u32 4294901760, %v14413_v1  ;;  %v3671_v51 = vand.u32 4294901760, %v3612_v56  ;;  %v3818_v2 = vand.u32 4294901760, %v3817_v34 }
 0x29a   :  { %v14423_v38 = vpack.c.bf16 %v3659_v44, %v16776_v45  ;;  %v3825_v10 = vand.u32 4294901760, %v3824_v35  ;;  %v14433_v13 = vsub.f32 %v3611_v63, %v3668_v20  ;;  %v3944_v55 = vand.u32 4294901760, %v3943_v17 }
 0x29b   :  { %16778 = vst [vmem:[#allocation92_spill] sm:$0xff] %v14426_v59  ;;  %11993 = vmatprep.subr.bf16.mxu1 %v14426_v59  ;;  %v3950_v44 = vsub.f32 %v14413_v1, %v16497_v18  ;;  %v14439_v6 = vsub.f32 %v3612_v56, %v3671_v51  ;;  %v14458_v59 = vpack.c.bf16 %v3665_v5, %v3662_v47 }
 0x29c   :  { %16777 = vst [vmem:[#allocation91_spill] sm:$0xff] %v14423_v38  ;;  %11959 = vmatpush3.bf16.msra.mxu0 %v14423_v38  ;;  %v14442_v61 = vpack.c.bf16 %v3825_v10, %v3818_v2  ;;  %v16502_v34 = vand.u32 4294901760, %v14433_v13  ;;  %v14456_v2 = vpack.c.bf16 %v3719_v58, %v3716_v12 }
 0x29d   :  { %11961 = vmatprep.subr.bf16.mxu0 %v14405_v22  ;;  %v3951_v35 = vand.u32 4294901760, %v3950_v44  ;;  %v16504_v45 = vand.u32 4294901760, %v14439_v6  ;;  %v3629_v44 = vld [vmem:[#allocation9 + $0xf0] sm:$0xff] }
 0x29e   :  { %16779 = vst [vmem:[#allocation93_spill] sm:$0xff] %v14442_v61  ;;  %11995 = vmatpush3.bf16.msra.mxu1 %v14442_v61  ;;  %v3831_v63 = vsub.f32 %v14433_v13, %v16502_v34  ;;  %v3613_v61 = vld [vmem:[#allocation9 + $0x70] sm:$0xff]  ;;  %v3722_v34 = vand.u32 4294901760, %v3629_v44 }
 0x29f   :  { %v14450_v17 = vpack.c.bf16 %v3951_v35, %v3944_v55  ;;  %v3838_v56 = vsub.f32 %v14439_v6, %v16504_v45  ;;  %v3725_v55 = vand.u32 4294901760, %v3630_v23  ;;  %v3614_v35 = vld [vmem:[#allocation9 + $0x78] sm:$0xff]  ;;  %v3674_v32 = vand.u32 4294901760, %v3613_v61 }
 0x2a0   :  { %v3832_v18 = vand.u32 4294901760, %v3831_v63  ;;  %11963 = vmatpush3.bf16.msra.mxu0 %v14458_v59  ;;  %v3677_v45 = vand.u32 4294901760, %v3614_v35  ;;  %v14463_v63 = vpack.c.bf16 %v3671_v51, %v3668_v20  ;;  %v3955_v12 = vsub.f32 %v3629_v44, %v3722_v34 }
 0x2a1   :  { %16780 = vst [vmem:[#allocation94_spill] sm:$0xff] %v14450_v17  ;;  %11997 = vmatprep.subr.bf16.mxu1 %v14450_v17  ;;  %v3839_v10 = vand.u32 4294901760, %v3838_v56  ;;  %v14466_v58 = vpack.c.bf16 %v3725_v55, %v3722_v34  ;;  %v3962_v56 = vsub.f32 %v3630_v23, %v3725_v55  ;;  %v3843_v47 = vsub.f32 %v3613_v61, %v3674_v32 }
 0x2a2   :  { %v3850_v5 = vsub.f32 %v3614_v35, %v3677_v45  ;;  %11965 = vmatprep.subr.bf16.mxu0 %v14456_v2  ;;  %v14474_v20 = vpack.c.bf16 %v3677_v45, %v3674_v32  ;;  %v14478_v51 = vpack.c.bf16 %v14178_v7, %v14176_v25  ;;  %v14482_v23 = vpack.c.bf16 %v14188_v24, %v14186_v26 }
 0x2a3   :  { %v14460_v0 = vpack.c.bf16 %v3839_v10, %v3832_v18  ;;  %v14471_v18 = vpack.c.bf16 %v14182_v42, %v14180_v3  ;;  %v3956_v10 = vand.u32 4294901760, %v3955_v12  ;;  %v3963_v17 = vand.u32 4294901760, %v3962_v56 }
 0x2a4   :  { %v3844_v33 = vand.u32 4294901760, %v3843_v47  ;;  %v3851_v41 = vand.u32 4294901760, %v3850_v5  ;;  %11967 = vmatpush3.bf16.msra.mxu0 %v14463_v63  ;;  %16782 = vst [vmem:[#allocation96_spill] sm:$0xff] %v14478_v51  ;;  %v14487_v55 = vpack.c.bf16 %v14219_v50, %v14208_v48  ;;  %v14496_v24 = vpack.c.bf16 %v14266_v27, %v14263_v53 }
 0x2a5   :  { %16781 = vst [vmem:[#allocation95_spill] sm:$0xff] %v14460_v0  ;;  %11999 = vmatpush3.bf16.msra.mxu1 %v14460_v0  ;;  %v3957_v61 = vsub.f32 %v3955_v12, %v3956_v10  ;;  %v3964_v34 = vsub.f32 %v3962_v56, %v3963_v17  ;;  %11969 = vmatprep.subr.bf16.mxu0 %v14466_v58 }
 0x2a6   :  { %v3845_v44 = vsub.f32 %v3843_v47, %v3844_v33  ;;  %v3852_v35 = vsub.f32 %v3850_v5, %v3851_v41 }
 0x2a7   :  { %v3958_v32 = vand.u32 4294901760, %v3957_v61  ;;  %v3965_v45 = vand.u32 4294901760, %v3964_v34  ;;  %v14506_v61 = vpack.c.bf16 %v14280_v16, %v14268_v8  ;;  %v14511_v34 = vpack.c.bf16 %v14309_v37, %v14301_v60 }
 0x2a8   :  { %v3846_v0 = vand.u32 4294901760, %v3845_v44  ;;  %v3853_v42 = vand.u32 4294901760, %v3852_v35  ;;  %11971 = vmatpush3.bf16.msra.mxu0 %v14474_v20  ;;  %v14516_v44 = vpack.c.bf16 %v14337_v29, %v14316_v11  ;;  %v14528_v35 = vpack.c.bf16 %v14395_v46, %v14392_v28 }
 0x2a9   :  { %v14498_v26 = vpack.c.bf16 %v3965_v45, %v3958_v32  ;;  %12005 = vmatprep.subr.bf16.mxu0 %v14478_v51  ;;  %v14532_v51 = vpack.c.bf16 %v14413_v1, %v14403_v4 }
 0x2aa   :  { %v14501_v50 = vpack.c.bf16 %v3853_v42, %v3846_v0  ;;  %v14520_v42 = vpack.c.bf16 %v14354_v30, %v14344_v14  ;;  %v14524_v0 = vpack.c.bf16 %v14375_v54, %v14366_v15  ;;  %v14540_v30 = vpack.c.bf16 %v3850_v5, %v3843_v47 }
 0x2ab   :  { %16783 = vst [vmem:[#allocation97_spill] sm:$0xff] %v14498_v26  ;;  %12001 = vmatprep.subr.bf16.mxu1 %v14498_v26  ;;  %v14538_v26 = vpack.c.bf16 %v3962_v56, %v3955_v12  ;;  %v14542_v54 = vpack.c.bf16 %v3963_v17, %v3956_v10  ;;  %v14544_v15 = vpack.c.bf16 %v3851_v41, %v3844_v33 }
 0x2ac   :  { %16784 = vst [vmem:[#allocation98_spill] sm:$0xff] %v14501_v50  ;;  %12003 = vmatpush3.bf16.msra.mxu1 %v14501_v50  ;;  %v14536_v50 = vpack.c.bf16 %v14439_v6, %v14433_v13 }
 0x2ad   :  { %12037 = vmatprep.subr.bf16.mxu1 %v14174_v36  ;;  %16785 = vst [vmem:[#allocation99_spill] sm:$0xff] %v14542_v54  ;;  %16786 = vst [vmem:[#allocation100_spill] sm:$0xff] %v14544_v15 }
 0x2e0   :  { %v1587_v32 = vpop.f32.mrb[2].mxu1 }
 0x2e1   :  { %v1589_v45 = vpop.f32.mrb[3].mxu1 }
 0x312   :  { %v2070_v46 = vpop.f32.mrb[2].mxu0 }
 0x313   :  { %v14546_v28 = vadd.f32 %v2070_v46, %v1587_v32  ;;  %v2072_v14 = vpop.f32.mrb[3].mxu0 }
 0x314   :  { %v14548_v29 = vadd.f32 %v2072_v14, %v1589_v45 }
 0x315   :  { %16787 = vst [vmem:[#allocation101_spill] sm:$0xff] %v14546_v28  ;;  %v2644_v1 = vmax.f32 %v14546_v28, 0.0 }
 0x316   :  { %16788 = vst [vmem:[#allocation102_spill] sm:$0xff] %v14548_v29  ;;  %v2645_v4 = vmax.f32 %v14548_v29, 0.0  ;;  %v16851_v29 = vld [vmem:[#allocation94_spill] sm:$0xff] }
 0x317   :  { %2648 = vst [vmem:[#allocation3] sm:$0xf0] %v2644_v1 }
 0x318   :  { %2649 = vst [vmem:[#allocation3 + $0x8] sm:$0xf0] %v2645_v4 }
 0x323   :  { %v14552_v12 = vpop.f32.mrb[4].mxu1 }
 0x324   :  { %16789 = vst [vmem:[#allocation103_spill] sm:$0xff] %v14552_v12  ;;  %v2646_v56 = vmax.f32 %v14552_v12, 0.0  ;;  %v14555_v17 = vpop.f32.mrb[5].mxu1  ;;  %v16801_v12 = vld [vmem:[#allocation63_spill] sm:$0xff] }
 0x325   :  { %16790 = vst [vmem:[#allocation104_spill] sm:$0xff] %v14555_v17  ;;  %v2647_v41 = vmax.f32 %v14555_v17, 0.0 }
 0x326   :  { %2650 = vst [vmem:[#allocation3 + $0x10] sm:$0xf0] %v2646_v56 }
 0x327   :  { %2651 = vst [vmem:[#allocation3 + $0x18] sm:$0xf0] %v2647_v41 }
 0x33e   :  { %v3129_v46 = vpop.f32.mrb[4].mxu0 }
 0x33f   :  { %v14558_v33 = vand.u32 4294901760, %v3129_v46  ;;  %v3131_v14 = vpop.f32.mrb[5].mxu0 }
 0x340   :  { %v3727_v47 = vand.u32 4294901760, %v3131_v14 }
 0x341   :  { %v3734_v5 = vsub.f32 %v3129_v46, %v14558_v33 }
 0x342   :  { %v3728_v10 = vsub.f32 %v3131_v14, %v3727_v47  ;;  %3968 = vmatprep.mubr.f32.mxu1 %v3727_v47 }
 0x343   :  { %v3735_v1 = vand.u32 4294901760, %v3734_v5  ;;  %3970 = vmatmul.mubr.f32.vlgmr.msra.gmra.mrb[8].mxu1 %v14558_v33 }
 0x344   :  { %12039 = vmatpush3.bf16.msra.mxu1 %v14239_v31  ;;  %v3729_v4 = vand.u32 4294901760, %v3728_v10 }
 0x345   :  { %v3736_v32 = vsub.f32 %v3734_v5, %v3735_v1  ;;  %12041 = vmatprep.subr.bf16.mxu1 %v14184_v43 }
 0x346   :  { %4212 = vmatprep.mubr.f32.mxu1 %v3729_v4  ;;  %v3730_v45 = vsub.f32 %v3728_v10, %v3729_v4  ;;  %v16792_v4 = vand.u32 4294901760, %v14178_v7 }
 0x347   :  { %v3737_v41 = vand.u32 4294901760, %v3736_v32 }
 0x348   :  { %12043 = vmatpush3.bf16.msra.mxu1 %v14256_v49  ;;  %v3731_v56 = vand.u32 4294901760, %v3730_v45  ;;  %v16794_v45 = vld [vmem:[#allocation59_spill] sm:$0xff] }
 0x349   :  { %12045 = vmatprep.subr.bf16.mxu1 %v14242_v62 }
 0x34a   :  { %3732 = vmatprep.mubr.f32.mxu0 %v3731_v56  ;;  %v16795_v56 = vand.u32 4294901760, %v16794_v45  ;;  %v16802_v45 = vand.u32 4294901760, %v16801_v12  ;;  %v16806_v12 = vand.u32 4294901760, %v14266_v27  ;;  %v16810_v27 = vand.u32 4294901760, %v14309_v37  ;;  %v16814_v37 = vld [vmem:[#allocation78_spill] sm:$0xff] }
 0x34b   :  { %3738 = vmatmul.mubr.f32.vlgmr.msra.gmra.mrb[6].mxu0 %v3737_v41 }
 0x34c   :  { %12007 = vmatpush3.bf16.msra.mxu0 %v14471_v18  ;;  %12047 = vmatpush3.bf16.msra.mxu1 %v14325_v40 }
 0x34d   :  { %4105 = vmatprep.mubr.f32.mxu0 %v3728_v10  ;;  %12009 = vmatprep.subr.bf16.mxu0 %v14482_v23  ;;  %v16791_v10 = vand.u32 4294901760, %v14176_v25  ;;  %v16796_v25 = vld [vmem:[#allocation61_spill] sm:$0xff] }
 0x34e   :  { %12049 = vmatprep.subr.bf16.mxu1 %v14278_v52  ;;  %v16797_v7 = vand.u32 4294901760, %v16796_v25  ;;  %v16804_v25 = vand.u32 4294901760, %v14246_v39  ;;  %v16808_v39 = vand.u32 4294901760, %v14280_v16  ;;  %v16812_v16 = vld [vmem:[#allocation77_spill] sm:$0xff] }
 0x34f   :  { %v14599_v32 = vpack.c.bf16 %v16792_v4, %v16791_v10  ;;  %v16798_v10 = vld [vmem:[#allocation62_spill] sm:$0xff] }
 0x350   :  { %12011 = vmatpush3.bf16.msra.mxu0 %v14487_v55  ;;  %12051 = vmatpush3.bf16.msra.mxu1 %v14356_v21  ;;  %v14572_v46 = vpop.f32.mrb[6].mxu1  ;;  %v16799_v4 = vand.u32 4294901760, %v16798_v10 }
 0x351   :  { %12013 = vmatprep.subr.bf16.mxu0 %v14491_v19  ;;  %12053 = vmatprep.subr.bf16.mxu1 %v14333_v57  ;;  %v3596_v14 = vpop.f32.mrb[7].mxu1 }
 0x352   :  { %v14616_v17 = vpack.c.bf16 %v16799_v4, %v16797_v7  ;;  %v14650_v10 = vand.u32 4294901760, %v3596_v14 }
 0x354   :  { %12015 = vmatpush3.bf16.msra.mxu0 %v14496_v24  ;;  %12055 = vmatpush3.bf16.msra.mxu1 %v14423_v38 }
 0x355   :  { %12017 = vmatprep.subr.bf16.mxu0 %v14506_v61  ;;  %12057 = vmatprep.subr.bf16.mxu1 %v14405_v22 }
 0x358   :  { %12019 = vmatpush3.bf16.msra.mxu0 %v14511_v34  ;;  %12059 = vmatpush3.bf16.msra.mxu1 %v14458_v59 }
 0x359   :  { %12021 = vmatprep.subr.bf16.mxu0 %v14516_v44  ;;  %12061 = vmatprep.subr.bf16.mxu1 %v14456_v2 }
 0x35c   :  { %12023 = vmatpush3.bf16.msra.mxu0 %v14520_v42  ;;  %12063 = vmatpush3.bf16.msra.mxu1 %v14463_v63 }
 0x35d   :  { %12025 = vmatprep.subr.bf16.mxu0 %v14524_v0  ;;  %12065 = vmatprep.subr.bf16.mxu1 %v14466_v58 }
 0x360   :  { %12027 = vmatpush3.bf16.msra.mxu0 %v14528_v35  ;;  %12067 = vmatpush3.bf16.msra.mxu1 %v14474_v20 }
 0x361   :  { %12029 = vmatprep.subr.bf16.mxu0 %v14532_v51  ;;  %12101 = vmatprep.subr.bf16.mxu1 %v14174_v36 }
 0x363   :  { %4216 = vmatmul.mubr.f32.vlgmr.msra.gmra.mrb[10].mxu1 %v3735_v1  ;;  %v16793_v1 = vand.u32 4294901760, %v14180_v3  ;;  %v16800_v3 = vand.u32 4294901760, %v14208_v48  ;;  %v16805_v48 = vand.u32 4294901760, %v14263_v53  ;;  %v16809_v53 = vand.u32 4294901760, %v14301_v60 }
 0x364   :  { %12031 = vmatpush3.bf16.msra.mxu0 %v14536_v50  ;;  %12103 = vmatpush3.bf16.msra.mxu1 %v14239_v31  ;;  %v16815_v60 = vand.u32 4294901760, %v16814_v37 }
 0x365   :  { %4486 = vmatprep.mubr.f32.mxu1 %v3727_v47  ;;  %12033 = vmatprep.subr.bf16.mxu0 %v14538_v26  ;;  %v14608_v41 = vpack.c.bf16 %v16795_v56, %v16793_v1  ;;  %v14623_v1 = vpack.c.bf16 %v16802_v45, %v16800_v3  ;;  %v16803_v56 = vand.u32 4294901760, %v14244_v9  ;;  %v16807_v9 = vand.u32 4294901760, %v14268_v8 }
 0x366   :  { %12105 = vmatprep.subr.bf16.mxu1 %v14184_v43  ;;  %v14657_v4 = vpack.c.bf16 %v16810_v27, %v16809_v53  ;;  %v16811_v8 = vand.u32 4294901760, %v14316_v11  ;;  %v16813_v3 = vand.u32 4294901760, %v16812_v16  ;;  %v16819_v11 = vld [vmem:[#allocation82_spill] sm:$0xff] }
 0x367   :  { %v14631_v7 = vpack.c.bf16 %v16804_v25, %v16803_v56  ;;  %v14669_v56 = vsub.f32 %v3596_v14, %v14650_v10  ;;  %v16816_v25 = vld [vmem:[#allocation79_spill] sm:$0xff] }
 0x368   :  { %12035 = vmatpush3.bf16.msra.mxu0 %v14540_v30  ;;  %12107 = vmatpush3.bf16.msra.mxu1 %v14256_v49  ;;  %v14665_v45 = vpack.c.bf16 %v16813_v3, %v16811_v8  ;;  %v16824_v8 = vld [vmem:[#allocation84_spill] sm:$0xff]  ;;  %v16826_v3 = vld [vmem:[#allocation85_spill] sm:$0xff] }
 0x369   :  { %12069 = vmatprep.subr.bf16.mxu0 %v14599_v32  ;;  %12109 = vmatprep.subr.bf16.mxu1 %v14242_v62  ;;  %v16529_v14 = vand.u32 4294901760, %v14669_v56  ;;  %v16825_v16 = vand.u32 4294901760, %v16824_v8  ;;  %v16827_v37 = vand.u32 4294901760, %v16826_v3  ;;  %v16834_v8 = vand.u32 4294901760, %v14433_v13 }
 0x36a   :  { %v16837_v13 = vmov 0.0  }
 0x36b   :  { %4108 = vmatmul.mubr.f32.vlgmr.msra.gmra.mrb[8].mxu0 %v3734_v5  ;;  %v14647_v5 = vpack.c.bf16 %v16808_v39, %v16807_v9  ;;  %v16820_v9 = vand.u32 4294901760, %v16819_v11  ;;  %v16821_v39 = vld [vmem:[#allocation83_spill] sm:$0xff]  ;;  %v16831_v11 = vld [vmem:[#allocation90_spill] sm:$0xff] }
 0x36c   :  { %12071 = vmatpush3.bf16.msra.mxu0 %v14608_v41  ;;  %4382 = vmatprep.mubr.f32.mxu0 %v3727_v47  ;;  %v14639_v47 = vpack.c.bf16 %v16806_v12, %v16805_v48  ;;  %v16817_v48 = vand.u32 4294901760, %v16816_v25  ;;  %v16822_v53 = vand.u32 4294901760, %v16821_v39  ;;  %v16829_v25 = vld [vmem:[#allocation87_spill] sm:$0xff] }
 0x36d   :  { %12111 = vmatpush3.bf16.msra.mxu1 %v14325_v40  ;;  %12073 = vmatprep.subr.bf16.mxu0 %v14616_v17 }
 0x36e   :  { %12113 = vmatprep.subr.bf16.mxu1 %v14278_v52  ;;  %v14676_v12 = vpack.c.bf16 %v16817_v48, %v16815_v60  ;;  %v14684_v27 = vpack.c.bf16 %v16822_v53, %v16820_v9  ;;  %v14693_v60 = vpack.c.bf16 %v16827_v37, %v16825_v16  ;;  %v16830_v48 = vand.u32 4294901760, %v16829_v25 }
 0x36f   :  { %v16832_v9 = vand.u32 4294901760, %v16831_v11  ;;  %v5480_v53 = vsub.f32 %v14669_v56, %v16529_v14  ;;  %v16835_v16 = vand.u32 4294901760, %v14439_v6  ;;  %v14731_v6 = vand.u32 4294901760, %v14572_v46  ;;  %v16839_v11 = vld [vmem:[#allocation64_spill] sm:$0xff]  ;;  %v16846_v14 = vld [vmem:[#allocation81_spill] sm:$0xff] }
 0x370   :  { %12075 = vmatpush3.bf16.msra.mxu0 %v14623_v1  ;;  %16818 = vst [vmem:[#allocation59_spill] sm:$0xff] %v14676_v12  ;;  %16823 = vst [vmem:[#allocation61_spill] sm:$0xff] %v14684_v27 }
 0x371   :  { %12115 = vmatpush3.bf16.msra.mxu1 %v14356_v21  ;;  %12077 = vmatprep.subr.bf16.mxu0 %v14631_v7  ;;  %16828 = vst [vmem:[#allocation62_spill] sm:$0xff] %v14693_v60  ;;  %v14701_v39 = vpack.c.bf16 %v16832_v9, %v16830_v48  ;;  %v14712_v3 = vpack.c.bf16 %v16835_v16, %v16834_v8  ;;  %v5481_v37 = vand.u32 4294901760, %v5480_v53  ;;  %16838 = vst [vmem:[#allocation78_spill] sm:$0xff] %v14731_v6  ;;  %v16840_v9 = vld [vmem:[#allocation65_spill] sm:$0xff]  ;;  %v16841_v53 = vld [vmem:[#allocation66_spill] sm:$0xff] }
 0x372   :  { %12117 = vmatprep.subr.bf16.mxu1 %v14333_v57  ;;  %v14737_v25 = vsub.f32 %v14572_v46, %v14731_v6  ;;  %v16842_v8 = vld [vmem:[#allocation70_spill] sm:$0xff]  ;;  %v16843_v16 = vld [vmem:[#allocation72_spill] sm:$0xff] }
 0x373   :  { %16833 = vst [vmem:[#allocation63_spill] sm:$0xff] %v14701_v39  ;;  %16836 = vst [vmem:[#allocation77_spill] sm:$0xff] %v14712_v3 }
 0x374   :  { %12079 = vmatpush3.bf16.msra.mxu0 %v14639_v47 }
 0x375   :  { %12119 = vmatpush3.bf16.msra.mxu1 %v14423_v38  ;;  %12081 = vmatprep.subr.bf16.mxu0 %v14647_v5 }
 0x376   :  { %12121 = vmatprep.subr.bf16.mxu1 %v14405_v22 }
 0x378   :  { %12083 = vmatpush3.bf16.msra.mxu0 %v14657_v4 }
 0x379   :  { %12123 = vmatpush3.bf16.msra.mxu1 %v14458_v59  ;;  %12085 = vmatprep.subr.bf16.mxu0 %v14665_v45 }
 0x37a   :  { %12125 = vmatprep.subr.bf16.mxu1 %v14456_v2 }
 0x37c   :  { %12087 = vmatpush3.bf16.msra.mxu0 %v14676_v12 }
 0x37d   :  { %12127 = vmatpush3.bf16.msra.mxu1 %v14463_v63  ;;  %12089 = vmatprep.subr.bf16.mxu0 %v14684_v27 }
 0x37e   :  { %12129 = vmatprep.subr.bf16.mxu1 %v14466_v58 }
 0x380   :  { %12091 = vmatpush3.bf16.msra.mxu0 %v14693_v60 }
 0x381   :  { %12131 = vmatpush3.bf16.msra.mxu1 %v14474_v20  ;;  %12093 = vmatprep.subr.bf16.mxu0 %v14701_v39 }
 0x382   :  { %12325 = vmatprep.subr.bf16.mxu1 %v14174_v36 }
 0x384   :  { %4488 = vmatmul.mubr.f32.vlgmr.msra.gmra.mrb[12].mxu1 %v14558_v33  ;;  %12095 = vmatpush3.bf16.msra.mxu0 %v14712_v3  ;;  %v14963_v3 = vld [vmem:[#allocation10 + $0xf8] sm:$0xff] }
 0x385   :  { %12327 = vmatpush3.bf16.msra.mxu1 %v14239_v31  ;;  %5482 = vmatprep.mubr.f32.mxu1 %v5481_v37  ;;  %v16844_v37 = vld [vmem:[#allocation73_spill] sm:$0xff] }
 0x386   :  { %12097 = vmatprep.subr.bf16.mxu0 %v14542_v54  ;;  %12329 = vmatprep.subr.bf16.mxu1 %v14184_v43  ;;  %v14961_v54 = vld [vmem:[#allocation10 + $0xe8] sm:$0xff] }
 0x387   :  { %v16890_v27 = vand.u32 4294901760, %v14961_v54 }
 0x388   :  { %12099 = vmatpush3.bf16.msra.mxu0 %v14544_v15 }
 0x389   :  { %12331 = vmatpush3.bf16.msra.mxu1 %v14256_v49 }
 0x38a   :  { %12333 = vmatprep.subr.bf16.mxu1 %v14242_v62 }
 0x38b   :  { %4384 = vmatmul.mubr.f32.vlgmr.msra.gmra.mrb[10].mxu0 %v14558_v33  ;;  %v16528_v33 = vand.u32 4294901760, %v14737_v25 }
 0x38c   :  { %4622 = vmatprep.mubr.f32.mxu0 %v16837_v13 }
 0x38d   :  { %12335 = vmatpush3.bf16.msra.mxu1 %v14325_v40  ;;  %v5486_v48 = vsub.f32 %v14737_v25, %v16528_v33  ;;  %v16845_v33 = vld [vmem:[#allocation75_spill] sm:$0xff] }
 0x38e   :  { %12337 = vmatprep.subr.bf16.mxu1 %v14278_v52 }
 0x38f   :  { %v5487_v46 = vand.u32 4294901760, %v5486_v48  ;;  %v16847_v48 = vld [vmem:[#allocation86_spill] sm:$0xff] }
 0x391   :  { %12339 = vmatpush3.bf16.msra.mxu1 %v14356_v21 }
 0x392   :  { %12341 = vmatprep.subr.bf16.mxu1 %v14333_v57 }
 0x395   :  { %12343 = vmatpush3.bf16.msra.mxu1 %v14423_v38 }
 0x396   :  { %12345 = vmatprep.subr.bf16.mxu1 %v14405_v22 }
 0x399   :  { %12347 = vmatpush3.bf16.msra.mxu1 %v14458_v59 }
 0x39a   :  { %12349 = vmatprep.subr.bf16.mxu1 %v14456_v2 }
 0x39d   :  { %12351 = vmatpush3.bf16.msra.mxu1 %v14463_v63 }
 0x39e   :  { %12353 = vmatprep.subr.bf16.mxu1 %v14466_v58 }
 0x3a1   :  { %12355 = vmatpush3.bf16.msra.mxu1 %v14474_v20 }
 0x3a2   :  { %12357 = vmatprep.subr.bf16.mxu1 %v16839_v11  ;;  %v16848_v11 = vld [vmem:[#allocation89_spill] sm:$0xff] }
 0x3a4   :  { %5488 = vmatmul.mubr.f32.vlgmr.msra.gmra.mrb[14].mxu1 %v5487_v46  ;;  %v16849_v46 = vld [vmem:[#allocation92_spill] sm:$0xff] }
 0x3a5   :  { %12359 = vmatpush3.bf16.msra.mxu1 %v16840_v9  ;;  %5718 = vmatprep.mubr.f32.mxu1 %v14650_v10  ;;  %v16850_v9 = vld [vmem:[#allocation93_spill] sm:$0xff] }
 0x3a6   :  { %12361 = vmatprep.subr.bf16.mxu1 %v16841_v53  ;;  %v16852_v53 = vld [vmem:[#allocation95_spill] sm:$0xff] }
 0x3a9   :  { %12363 = vmatpush3.bf16.msra.mxu1 %v16842_v8  ;;  %v16853_v8 = vld [vmem:[#allocation97_spill] sm:$0xff] }
 0x3aa   :  { %12365 = vmatprep.subr.bf16.mxu1 %v16843_v16  ;;  %v16854_v16 = vld [vmem:[#allocation98_spill] sm:$0xff] }
 0x3ad   :  { %12367 = vmatpush3.bf16.msra.mxu1 %v16844_v37  ;;  %v16855_v37 = vld [vmem:[#allocation96_spill] sm:$0xff] }
 0x3ae   :  { %12369 = vmatprep.subr.bf16.mxu1 %v16845_v33  ;;  %v14770_v33 = vld [vmem:[#allocation10 + $0x18] sm:$0xff] }
 0x3b1   :  { %12371 = vmatpush3.bf16.msra.mxu1 %v16846_v14  ;;  %v14768_v14 = vld [vmem:[#allocation10 + $0x8] sm:$0xff] }
 0x3b2   :  { %12373 = vmatprep.subr.bf16.mxu1 %v16847_v48  ;;  %v14772_v48 = vld [vmem:[#allocation10] sm:$0xff] }
 0x3b5   :  { %12375 = vmatpush3.bf16.msra.mxu1 %v16848_v11  ;;  %v16536_v11 = vand.u32 4294901760, %v14770_v33 }
 0x3b6   :  { %12377 = vmatprep.subr.bf16.mxu1 %v16849_v46  ;;  %v14778_v46 = vld [vmem:[#allocation10 + $0x10] sm:$0xff] }
 0x3b9   :  { %12379 = vmatpush3.bf16.msra.mxu1 %v16850_v9  ;;  %v16535_v9 = vand.u32 4294901760, %v14772_v48 }
 0x3ba   :  { %12381 = vmatprep.subr.bf16.mxu1 %v16851_v29  ;;  %v16537_v29 = vand.u32 4294901760, %v14768_v14 }
 0x3bc   :  { %v14793_v28 = vpack.c.bf16 %v16536_v11, %v16537_v29  ;;  %v14845_v11 = vld [vmem:[#allocation10 + $0x78] sm:$0xff] }
 0x3bd   :  { %12383 = vmatpush3.bf16.msra.mxu1 %v16852_v53  ;;  %v14781_v53 = vld [vmem:[#allocation10 + $0x28] sm:$0xff] }
 0x3be   :  { %12385 = vmatprep.subr.bf16.mxu1 %v16853_v8  ;;  %v14783_v8 = vld [vmem:[#allocation10 + $0x38] sm:$0xff]  ;;  %16856 = vst [vmem:[#allocation79_spill] sm:$0xff] %v14793_v28  ;;  %12133 = vmatprep.subr.bf16.mxu0 %v14793_v28  ;;  %v16894_v12 = vand.u32 4294901760, %v14781_v53 }
 0x3c1   :  { %12387 = vmatpush3.bf16.msra.mxu1 %v16854_v16  ;;  %v16534_v16 = vand.u32 4294901760, %v14778_v46 }
 0x3c2   :  { %12389 = vmatprep.subr.bf16.mxu1 %v16855_v37  ;;  %v16532_v37 = vand.u32 4294901760, %v14783_v8 }
 0x3c3   :  { %v14799_v13 = vpack.c.bf16 %v16534_v16, %v16535_v9  ;;  %v14840_v16 = vld [vmem:[#allocation10 + $0x50] sm:$0xff]  ;;  %v14843_v9 = vld [vmem:[#allocation10 + $0x68] sm:$0xff] }
 0x3c4   :  { %5720 = vmatmul.mubr.f32.vlgmr.msra.gmra.mrb[16].mxu1 %v14731_v6  ;;  %v16551_v29 = vand.u32 4294901760, %v14843_v9 }
 0x3c5   :  { %12391 = vmatpush3.bf16.msra.mxu1 %v14471_v18  ;;  %5855 = vmatprep.mubr.f32.mxu1 %v14669_v56  ;;  %v16533_v18 = vand.u32 4294901760, %v14781_v53  ;;  %16857 = vst [vmem:[#allocation82_spill] sm:$0xff] %v14799_v13 }
 0x3c6   :  { %12393 = vmatprep.subr.bf16.mxu1 %v14482_v23  ;;  %12135 = vmatpush1.bf16.msra.mxu0 %v14799_v13 }
 0x3c7   :  { %v14805_v23 = vpack.c.bf16 %v16532_v37, %v16533_v18  ;;  %v14820_v37 = vld [vmem:[#allocation10 + $0x30] sm:$0xff] }
 0x3c8   :  { %v16540_v18 = vand.u32 4294901760, %v14820_v37 }
 0x3c9   :  { %16858 = vst [vmem:[#allocation83_spill] sm:$0xff] %v14805_v23  ;;  %12395 = vmatpush3.bf16.msra.mxu1 %v14487_v55  ;;  %12137 = vmatprep.subr.bf16.mxu0 %v14805_v23  ;;  %v14818_v55 = vld [vmem:[#allocation10 + $0x20] sm:$0xff]  ;;  %v16548_v23 = vand.u32 4294901760, %v14845_v11 }
 0x3ca   :  { %12397 = vmatprep.subr.bf16.mxu1 %v14491_v19  ;;  %v16541_v19 = vand.u32 4294901760, %v14818_v55 }
 0x3cb   :  { %v14868_v13 = vpack.c.bf16 %v16548_v23, %v16551_v29  ;;  %v16864_v23 = vand.u32 4294901760, %v14669_v56  ;;  %v14923_v56 = vld [vmem:[#allocation10 + $0xc8] sm:$0xff] }
 0x3cd   :  { %12399 = vmatpush3.bf16.msra.mxu1 %v14496_v24  ;;  %v14825_v24 = vld [vmem:[#allocation10 + $0x48] sm:$0xff]  ;;  %16862 = vst [vmem:[#allocation90_spill] sm:$0xff] %v14868_v13 }
 0x3ce   :  { %12401 = vmatprep.subr.bf16.mxu1 %v14506_v61  ;;  %v14827_v61 = vld [vmem:[#allocation10 + $0x58] sm:$0xff] }
 0x3d1   :  { %12403 = vmatpush3.bf16.msra.mxu1 %v14511_v34  ;;  %v14829_v34 = vld [vmem:[#allocation10 + $0x40] sm:$0xff] }
 0x3d2   :  { %12405 = vmatprep.subr.bf16.mxu1 %v14516_v44  ;;  %v14836_v44 = vpack.c.bf16 %v16540_v18, %v16541_v19 }
 0x3d4   :  { %16859 = vst [vmem:[#allocation84_spill] sm:$0xff] %v14836_v44  ;;  %12139 = vmatpush1.bf16.msra.mxu0 %v14836_v44 }
 0x3d5   :  { %12407 = vmatpush3.bf16.msra.mxu1 %v14520_v42  ;;  %v16545_v42 = vand.u32 4294901760, %v14825_v24 }
 0x3d6   :  { %12409 = vmatprep.subr.bf16.mxu1 %v14524_v0  ;;  %v16544_v0 = vand.u32 4294901760, %v14827_v61 }
 0x3d8   :  { %v14855_v18 = vpack.c.bf16 %v16544_v0, %v16545_v42  ;;  %v14872_v0 = vld [vmem:[#allocation10 + $0x60] sm:$0xff]  ;;  %v14874_v42 = vld [vmem:[#allocation10 + $0x70] sm:$0xff] }
 0x3d9   :  { %12411 = vmatpush3.bf16.msra.mxu1 %v14528_v35  ;;  %v16553_v35 = vand.u32 4294901760, %v14829_v34  ;;  %v16549_v44 = vand.u32 4294901760, %v14874_v42 }
 0x3da   :  { %12413 = vmatprep.subr.bf16.mxu1 %v14532_v51  ;;  %v16552_v51 = vand.u32 4294901760, %v14840_v16  ;;  %16860 = vst [vmem:[#allocation85_spill] sm:$0xff] %v14855_v18  ;;  %12141 = vmatprep.subr.bf16.mxu0 %v14855_v18 }
 0x3dc   :  { %v14862_v19 = vpack.c.bf16 %v16552_v51, %v16553_v35  ;;  %v14904_v35 = vld [vmem:[#allocation10 + $0x90] sm:$0xff]  ;;  %v14919_v51 = vld [vmem:[#allocation10 + $0xa0] sm:$0xff] }
 0x3dd   :  { %12415 = vmatpush3.bf16.msra.mxu1 %v14536_v50  ;;  %v16550_v50 = vand.u32 4294901760, %v14872_v0 }
 0x3de   :  { %16861 = vst [vmem:[#allocation87_spill] sm:$0xff] %v14862_v19  ;;  %12417 = vmatprep.subr.bf16.mxu1 %v14538_v26  ;;  %12143 = vmatpush1.bf16.msra.mxu0 %v14862_v19 }
 0x3df   :  { %12145 = vmatprep.subr.bf16.mxu0 %v14868_v13  ;;  %v14885_v26 = vpack.c.bf16 %v16549_v44, %v16550_v50  ;;  %v14898_v44 = vld [vmem:[#allocation10 + $0x98] sm:$0xff]  ;;  %v14900_v50 = vld [vmem:[#allocation10 + $0x80] sm:$0xff]  ;;  %v16865_v13 = vand.u32 4294901760, %v14768_v14 }
 0x3e1   :  { %12419 = vmatpush3.bf16.msra.mxu1 %v14540_v30  ;;  %16863 = vst [vmem:[#allocation64_spill] sm:$0xff] %v14885_v26  ;;  %v14896_v30 = vld [vmem:[#allocation10 + $0x88] sm:$0xff]  ;;  %v14914_v19 = vsub.f32 %v14768_v14, %v16865_v13  ;;  %v16869_v14 = vand.u32 4294901760, %v14898_v44 }
 0x3e2   :  { %12421 = vmatprep.subr.bf16.mxu1 %v14174_v36  ;;  %12147 = vmatpush1.bf16.msra.mxu0 %v14885_v26  ;;  %v14909_v26 = vld [vmem:[#allocation10 + $0xb8] sm:$0xff]  ;;  %v16868_v13 = vand.u32 4294901760, %v14896_v30  ;;  %v14942_v36 = vld [vmem:[#allocation10 + $0xc0] sm:$0xff] }
 0x3e3   :  { %16866 = vst [vmem:[#allocation65_spill] sm:$0xff] %v14914_v19  ;;  %v16875_v18 = vand.u32 4294901760, %v14909_v26 }
 0x3e4   :  { %5858 = vmatmul.mubr.f32.vlgmr.msra.gmra.mrb[18].mxu1 %v14737_v25  ;;  %v14935_v28 = vpack.c.bf16 %v16869_v14, %v16868_v13 }
 0x3e5   :  { %12423 = vmatpush3.bf16.msra.mxu1 %v14239_v31  ;;  %5962 = vmatprep.mubr.f32.mxu1 %v16864_v23  ;;  %v14907_v23 = vld [vmem:[#allocation10 + $0xa8] sm:$0xff]  ;;  %v14939_v31 = vld [vmem:[#allocation10 + $0xd8] sm:$0xff] }
 0x3e6   :  { %12425 = vmatprep.subr.bf16.mxu1 %v14184_v43  ;;  %16870 = vst [vmem:[#allocation66_spill] sm:$0xff] %v14935_v28  ;;  %v16874_v14 = vand.u32 4294901760, %v14907_v23  ;;  %12149 = vmatprep.subr.bf16.mxu0 %v14935_v28  ;;  %v16881_v39 = vand.u32 4294901760, %v14939_v31  ;;  %v16888_v28 = vand.u32 4294901760, %v14778_v46 }
 0x3e8   :  { %v14957_v29 = vpack.c.bf16 %v16875_v18, %v16874_v14  ;;  %v14971_v18 = vld [vmem:[#allocation10 + $0xf0] sm:$0xff]  ;;  %v16877_v14 = vand.u32 4294901760, %v14919_v51 }
 0x3e9   :  { %12427 = vmatpush3.bf16.msra.mxu1 %v14256_v49  ;;  %v16867_v49 = vand.u32 4294901760, %v14770_v33 }
 0x3ea   :  { %12429 = vmatprep.subr.bf16.mxu1 %v14242_v62  ;;  %v14921_v62 = vld [vmem:[#allocation10 + $0xb0] sm:$0xff]  ;;  %16876 = vst [vmem:[#allocation72_spill] sm:$0xff] %v14957_v29 }
 0x3eb   :  { %v14928_v43 = vsub.f32 %v14770_v33, %v16867_v49  ;;  %v14944_v49 = vld [vmem:[#allocation10 + $0xd0] sm:$0xff]  ;;  %v16871_v33 = vand.u32 4294901760, %v14900_v50  ;;  %v16878_v15 = vand.u32 4294901760, %v14921_v62 }
 0x3ed   :  { %12431 = vmatpush3.bf16.msra.mxu1 %v14325_v40  ;;  %v16872_v40 = vand.u32 4294901760, %v14904_v35  ;;  %v14978_v6 = vpack.c.bf16 %v16878_v15, %v16877_v14  ;;  %v16883_v15 = vand.u32 4294901760, %v14942_v36  ;;  %v16884_v14 = vand.u32 4294901760, %v14944_v49 }
 0x3ee   :  { %12433 = vmatprep.subr.bf16.mxu1 %v14278_v52  ;;  %v14965_v52 = vld [vmem:[#allocation10 + $0xe0] sm:$0xff] }
 0x3ef   :  { %v14951_v13 = vpack.c.bf16 %v16872_v40, %v16871_v33  ;;  %16879 = vst [vmem:[#allocation73_spill] sm:$0xff] %v14978_v6  ;;  %v16880_v33 = vand.u32 4294901760, %v14923_v56  ;;  %v14997_v60 = vpack.c.bf16 %v16884_v14, %v16883_v15  ;;  %v16893_v14 = vand.u32 4294901760, %v14928_v43 }
 0x3f1   :  { %16873 = vst [vmem:[#allocation70_spill] sm:$0xff] %v14951_v13  ;;  %12151 = vmatpush1.bf16.msra.mxu0 %v14951_v13  ;;  %12435 = vmatpush3.bf16.msra.mxu1 %v14356_v21  ;;  %v14987_v40 = vpack.c.bf16 %v16881_v39, %v16880_v33  ;;  %16885 = vst [vmem:[#allocation81_spill] sm:$0xff] %v14997_v60  ;;  %v16887_v39 = vand.u32 4294901760, %v14772_v48  ;;  %v15010_v13 = vsub.f32 %v14778_v46, %v16888_v28 }
 0x3f2   :  { %12153 = vmatprep.subr.bf16.mxu0 %v14957_v29  ;;  %12437 = vmatprep.subr.bf16.mxu1 %v14333_v57  ;;  %v16886_v29 = vand.u32 4294901760, %v14914_v19  ;;  %v16891_v57 = vand.u32 4294901760, %v14963_v3 }
 0x3f3   :  { %16882 = vst [vmem:[#allocation75_spill] sm:$0xff] %v14987_v40  ;;  %v15005_v33 = vsub.f32 %v14772_v48, %v16887_v39  ;;  %16889 = vst [vmem:[#allocation86_spill] sm:$0xff] %v15010_v13  ;;  %v15024_v48 = vsub.f32 %v14781_v53, %v16894_v12  ;;  %v16895_v39 = vand.u32 4294901760, %v14783_v8  ;;  %v16899_v53 = vand.u32 4294901760, %v14965_v52 }
 0x3f4   :  { %v4637_v21 = vsub.f32 %v14914_v19, %v16886_v29  ;;  %v15016_v15 = vpack.c.bf16 %v16891_v57, %v16890_v27  ;;  %v4649_v29 = vsub.f32 %v14928_v43, %v16893_v14  ;;  %v16596_v27 = vand.u32 4294901760, %v15010_v13 }
 0x3f5   :  { %v15029_v28 = vsub.f32 %v14783_v8, %v16895_v39  ;;  %12155 = vmatpush1.bf16.msra.mxu0 %v14978_v6  ;;  %v16594_v57 = vand.u32 4294901760, %v15005_v33  ;;  %v16897_v19 = vand.u32 4294901760, %v14818_v55  ;;  %12439 = vmatpush3.bf16.msra.mxu1 %v14423_v38  ;;  %v16900_v8 = vand.u32 4294901760, %v14971_v18 }
 0x3f6   :  { %16892 = vst [vmem:[#allocation89_spill] sm:$0xff] %v15016_v15  ;;  %v4638_v46 = vand.u32 4294901760, %v4637_v21  ;;  %12157 = vmatprep.subr.bf16.mxu0 %v14987_v40  ;;  %v4650_v12 = vand.u32 4294901760, %v4649_v29  ;;  %v16898_v21 = vand.u32 4294901760, %v14820_v37  ;;  %12441 = vmatprep.subr.bf16.mxu1 %v14405_v22 }
 0x3f7   :  { %16896 = vst [vmem:[#allocation92_spill] sm:$0xff] %v15029_v28  ;;  %v15037_v14 = vsub.f32 %v14818_v55, %v16897_v19  ;;  %v4643_v55 = vsub.f32 %v15005_v33, %v16594_v57  ;;  %v4655_v19 = vsub.f32 %v15010_v13, %v16596_v27  ;;  %v15060_v40 = vpack.c.bf16 %v16900_v8, %v16899_v53 }
 0x3f8   :  { %v15046_v39 = vsub.f32 %v14820_v37, %v16898_v21  ;;  %v16902_v37 = vand.u32 4294901760, %v15024_v48  ;;  %v16903_v6 = vand.u32 4294901760, %v15029_v28  ;;  %v15070_v27 = vpack.c.bf16 %v4650_v12, %v4638_v46 }
 0x3f9   :  { %16901 = vst [vmem:[#allocation93_spill] sm:$0xff] %v15060_v40  ;;  %12159 = vmatpush1.bf16.msra.mxu0 %v14997_v60  ;;  %v4644_v29 = vand.u32 4294901760, %v4643_v55  ;;  %v4656_v38 = vand.u32 4294901760, %v4655_v19  ;;  %v16905_v13 = vand.u32 4294901760, %v15037_v14  ;;  %12443 = vmatpush3.bf16.msra.mxu1 %v14458_v59  ;;  %v16906_v60 = vand.u32 4294901760, %v14825_v24 }
 0x3fa   :  { %v4661_v21 = vsub.f32 %v15024_v48, %v16902_v37  ;;  %v4673_v57 = vsub.f32 %v15029_v28, %v16903_v6  ;;  %v16602_v22 = vand.u32 4294901760, %v15046_v39  ;;  %16904 = vst [vmem:[#allocation94_spill] sm:$0xff] %v15070_v27  ;;  %12161 = vmatprep.subr.bf16.mxu0 %v15016_v15  ;;  %12445 = vmatprep.subr.bf16.mxu1 %v14456_v2  ;;  %v16908_v55 = vand.u32 4294901760, %v14827_v61 }
 0x3fb   :  { %v4667_v53 = vsub.f32 %v15037_v14, %v16905_v13  ;;  %v15083_v46 = vsub.f32 %v14825_v24, %v16906_v60  ;;  %v15086_v12 = vpack.c.bf16 %v4656_v38, %v4644_v29  ;;  %v16911_v24 = vand.u32 4294901760, %v14840_v16 }
 0x3fc   :  { %v4662_v8 = vand.u32 4294901760, %v4661_v21  ;;  %v4674_v37 = vand.u32 4294901760, %v4673_v57  ;;  %v4679_v6 = vsub.f32 %v15046_v39, %v16602_v22  ;;  %v15091_v19 = vsub.f32 %v14827_v61, %v16908_v55 }
 0x3fd   :  { %16907 = vst [vmem:[#allocation95_spill] sm:$0xff] %v15086_v12  ;;  %v4668_v13 = vand.u32 4294901760, %v4667_v53  ;;  %v16909_v57 = vand.u32 4294901760, %v14829_v34  ;;  %v16605_v60 = vand.u32 4294901760, %v15083_v46  ;;  %v15104_v38 = vsub.f32 %v14840_v16, %v16911_v24  ;;  %12163 = vmatpush1.bf16.msra.mxu0 %v15060_v40  ;;  %12447 = vmatpush3.bf16.msra.mxu1 %v14463_v63 }
 0x3fe   :  { %v15098_v22 = vpack.c.bf16 %v4674_v37, %v4662_v8  ;;  %v4680_v15 = vand.u32 4294901760, %v4679_v6  ;;  %v16606_v61 = vand.u32 4294901760, %v15091_v19  ;;  %v16912_v53 = vand.u32 4294901760, %v14843_v9  ;;  %12165 = vmatprep.subr.bf16.mxu0 %v15070_v27  ;;  %12449 = vmatprep.subr.bf16.mxu1 %v14466_v58 }
 0x3ff   :  { %v15096_v21 = vsub.f32 %v14829_v34, %v16909_v57  ;;  %v16914_v8 = vand.u32 4294901760, %v14845_v11  ;;  %v4685_v6 = vsub.f32 %v15083_v46, %v16605_v60  ;;  %v16609_v55 = vand.u32 4294901760, %v15104_v38 }
 0x400   :  { %16910 = vst [vmem:[#allocation97_spill] sm:$0xff] %v15098_v22  ;;  %v15112_v34 = vsub.f32 %v14843_v9, %v16912_v53  ;;  %v15121_v16 = vpack.c.bf16 %v4680_v15, %v4668_v13  ;;  %v16917_v9 = vand.u32 4294901760, %v14872_v0 }
 0x401   :  { %v16608_v29 = vand.u32 4294901760, %v15096_v21  ;;  %v15117_v37 = vsub.f32 %v14845_v11, %v16914_v8  ;;  %v4697_v11 = vsub.f32 %v15091_v19, %v16606_v61  ;;  %v4686_v53 = vand.u32 4294901760, %v4685_v6  ;;  %12451 = vmatpush3.bf16.msra.mxu1 %v14474_v20 }
 0x402   :  { %16913 = vst [vmem:[#allocation98_spill] sm:$0xff] %v15112_v34  ;;  %16916 = vst [vmem:[#allocation105_spill] sm:$0xff] %v15121_v16  ;;  %v15130_v57 = vsub.f32 %v14872_v0, %v16917_v9  ;;  %v16612_v13 = vand.u32 4294901760, %v15112_v34  ;;  %v4703_v0 = vsub.f32 %v15104_v38, %v16609_v55  ;;  %v16918_v9 = vand.u32 4294901760, %v14874_v42  ;;  %12453 = vmatprep.subr.bf16.mxu1 %v14599_v32 }
 0x403   :  { %16915 = vst [vmem:[#allocation96_spill] sm:$0xff] %v15117_v37  ;;  %v4691_v15 = vsub.f32 %v15096_v21, %v16608_v29  ;;  %v16613_v24 = vand.u32 4294901760, %v15117_v37  ;;  %v4698_v61 = vand.u32 4294901760, %v4697_v11  ;;  %v16920_v11 = vand.u32 4294901760, %v14896_v30 }
 0x404   :  { %v16616_v8 = vand.u32 4294901760, %v15130_v57  ;;  %v15148_v60 = vsub.f32 %v14874_v42, %v16918_v9  ;;  %v4709_v29 = vsub.f32 %v15112_v34, %v16612_v13  ;;  %v4704_v55 = vand.u32 4294901760, %v4703_v0 }
 0x405   :  { %v4692_v27 = vand.u32 4294901760, %v4691_v15  ;;  %v4721_v6 = vsub.f32 %v15117_v37, %v16613_v24  ;;  %v15164_v15 = vsub.f32 %v14896_v30, %v16920_v11  ;;  %v15167_v9 = vpack.c.bf16 %v4698_v61, %v4686_v53 }
 0x406   :  { %16919 = vst [vmem:[#allocation106_spill] sm:$0xff] %v15148_v60  ;;  %v4715_v40 = vsub.f32 %v15130_v57, %v16616_v8  ;;  %v16633_v42 = vand.u32 4294901760, %v15148_v60  ;;  %v4710_v13 = vand.u32 4294901760, %v4709_v29  ;;  %v16921_v16 = vand.u32 4294901760, %v14898_v44 }
 0x407   :  { %v4722_v24 = vand.u32 4294901760, %v4721_v6  ;;  %v15174_v22 = vpack.c.bf16 %v4704_v55, %v4692_v27  ;;  %v16623_v30 = vand.u32 4294901760, %v15164_v15  ;;  %v16923_v32 = vand.u32 4294901760, %v14737_v25 }
 0x408   :  { %v15172_v0 = vsub.f32 %v14898_v44, %v16921_v16  ;;  %v4716_v8 = vand.u32 4294901760, %v4715_v40  ;;  %v4727_v12 = vsub.f32 %v15148_v60, %v16633_v42  ;;  %v16924_v53 = vand.u32 4294901760, %v14900_v50 }
 0x409   :  { %5966 = vmatmul.mubr.f32.vlgmr.msra.gmra.mrb[20].mxu1 %v16923_v32  ;;  %v15182_v61 = vpack.c.bf16 %v4722_v24, %v4710_v13  ;;  %v16925_v40 = vand.u32 4294901760, %v14904_v35  ;;  %v4733_v16 = vsub.f32 %v15164_v15, %v16623_v30  ;;  %v16926_v55 = vand.u32 4294901760, %v14907_v23 }
 0x40a   :  { %16922 = vst [vmem:[#allocation107_spill] sm:$0xff] %v15172_v0  ;;  %v16622_v29 = vand.u32 4294901760, %v15172_v0  ;;  %v15188_v44 = vsub.f32 %v14900_v50, %v16924_v53  ;;  %12455 = vmatpush3.bf16.msra.mxu1 %v14608_v41  ;;  %6132 = vmatprep.mubr.f32.mxu1 %v14650_v10  ;;  %v4728_v25 = vand.u32 4294901760, %v4727_v12  ;;  %v16927_v50 = vand.u32 4294901760, %v14909_v26 }
 0x40b   :  { %v15193_v27 = vsub.f32 %v14904_v35, %v16925_v40  ;;  %v15203_v13 = vsub.f32 %v14907_v23, %v16926_v55  ;;  %12457 = vmatprep.subr.bf16.mxu1 %v14616_v17  ;;  %v16928_v6 = vand.u32 4294901760, %v14919_v51  ;;  %v4734_v32 = vand.u32 4294901760, %v4733_v16 }
 0x40c   :  { %v15208_v24 = vsub.f32 %v14909_v26, %v16927_v50  ;;  %v4745_v41 = vsub.f32 %v15172_v0, %v16622_v29  ;;  %v16621_v35 = vand.u32 4294901760, %v15188_v44  ;;  %v15221_v11 = vpack.c.bf16 %v4728_v25, %v4716_v8 }
 0x40d   :  { %v16618_v12 = vand.u32 4294901760, %v15193_v27  ;;  %v15219_v23 = vsub.f32 %v14919_v51, %v16928_v6  ;;  %v16619_v26 = vand.u32 4294901760, %v15203_v13  ;;  %v16930_v25 = vand.u32 4294901760, %v14921_v62 }
 0x40e   :  { %v16620_v17 = vand.u32 4294901760, %v15208_v24  ;;  %v4746_v53 = vand.u32 4294901760, %v4745_v41  ;;  %v4739_v40 = vsub.f32 %v15188_v44, %v16621_v35  ;;  %12459 = vmatpush3.bf16.msra.mxu1 %v14623_v1  ;;  %v16932_v41 = vand.u32 4294901760, %v14923_v56 }
 0x40f   :  { %16929 = vst [vmem:[#allocation108_spill] sm:$0xff] %v15219_v23  ;;  %v4751_v55 = vsub.f32 %v15193_v27, %v16618_v12  ;;  %v16631_v50 = vand.u32 4294901760, %v15219_v23  ;;  %v4757_v51 = vsub.f32 %v15203_v13, %v16619_v26  ;;  %v15242_v16 = vsub.f32 %v14921_v62, %v16930_v25  ;;  %12461 = vmatprep.subr.bf16.mxu1 %v14631_v7 }
 0x410   :  { %v4769_v8 = vsub.f32 %v15208_v24, %v16620_v17  ;;  %v15247_v6 = vsub.f32 %v14923_v56, %v16932_v41  ;;  %v15250_v1 = vpack.c.bf16 %v4746_v53, %v4734_v32  ;;  %v4740_v12 = vand.u32 4294901760, %v4739_v40 }
 0x411   :  { %16931 = vst [vmem:[#allocation109_spill] sm:$0xff] %v15242_v16  ;;  %v4752_v26 = vand.u32 4294901760, %v4751_v55  ;;  %v4763_v17 = vsub.f32 %v15219_v23, %v16631_v50  ;;  %v4758_v35 = vand.u32 4294901760, %v4757_v51  ;;  %v16629_v62 = vand.u32 4294901760, %v15242_v16 }
 0x412   :  { %16933 = vst [vmem:[#allocation110_spill] sm:$0xff] %v15247_v6  ;;  %v4770_v29 = vand.u32 4294901760, %v4769_v8  ;;  %v16627_v25 = vand.u32 4294901760, %v15247_v6  ;;  %v16934_v41 = vand.u32 4294901760, %v14939_v31  ;;  %v16936_v32 = vand.u32 4294901760, %v14942_v36  ;;  %12463 = vmatpush3.bf16.msra.mxu1 %v14639_v47 }
 0x413   :  { %v15257_v30 = vpack.c.bf16 %v4752_v26, %v4740_v12  ;;  %v4764_v56 = vand.u32 4294901760, %v4763_v17  ;;  %v4775_v12 = vsub.f32 %v15242_v16, %v16629_v62  ;;  %12465 = vmatprep.subr.bf16.mxu1 %v14647_v5  ;;  %v16942_v55 = vand.u32 4294901760, %v14963_v3 }
 0x414   :  { %v15262_v7 = vsub.f32 %v14939_v31, %v16934_v41  ;;  %v15267_v53 = vsub.f32 %v14942_v36, %v16936_v32  ;;  %v15270_v40 = vpack.c.bf16 %v4770_v29, %v4758_v35  ;;  %v4781_v26 = vsub.f32 %v15247_v6, %v16627_v25 }
 0x415   :  { %v16938_v31 = vand.u32 4294901760, %v14944_v49  ;;  %v16940_v29 = vand.u32 4294901760, %v14961_v54  ;;  %v15294_v51 = vsub.f32 %v14963_v3, %v16942_v55  ;;  %v4776_v8 = vand.u32 4294901760, %v4775_v12 }
 0x416   :  { %16935 = vst [vmem:[#allocation111_spill] sm:$0xff] %v15262_v7  ;;  %16937 = vst [vmem:[#allocation112_spill] sm:$0xff] %v15267_v53  ;;  %v16625_v36 = vand.u32 4294901760, %v15262_v7  ;;  %v16624_v47 = vand.u32 4294901760, %v15267_v53  ;;  %v4782_v41 = vand.u32 4294901760, %v4781_v26  ;;  %v16944_v5 = vand.u32 4294901760, %v14965_v52  ;;  %12467 = vmatpush3.bf16.msra.mxu1 %v14657_v4 }
 0x417   :  { %v15281_v17 = vsub.f32 %v14944_v49, %v16938_v31  ;;  %v15289_v35 = vsub.f32 %v14961_v54, %v16940_v29  ;;  %16943 = vst [vmem:[#allocation115_spill] sm:$0xff] %v15294_v51  ;;  %v16630_v12 = vand.u32 4294901760, %v15294_v51  ;;  %v15311_v26 = vpack.c.bf16 %v4776_v8, %v4764_v56  ;;  %12469 = vmatprep.subr.bf16.mxu1 %v14665_v45 }
 0x418   :  { %v15300_v32 = vsub.f32 %v14965_v52, %v16944_v5  ;;  %v4793_v31 = vsub.f32 %v15262_v7, %v16625_v36  ;;  %v4787_v54 = vsub.f32 %v15267_v53, %v16624_v47  ;;  %v16946_v55 = vand.u32 4294901760, %v14971_v18 }
 0x419   :  { %16939 = vst [vmem:[#allocation113_spill] sm:$0xff] %v15281_v17  ;;  %16941 = vst [vmem:[#allocation114_spill] sm:$0xff] %v15289_v35  ;;  %v16626_v49 = vand.u32 4294901760, %v15281_v17  ;;  %v16628_v3 = vand.u32 4294901760, %v15289_v35  ;;  %v4817_v56 = vsub.f32 %v15294_v51, %v16630_v12  ;;  %v16950_v12 = vld [vmem:[#allocation59_spill] sm:$0xff]  ;;  %v15351_v42 = vpack.c.bf16 %v15029_v28, %v15024_v48 }
 0x41a   :  { %16945 = vst [vmem:[#allocation116_spill] sm:$0xff] %v15300_v32  ;;  %v16632_v29 = vand.u32 4294901760, %v15300_v32  ;;  %v15320_v5 = vsub.f32 %v14971_v18, %v16946_v55  ;;  %v4794_v47 = vand.u32 4294901760, %v4793_v31  ;;  %v4788_v36 = vand.u32 4294901760, %v4787_v54  ;;  %v16948_v55 = vld [vmem:[#allocation65_spill] sm:$0xff]  ;;  %12471 = vmatpush3.bf16.msra.mxu1 %v16950_v12 }
 0x41b   :  { %v4799_v52 = vsub.f32 %v15281_v17, %v16626_v49  ;;  %v4805_v4 = vsub.f32 %v15289_v35, %v16628_v3  ;;  %v15335_v45 = vpack.c.bf16 %v14928_v43, %v16948_v55  ;;  %v4818_v25 = vand.u32 4294901760, %v4817_v56  ;;  %v16949_v3 = vld [vmem:[#allocation86_spill] sm:$0xff]  ;;  %16951 = vst [vmem:[#allocation65_spill] sm:$0xff] %v15351_v42 }
 0x41c   :  { %16947 = vst [vmem:[#allocation117_spill] sm:$0xff] %v15320_v5  ;;  %v4811_v49 = vsub.f32 %v15300_v32, %v16632_v29  ;;  %v16634_v18 = vand.u32 4294901760, %v15320_v5  ;;  %v15337_v31 = vpack.c.bf16 %v4794_v47, %v4782_v41  ;;  %v15341_v62 = vpack.c.bf16 %v16949_v3, %v15005_v33  ;;  %v11491_v47 = vpop.f32.mrb[8].mxu1  ;;  %v16952_v41 = vld [vmem:[#allocation61_spill] sm:$0xff] }
 0x41d   :  { %v4800_v8 = vand.u32 4294901760, %v4799_v52  ;;  %v4806_v54 = vand.u32 4294901760, %v4805_v4  ;;  %12473 = vmatprep.subr.bf16.mxu1 %v16952_v41  ;;  %v15358_v56 = vpack.c.bf16 %v15046_v39, %v15037_v14  ;;  %v15366_v28 = vpack.c.bf16 %v15091_v19, %v15083_v46 }
 0x41e   :  { %v4812_v50 = vand.u32 4294901760, %v4811_v49  ;;  %v4823_v29 = vsub.f32 %v15320_v5, %v16634_v18  ;;  %v16955_v18 = vld [vmem:[#allocation63_spill] sm:$0xff] }
 0x41f   :  { %v15344_v52 = vpack.c.bf16 %v4800_v8, %v4788_v36  ;;  %v15354_v4 = vpack.c.bf16 %v4818_v25, %v4806_v54  ;;  %16953 = vst [vmem:[#allocation59_spill] sm:$0xff] %v15358_v56  ;;  %v11492_v36 = vpop.f32.mrb[9].mxu1  ;;  %v16954_v8 = vld [vmem:[#allocation62_spill] sm:$0xff]  ;;  %16956 = vst [vmem:[#allocation61_spill] sm:$0xff] %v15366_v28  ;;  %v15370_v25 = vpack.c.bf16 %v15104_v38, %v15096_v21 }
 0x420   :  { %v4824_v12 = vand.u32 4294901760, %v4823_v29  ;;  %v11493_v49 = vadd.f32 %v11492_v36, %v11491_v47  ;;  %12475 = vmatpush3.bf16.msra.mxu1 %v16954_v8  ;;  %v15374_v54 = vpack.c.bf16 %v15117_v37, %v15112_v34  ;;  %v15378_v29 = vpack.c.bf16 %v15148_v60, %v15130_v57  ;;  %v11456_v47 = vpop.f32.mrb[6].mxu0  ;;  %v16964_v37 = vld [vmem:[#allocation100_spill] sm:$0xff]  ;;  %v16965_v60 = vld [vmem:[#allocation51_spill] sm:$0xff] }
 0x421   :  { %12477 = vmatprep.subr.bf16.mxu1 %v16955_v18  ;;  %16957 = vst [vmem:[#allocation62_spill] sm:$0xff] %v15370_v25  ;;  %v16961_v18 = vld [vmem:[#allocation99_spill] sm:$0xff]  ;;  %v11457_v41 = vpop.f32.mrb[7].mxu0  ;;  %v15384_v36 = vpack.c.bf16 %v15172_v0, %v15164_v15  ;;  %v15388_v8 = vpack.c.bf16 %v15193_v27, %v15188_v44  ;;  %v15399_v0 = vpack.c.bf16 %v15242_v16, %v15219_v23 }
 0x422   :  { %v15361_v3 = vpack.c.bf16 %v4824_v12, %v4812_v50  ;;  %16958 = vst [vmem:[#allocation63_spill] sm:$0xff] %v15374_v54  ;;  %16959 = vst [vmem:[#allocation118_spill] sm:$0xff] %v15378_v29  ;;  %v16960_v50 = vld [vmem:[#allocation77_spill] sm:$0xff]  ;;  %v11458_v12 = vadd.f32 %v11457_v41, %v11456_v47  ;;  %v16969_v47 = vld [vmem:[#allocation67_spill] sm:$0xff]  ;;  %v15416_v16 = vpack.c.bf16 %v15294_v51, %v15289_v35 }
 0x423   :  { %16962 = vst [vmem:[#allocation77_spill] sm:$0xff] %v15384_v36  ;;  %16963 = vst [vmem:[#allocation99_spill] sm:$0xff] %v15388_v8  ;;  %v16970_v41 = vld [vmem:[#allocation60_spill] sm:$0xff] }
 0x424   :  { %12479 = vmatpush3.bf16.msra.mxu1 %v16960_v50  ;;  %v3972_v34 = vadd.f32 %v11493_v49, %v11458_v12  ;;  %v15394_v50 = vpack.c.bf16 %v15208_v24, %v15203_v13  ;;  %16968 = vst [vmem:[#allocation51_spill] sm:$0xff] %v15399_v0  ;;  %v16973_v49 = vld [vmem:[#allocation69_spill] sm:$0xff]  ;;  %v16974_v12 = vld [vmem:[#allocation68_spill] sm:$0xff]  ;;  %16975 = vst [vmem:[#allocation60_spill] sm:$0xff] %v15416_v16 }
 0x425   :  { %12481 = vmatprep.subr.bf16.mxu1 %v16961_v18  ;;  %v16967_v18 = vld [vmem:[#allocation78_spill] sm:$0xff] }
 0x426   :  { %16966 = vst [vmem:[#allocation100_spill] sm:$0xff] %v15394_v50 }
 0x428   :  { %12483 = vmatpush3.bf16.msra.mxu1 %v16964_v37  ;;  %v15406_v37 = vpack.c.bf16 %v15262_v7, %v15247_v6  ;;  %v16979_v7 = vld [vmem:[#allocation80_spill] sm:$0xff] }
 0x429   :  { %12485 = vmatprep.subr.bf16.mxu1 %v16965_v60  ;;  %v15410_v60 = vpack.c.bf16 %v15281_v17, %v15267_v53  ;;  %v16980_v17 = vld [vmem:[#allocation76_spill] sm:$0xff]  ;;  %v16981_v53 = vld [vmem:[#allocation91_spill] sm:$0xff] }
 0x42a   :  { %16971 = vst [vmem:[#allocation78_spill] sm:$0xff] %v15406_v37 }
 0x42b   :  { %6134 = vmatmul.mubr.f32.vlgmr.msra.gmra.mrb[22].mxu1 %v16967_v18  ;;  %16972 = vst [vmem:[#allocation67_spill] sm:$0xff] %v15410_v60 }
 0x42c   :  { %12487 = vmatpush3.bf16.msra.mxu1 %v16969_v47  ;;  %6236 = vmatprep.mubr.f32.mxu1 %v14650_v10  ;;  %v15420_v10 = vpack.c.bf16 %v15320_v5, %v15300_v32  ;;  %v16977_v47 = vld [vmem:[#allocation74_spill] sm:$0xff] }
 0x42d   :  { %12489 = vmatprep.subr.bf16.mxu1 %v16970_v41  ;;  %v16978_v41 = vld [vmem:[#allocation71_spill] sm:$0xff] }
 0x42e   :  { %16976 = vst [vmem:[#allocation69_spill] sm:$0xff] %v15420_v10 }
 0x430   :  { %12491 = vmatpush3.bf16.msra.mxu1 %v16973_v49 }
 0x431   :  { %12493 = vmatprep.subr.bf16.mxu1 %v16974_v12  ;;  %v16982_v12 = vld [vmem:[#allocation88_spill] sm:$0xff] }
 0x434   :  { %12495 = vmatpush3.bf16.msra.mxu1 %v16977_v47 }
 0x435   :  { %12497 = vmatprep.subr.bf16.mxu1 %v16978_v41 }
 0x436   :  { %v11561_v49 = vpop.f32.mrb[10].mxu1 }
 0x437   :  { %v11562_v6 = vpop.f32.mrb[11].mxu1 }
 0x438   :  { %12499 = vmatpush3.bf16.msra.mxu1 %v16979_v7  ;;  %v11563_v51 = vadd.f32 %v11562_v6, %v11561_v49 }
 0x439   :  { %12501 = vmatprep.subr.bf16.mxu1 %v16980_v17 }
 0x43c   :  { %12503 = vmatpush3.bf16.msra.mxu1 %v16981_v53 }
 0x43d   :  { %12505 = vmatprep.subr.bf16.mxu1 %v16982_v12  ;;  %v16983_v12 = vmov 0.0  }
 0x43e   :  { %v11526_v47 = vpop.f32.mrb[8].mxu0 }
 0x43f   :  { %v11527_v41 = vpop.f32.mrb[9].mxu0 }
 0x440   :  { %12507 = vmatpush3.bf16.msra.mxu1 %v14458_v59  ;;  %v11528_v7 = vadd.f32 %v11527_v41, %v11526_v47 }
 0x441   :  { %12509 = vmatprep.subr.bf16.mxu1 %v14456_v2 }
 0x442   :  { %v4110_v17 = vadd.f32 %v11528_v7, %v3972_v34 }
 0x444   :  { %12511 = vmatpush3.bf16.msra.mxu1 %v14463_v63  ;;  %v4218_v53 = vadd.f32 %v11563_v51, %v4110_v17 }
 0x445   :  { %12513 = vmatprep.subr.bf16.mxu1 %v14466_v58 }
 0x448   :  { %12515 = vmatpush3.bf16.msra.mxu1 %v14474_v20 }
 0x44b   :  { %6238 = vmatmul.mubr.f32.vlgmr.msra.gmra.mrb[24].mxu1 %v16967_v18  ;;  %v16984_v18 = vld [vmem:[#allocation95_spill] sm:$0xff] }
 0x44c   :  { %7181 = vmatprep.mubr.f32.mxu1 %v16983_v12 }
 0x457   :  { %v11631_v6 = vpop.f32.mrb[12].mxu1 }
 0x458   :  { %v11632_v49 = vpop.f32.mrb[13].mxu1 }
 0x459   :  { %v11633_v59 = vadd.f32 %v11632_v49, %v11631_v6  ;;  %v16987_v49 = vld [vmem:[#allocation79_spill] sm:$0xff] }
 0x45e   :  { %v11596_v5 = vpop.f32.mrb[10].mxu0 }
 0x45f   :  { %v11597_v2 = vpop.f32.mrb[11].mxu0 }
 0x460   :  { %v11598_v32 = vadd.f32 %v11597_v2, %v11596_v5  ;;  %v16989_v2 = vld [vmem:[#allocation83_spill] sm:$0xff] }
 0x462   :  { %v4386_v63 = vadd.f32 %v11598_v32, %v4218_v53  ;;  %v16985_v32 = vld [vmem:[#allocation97_spill] sm:$0xff] }
 0x464   :  { %v4490_v35 = vadd.f32 %v11633_v59, %v4386_v63  ;;  %v16988_v59 = vld [vmem:[#allocation82_spill] sm:$0xff]  ;;  %v16990_v63 = vld [vmem:[#allocation84_spill] sm:$0xff] }
 0x466   :  { %v4493_v23 = vmax.f32 %v4490_v35, 0.0  ;;  %v16986_v35 = vld [vmem:[#allocation105_spill] sm:$0xff] }
 0x468   :  { %v15435_v58 = vand.u32 4294901760, %v4493_v23 }
 0x46a   :  { %v15438_v47 = vsub.f32 %v4493_v23, %v15435_v58 }
 0x46c   :  { %v16650_v20 = vand.u32 4294901760, %v15438_v47 }
 0x46e   :  { %v4626_v34 = vsub.f32 %v15438_v47, %v16650_v20  ;;  %v16995_v20 = vld [vmem:[#allocation66_spill] sm:$0xff] }
 0x470   :  { %v4627_v51 = vand.u32 4294901760, %v4626_v34 }
 0x472   :  { %4628 = vmatmul.mubr.f32.vlgmr.msra.gmra.mrb[12].mxu0 %v4627_v51 }
 0x473   :  { %12167 = vmatpush1.bf16.msra.mxu0 %v16984_v18  ;;  %4858 = vmatprep.mubr.f32.mxu0 %v16983_v12 }
 0x474   :  { %12169 = vmatprep.subr.bf16.mxu0 %v16985_v32 }
 0x477   :  { %12171 = vmatpush1.bf16.msra.mxu0 %v16986_v35  ;;  %v11666_v5 = vpop.f32.mrb[14].mxu1 }
 0x478   :  { %v11667_v41 = vpop.f32.mrb[15].mxu1  ;;  %12173 = vmatprep.subr.bf16.mxu0 %v15167_v9 }
 0x479   :  { %v11668_v23 = vadd.f32 %v11667_v41, %v11666_v5  ;;  %v16991_v5 = vld [vmem:[#allocation85_spill] sm:$0xff] }
 0x47b   :  { %12175 = vmatpush1.bf16.msra.mxu0 %v15174_v22 }
 0x47c   :  { %12177 = vmatprep.subr.bf16.mxu0 %v15182_v61 }
 0x47f   :  { %12179 = vmatpush1.bf16.msra.mxu0 %v15221_v11 }
 0x480   :  { %12181 = vmatprep.subr.bf16.mxu0 %v15250_v1 }
 0x483   :  { %12183 = vmatpush1.bf16.msra.mxu0 %v15257_v30 }
 0x484   :  { %12185 = vmatprep.subr.bf16.mxu0 %v15270_v40 }
 0x487   :  { %12187 = vmatpush1.bf16.msra.mxu0 %v15311_v26 }
 0x488   :  { %12189 = vmatprep.subr.bf16.mxu0 %v15337_v31 }
 0x48b   :  { %12191 = vmatpush1.bf16.msra.mxu0 %v15344_v52 }
 0x48c   :  { %12193 = vmatprep.subr.bf16.mxu0 %v15354_v4 }
 0x48f   :  { %12195 = vmatpush1.bf16.msra.mxu0 %v15361_v3 }
 0x490   :  { %12197 = vmatprep.subr.bf16.mxu0 %v15335_v45 }
 0x492   :  { %4860 = vmatmul.mubr.f32.vlgmr.msra.gmra.mrb[12].mxu0 %v15435_v58 }
 0x493   :  { %12199 = vmatpush1.bf16.msra.mxu0 %v15341_v62  ;;  %4994 = vmatprep.mubr.f32.mxu0 %v16983_v12 }
 0x494   :  { %12201 = vmatprep.subr.bf16.mxu0 %v15351_v42 }
 0x497   :  { %12203 = vmatpush1.bf16.msra.mxu0 %v15358_v56  ;;  %v11701_v7 = vpop.f32.mrb[16].mxu1 }
 0x498   :  { %v11702_v17 = vpop.f32.mrb[17].mxu1  ;;  %12205 = vmatprep.subr.bf16.mxu0 %v15366_v28  ;;  %v17009_v28 = vld [vmem:[#allocation92_spill] sm:$0xff] }
 0x499   :  { %v11703_v53 = vadd.f32 %v11702_v17, %v11701_v7  ;;  %v16992_v7 = vld [vmem:[#allocation87_spill] sm:$0xff]  ;;  %v16993_v17 = vld [vmem:[#allocation90_spill] sm:$0xff]  ;;  %v17010_v56 = vand.u32 4294901760, %v17009_v28  ;;  %v17015_v28 = vand.u32 4294901760, %v15091_v19 }
 0x49b   :  { %v5722_v6 = vadd.f32 %v11703_v53, %v11668_v23  ;;  %12207 = vmatpush1.bf16.msra.mxu0 %v15370_v25  ;;  %v16994_v53 = vld [vmem:[#allocation64_spill] sm:$0xff]  ;;  %v17008_v25 = vand.u32 4294901760, %v15024_v48  ;;  %v17014_v48 = vand.u32 4294901760, %v15083_v46 }
 0x49c   :  { %12209 = vmatprep.subr.bf16.mxu0 %v15374_v54 }
 0x49d   :  { %v15513_v42 = vpack.c.bf16 %v17010_v56, %v17008_v25  ;;  %v15530_v56 = vpack.c.bf16 %v17015_v28, %v17014_v48  ;;  %v17025_v28 = vand.u32 4294901760, %v15164_v15  ;;  %v17032_v15 = vld [vmem:[#allocation108_spill] sm:$0xff] }
 0x49f   :  { %12211 = vmatpush1.bf16.msra.mxu0 %v15378_v29 }
 0x4a0   :  { %12213 = vmatprep.subr.bf16.mxu0 %v15384_v36  ;;  %v17006_v36 = vld [vmem:[#allocation86_spill] sm:$0xff] }
 0x4a1   :  { %v17007_v29 = vand.u32 4294901760, %v17006_v36 }
 0x4a3   :  { %12215 = vmatpush1.bf16.msra.mxu0 %v15388_v8  ;;  %v17005_v8 = vand.u32 4294901760, %v15005_v33  ;;  %v17013_v33 = vand.u32 4294901760, %v15046_v39 }
 0x4a4   :  { %12217 = vmatprep.subr.bf16.mxu0 %v15394_v50  ;;  %v17004_v50 = vld [vmem:[#allocation93_spill] sm:$0xff] }
 0x4a5   :  { %v15506_v54 = vpack.c.bf16 %v17007_v29, %v17005_v8  ;;  %v17016_v29 = vand.u32 4294901760, %v15096_v21  ;;  %v17023_v21 = vld [vmem:[#allocation106_spill] sm:$0xff] }
 0x4a6   :  { %v17024_v48 = vand.u32 4294901760, %v17023_v21 }
 0x4a7   :  { %12219 = vmatpush1.bf16.msra.mxu0 %v15399_v0  ;;  %v17000_v0 = vld [vmem:[#allocation81_spill] sm:$0xff] }
 0x4a8   :  { %12221 = vmatprep.subr.bf16.mxu0 %v15406_v37  ;;  %v16999_v37 = vld [vmem:[#allocation75_spill] sm:$0xff] }
 0x4ab   :  { %12223 = vmatpush1.bf16.msra.mxu0 %v15410_v60  ;;  %v16998_v60 = vld [vmem:[#allocation73_spill] sm:$0xff] }
 0x4ac   :  { %12225 = vmatprep.subr.bf16.mxu0 %v15416_v16  ;;  %v16997_v16 = vld [vmem:[#allocation72_spill] sm:$0xff] }
 0x4af   :  { %12227 = vmatpush1.bf16.msra.mxu0 %v15420_v10  ;;  %v16996_v10 = vld [vmem:[#allocation70_spill] sm:$0xff] }
 0x4b0   :  { %12229 = vmatprep.subr.bf16.mxu0 %v16987_v49 }
 0x4b2   :  { %4997 = vmatmul.mubr.f32.vlgmr.msra.gmra.mrb[12].mxu0 %v15438_v47 }
 0x4b3   :  { %12231 = vmatpush1.bf16.msra.mxu0 %v16988_v59  ;;  %5099 = vmatprep.mubr.f32.mxu0 %v16983_v12 }
 0x4b4   :  { %12233 = vmatprep.subr.bf16.mxu0 %v16989_v2 }
 0x4b7   :  { %12235 = vmatpush1.bf16.msra.mxu0 %v16990_v63  ;;  %v11736_v34 = vpop.f32.mrb[18].mxu1 }
 0x4b8   :  { %v11737_v51 = vpop.f32.mrb[19].mxu1  ;;  %12237 = vmatprep.subr.bf16.mxu0 %v16991_v5 }
 0x4b9   :  { %v11738_v41 = vadd.f32 %v11737_v51, %v11736_v34  ;;  %v17001_v34 = vld [vmem:[#allocation89_spill] sm:$0xff]  ;;  %v17003_v51 = vand.u32 4294901760, %v14928_v43  ;;  %v17011_v43 = vand.u32 4294901760, %v15438_v47  ;;  %v17018_v47 = vld [vmem:[#allocation98_spill] sm:$0xff] }
 0x4bb   :  { %v5860_v23 = vadd.f32 %v11738_v41, %v5722_v6  ;;  %12239 = vmatpush1.bf16.msra.mxu0 %v16992_v7  ;;  %v17002_v6 = vand.u32 4294901760, %v16948_v55  ;;  %v17012_v55 = vand.u32 4294901760, %v15037_v14  ;;  %v17017_v14 = vand.u32 4294901760, %v15104_v38 }
 0x4bc   :  { %12241 = vmatprep.subr.bf16.mxu0 %v16993_v17 }
 0x4bd   :  { %v15499_v41 = vpack.c.bf16 %v17003_v51, %v17002_v6  ;;  %v15522_v36 = vpack.c.bf16 %v17013_v33, %v17012_v55  ;;  %v15537_v39 = vpack.c.bf16 %v17017_v14, %v17016_v29  ;;  %v17019_v6 = vand.u32 4294901760, %v17018_v47  ;;  %v17020_v51 = vld [vmem:[#allocation96_spill] sm:$0xff]  ;;  %v17026_v29 = vld [vmem:[#allocation107_spill] sm:$0xff] }
 0x4be   :  { %v17021_v46 = vand.u32 4294901760, %v17020_v51  ;;  %v17022_v33 = vand.u32 4294901760, %v15130_v57  ;;  %v17027_v14 = vand.u32 4294901760, %v17026_v29  ;;  %v17030_v57 = vand.u32 4294901760, %v15203_v13  ;;  %v17040_v13 = vld [vmem:[#allocation112_spill] sm:$0xff] }
 0x4bf   :  { %12243 = vmatpush1.bf16.msra.mxu0 %v16994_v53 }
 0x4c0   :  { %12245 = vmatprep.subr.bf16.mxu0 %v16995_v20  ;;  %v15551_v38 = vpack.c.bf16 %v17024_v48, %v17022_v33  ;;  %v15558_v47 = vpack.c.bf16 %v17027_v14, %v17025_v28  ;;  %v17038_v48 = vld [vmem:[#allocation111_spill] sm:$0xff]  ;;  %v17042_v14 = vld [vmem:[#allocation113_spill] sm:$0xff] }
 0x4c1   :  { %v17039_v28 = vand.u32 4294901760, %v17038_v48 }
 0x4c3   :  { %12247 = vmatpush1.bf16.msra.mxu0 %v16996_v10 }
 0x4c4   :  { %12249 = vmatprep.subr.bf16.mxu0 %v16997_v16 }
 0x4c7   :  { %12251 = vmatpush1.bf16.msra.mxu0 %v16998_v60 }
 0x4c8   :  { %12253 = vmatprep.subr.bf16.mxu0 %v16999_v37 }
 0x4cb   :  { %12255 = vmatpush1.bf16.msra.mxu0 %v17000_v0 }
 0x4cc   :  { %12257 = vmatprep.subr.bf16.mxu0 %v17001_v34 }
 0x4cf   :  { %12259 = vmatpush1.bf16.msra.mxu0 %v17004_v50 }
 0x4d0   :  { %12261 = vmatprep.subr.bf16.mxu0 %v15499_v41 }
 0x4d2   :  { %5103 = vmatmul.mubr.f32.vlgmr.msra.gmra.mrb[12].mxu0 %v17011_v43  ;;  %v15544_v43 = vpack.c.bf16 %v17021_v46, %v17019_v6  ;;  %v17031_v6 = vand.u32 4294901760, %v15208_v24  ;;  %v17033_v46 = vand.u32 4294901760, %v17032_v15  ;;  %v17041_v24 = vand.u32 4294901760, %v17040_v13  ;;  %v17046_v15 = vld [vmem:[#allocation115_spill] sm:$0xff] }
 0x4d3   :  { %12263 = vmatpush1.bf16.msra.mxu0 %v15506_v54  ;;  %5269 = vmatprep.mubr.f32.mxu0 %v16983_v12 }
 0x4d4   :  { %12265 = vmatprep.subr.bf16.mxu0 %v15513_v42  ;;  %v15572_v51 = vpack.c.bf16 %v17031_v6, %v17030_v57  ;;  %v17044_v57 = vld [vmem:[#allocation114_spill] sm:$0xff] }
 0x4d5   :  { %v17045_v6 = vand.u32 4294901760, %v17044_v57 }
 0x4d7   :  { %12267 = vmatpush1.bf16.msra.mxu0 %v15522_v36 }
 0x4d8   :  { %12269 = vmatprep.subr.bf16.mxu0 %v15530_v56 }
 0x4db   :  { %12271 = vmatpush1.bf16.msra.mxu0 %v15537_v39 }
 0x4dc   :  { %v11771_v25 = vpop.f32.mrb[20].mxu1  ;;  %12273 = vmatprep.subr.bf16.mxu0 %v15544_v43 }
 0x4dd   :  { %v11772_v8 = vpop.f32.mrb[21].mxu1 }
 0x4de   :  { %v11773_v19 = vadd.f32 %v11772_v8, %v11771_v25  ;;  %v17029_v25 = vand.u32 4294901760, %v15193_v27 }
 0x4df   :  { %12275 = vmatpush1.bf16.msra.mxu0 %v15551_v38 }
 0x4e0   :  { %v5968_v55 = vadd.f32 %v11773_v19, %v5860_v23  ;;  %v17028_v23 = vand.u32 4294901760, %v15188_v44  ;;  %12277 = vmatprep.subr.bf16.mxu0 %v15558_v47  ;;  %v17034_v19 = vld [vmem:[#allocation109_spill] sm:$0xff]  ;;  %v17036_v44 = vld [vmem:[#allocation110_spill] sm:$0xff] }
 0x4e1   :  { %v17035_v33 = vand.u32 4294901760, %v17034_v19  ;;  %v17037_v27 = vand.u32 4294901760, %v17036_v44 }
 0x4e2   :  { %v15565_v8 = vpack.c.bf16 %v17029_v25, %v17028_v23  ;;  %v17043_v23 = vand.u32 4294901760, %v17042_v14 }
 0x4e3   :  { %v15579_v21 = vpack.c.bf16 %v17035_v33, %v17033_v46  ;;  %v15586_v29 = vpack.c.bf16 %v17039_v28, %v17037_v27  ;;  %v17047_v46 = vand.u32 4294901760, %v17046_v15  ;;  %v17048_v33 = vld [vmem:[#allocation116_spill] sm:$0xff]  ;;  %v17050_v27 = vld [vmem:[#allocation117_spill] sm:$0xff] }
 0x4e4   :  { %12279 = vmatpush1.bf16.msra.mxu0 %v15565_v8  ;;  %v15593_v25 = vpack.c.bf16 %v17043_v23, %v17041_v24  ;;  %v17049_v44 = vand.u32 4294901760, %v17048_v33  ;;  %v17051_v48 = vand.u32 4294901760, %v17050_v27 }
 0x4e5   :  { %12281 = vmatprep.subr.bf16.mxu0 %v15572_v51  ;;  %v15600_v19 = vpack.c.bf16 %v17047_v46, %v17045_v6 }
 0x4e6   :  { %v15607_v28 = vpack.c.bf16 %v17051_v48, %v17049_v44 }
 0x4e8   :  { %12283 = vmatpush1.bf16.msra.mxu0 %v15579_v21 }
 0x4e9   :  { %12285 = vmatprep.subr.bf16.mxu0 %v15586_v29 }
 0x4ec   :  { %12287 = vmatpush1.bf16.msra.mxu0 %v15593_v25 }
 0x4ed   :  { %12289 = vmatprep.subr.bf16.mxu0 %v15600_v19 }
 0x4f0   :  { %12291 = vmatpush1.bf16.msra.mxu0 %v15607_v28 }
 0x4f1   :  { %12293 = vmatprep.subr.bf16.mxu0 %v16987_v49 }
 0x4f3   :  { %5271 = vmatmul.mubr.f32.vlgmr.msra.gmra.mrb[12].mxu0 %v15435_v58 }
 0x4f4   :  { %12295 = vmatpush1.bf16.msra.mxu0 %v16988_v59  ;;  %5373 = vmatprep.mubr.f32.mxu0 %v16983_v12 }
 0x4f5   :  { %12297 = vmatprep.subr.bf16.mxu0 %v16989_v2 }
 0x4f8   :  { %12299 = vmatpush1.bf16.msra.mxu0 %v16990_v63 }
 0x4f9   :  { %12301 = vmatprep.subr.bf16.mxu0 %v16991_v5 }
 0x4fc   :  { %12303 = vmatpush1.bf16.msra.mxu0 %v16992_v7 }
 0x4fd   :  { %12305 = vmatprep.subr.bf16.mxu0 %v16993_v17 }
 0x4fe   :  { %v11806_v13 = vpop.f32.mrb[22].mxu1 }
 0x4ff   :  { %v11807_v24 = vpop.f32.mrb[23].mxu1 }
 0x500   :  { %v11808_v14 = vadd.f32 %v11807_v24, %v11806_v13  ;;  %12307 = vmatpush1.bf16.msra.mxu0 %v16994_v53  ;;  %v17052_v13 = vld [vmem:[#allocation94_spill] sm:$0xff]  ;;  %v8074_v24 = vld [vmem:[%s16398_s6] sm:$0xf] }
 0x501   :  { %12309 = vmatprep.subr.bf16.mxu0 %v16995_v20  ;;  %8077 = vperm.xlu1 %12995, %v8074_v24  }
 0x502   :  { %v6136_v23 = vadd.f32 %v11808_v14, %v5968_v55 }
 0x504   :  { %12311 = vmatpush1.bf16.msra.mxu0 %v16996_v10 }
 0x505   :  { %12313 = vmatprep.subr.bf16.mxu0 %v16997_v16 }
 0x508   :  { %12315 = vmatpush1.bf16.msra.mxu0 %v16998_v60 }
 0x509   :  { %12317 = vmatprep.subr.bf16.mxu0 %v16999_v37 }
 0x50c   :  { %12319 = vmatpush1.bf16.msra.mxu0 %v17000_v0 }
 0x50d   :  { %12321 = vmatprep.subr.bf16.mxu0 %v17001_v34 }
 0x510   :  { %12323 = vmatpush1.bf16.msra.mxu0 %v17004_v50 }
 0x511   :  { %12517 = vmatprep.subr.bf16.mxu0 %v16987_v49 }
 0x513   :  { %5375 = vmatmul.mubr.f32.vlgmr.msra.gmra.mrb[12].mxu0 %v15435_v58 }
 0x514   :  { %12519 = vmatpush1.bf16.msra.mxu0 %v16988_v59  ;;  %6340 = vmatprep.mubr.f32.mxu0 %v16983_v12 }
 0x515   :  { %12521 = vmatprep.subr.bf16.mxu0 %v16989_v2 }
 0x518   :  { %12523 = vmatpush1.bf16.msra.mxu0 %v16990_v63 }
 0x519   :  { %12525 = vmatprep.subr.bf16.mxu0 %v16991_v5 }
 0x51c   :  { %12527 = vmatpush1.bf16.msra.mxu0 %v16992_v7 }
 0x51d   :  { %12529 = vmatprep.subr.bf16.mxu0 %v16993_v17 }
 0x51e   :  { %v11841_v55 = vpop.f32.mrb[24].mxu1 }
 0x51f   :  { %v11842_v57 = vpop.f32.mrb[25].mxu1 }
 0x520   :  { %v11843_v6 = vadd.f32 %v11842_v57, %v11841_v55  ;;  %12531 = vmatpush1.bf16.msra.mxu0 %v16994_v53 }
 0x521   :  { %12533 = vmatprep.subr.bf16.mxu0 %v16995_v20 }
 0x522   :  { %v6240_v15 = vadd.f32 %v11843_v6, %v6136_v23  ;;  %v8073_v6 = vld [vmem:[%s16397_s5] sm:$0xf] }
 0x524   :  { %v6243_v46 = vmax.f32 %v6240_v15, 0.0  ;;  %12535 = vmatpush1.bf16.msra.mxu0 %v16996_v10  ;;  %v8081_v15 = vsel %vm2653_vm11, %v8073_v6, 0 }
 0x525   :  { %12537 = vmatprep.subr.bf16.mxu0 %v16997_v16 }
 0x526   :  { %v15639_v58 = vand.u32 4294901760, %v6243_v46 }
 0x528   :  { %v15644_v33 = vsub.f32 %v6243_v46, %v15639_v58  ;;  %12539 = vmatpush1.bf16.msra.mxu0 %v16998_v60 }
 0x529   :  { %12541 = vmatprep.subr.bf16.mxu0 %v16999_v37 }
 0x52a   :  { %v6343_v44 = vand.u32 4294901760, %v15644_v33 }
 0x52c   :  { %12543 = vmatpush1.bf16.msra.mxu0 %v17000_v0  ;;  %v6344_v27 = vsub.f32 %v15644_v33, %v6343_v44 }
 0x52d   :  { %12545 = vmatprep.subr.bf16.mxu0 %v17001_v34 }
 0x52e   :  { %v6345_v48 = vand.u32 4294901760, %v6344_v27  ;;  %v15791_v27 = vand.u32 4294901760, %v8081_v15 }
 0x530   :  { %12547 = vmatpush1.bf16.msra.mxu0 %v17004_v50 }
 0x531   :  { %12549 = vmatprep.subr.bf16.mxu0 %v17052_v13 }
 0x533   :  { %6346 = vmatmul.mubr.f32.vlgmr.msra.gmra.mrb[14].mxu0 %v6345_v48  ;;  %v15794_v48 = vsub.f32 %v8081_v15, %v15791_v27 }
 0x534   :  { %12551 = vmatpush1.bf16.msra.mxu0 %v16984_v18  ;;  %6576 = vmatprep.mubr.f32.mxu0 %v16983_v12 }
 0x535   :  { %12553 = vmatprep.subr.bf16.mxu0 %v16985_v32  ;;  %v15797_v13 = vand.u32 4294901760, %v15794_v48 }
 0x538   :  { %12555 = vmatpush1.bf16.msra.mxu0 %v16986_v35 }
 0x539   :  { %12557 = vmatprep.subr.bf16.mxu0 %v15167_v9  ;;  %v17054_v9 = vld [vmem:[#allocation59_spill] sm:$0xff] }
 0x53c   :  { %12559 = vmatpush1.bf16.msra.mxu0 %v15174_v22  ;;  %v17053_v22 = vld [vmem:[#allocation65_spill] sm:$0xff] }
 0x53d   :  { %12561 = vmatprep.subr.bf16.mxu0 %v15182_v61  ;;  %v17056_v61 = vld [vmem:[#allocation62_spill] sm:$0xff] }
 0x540   :  { %12563 = vmatpush1.bf16.msra.mxu0 %v15221_v11  ;;  %v17057_v11 = vld [vmem:[#allocation63_spill] sm:$0xff] }
 0x541   :  { %12565 = vmatprep.subr.bf16.mxu0 %v15250_v1  ;;  %v17058_v1 = vld [vmem:[#allocation118_spill] sm:$0xff] }
 0x544   :  { %12567 = vmatpush1.bf16.msra.mxu0 %v15257_v30  ;;  %v17055_v30 = vld [vmem:[#allocation61_spill] sm:$0xff] }
 0x545   :  { %12569 = vmatprep.subr.bf16.mxu0 %v15270_v40  ;;  %v17059_v40 = vld [vmem:[#allocation77_spill] sm:$0xff] }
 0x548   :  { %12571 = vmatpush1.bf16.msra.mxu0 %v15311_v26  ;;  %v17061_v26 = vld [vmem:[#allocation100_spill] sm:$0xff] }
 0x549   :  { %12573 = vmatprep.subr.bf16.mxu0 %v15337_v31  ;;  %v17064_v31 = vld [vmem:[#allocation67_spill] sm:$0xff] }
 0x54c   :  { %12575 = vmatpush1.bf16.msra.mxu0 %v15344_v52  ;;  %v17065_v52 = vld [vmem:[#allocation60_spill] sm:$0xff] }
 0x54d   :  { %12577 = vmatprep.subr.bf16.mxu0 %v15354_v4  ;;  %v17066_v4 = vld [vmem:[#allocation69_spill] sm:$0xff] }
 0x550   :  { %12579 = vmatpush1.bf16.msra.mxu0 %v15361_v3  ;;  %v17060_v3 = vld [vmem:[#allocation99_spill] sm:$0xff] }
 0x551   :  { %12581 = vmatprep.subr.bf16.mxu0 %v15335_v45  ;;  %v17063_v45 = vld [vmem:[#allocation78_spill] sm:$0xff] }
 0x553   :  { %6578 = vmatmul.mubr.f32.vlgmr.msra.gmra.mrb[14].mxu0 %v15639_v58 }
 0x554   :  { %12583 = vmatpush1.bf16.msra.mxu0 %v15341_v62  ;;  %6712 = vmatprep.mubr.f32.mxu0 %v16983_v12  ;;  %v17062_v62 = vld [vmem:[#allocation51_spill] sm:$0xff] }
 0x555   :  { %12585 = vmatprep.subr.bf16.mxu0 %v17053_v22 }
 0x558   :  { %12587 = vmatpush1.bf16.msra.mxu0 %v17054_v9 }
 0x559   :  { %12589 = vmatprep.subr.bf16.mxu0 %v17055_v30  ;;  %v17067_v30 = vld [vmem:[#allocation21_spill] sm:$0xff] }
 0x55c   :  { %12591 = vmatpush1.bf16.msra.mxu0 %v17056_v61 }
 0x55d   :  { %12593 = vmatprep.subr.bf16.mxu0 %v17057_v11  ;;  %v8165_v11 = vsub.f32 %v15794_v48, %v15797_v13 }
 0x560   :  { %12595 = vmatpush1.bf16.msra.mxu0 %v17058_v1  ;;  %v17068_v1 = vld [vmem:[#allocation23_spill] sm:$0xff] }
 0x561   :  { %12597 = vmatprep.subr.bf16.mxu0 %v17059_v40 }
 0x564   :  { %12599 = vmatpush1.bf16.msra.mxu0 %v17060_v3 }
 0x565   :  { %12601 = vmatprep.subr.bf16.mxu0 %v17061_v26 }
 0x568   :  { %12603 = vmatpush1.bf16.msra.mxu0 %v17062_v62 }
 0x569   :  { %12605 = vmatprep.subr.bf16.mxu0 %v17063_v45 }
 0x56c   :  { %12607 = vmatpush1.bf16.msra.mxu0 %v17064_v31  ;;  %v8166_v31 = vand.u32 4294901760, %v8165_v11 }
 0x56d   :  { %12609 = vmatprep.subr.bf16.mxu0 %v17065_v52 }
 0x570   :  { %12611 = vmatpush1.bf16.msra.mxu0 %v17066_v4 }
 0x571   :  { %12613 = vmatprep.subr.bf16.mxu0 %v16987_v49 }
 0x573   :  { %6715 = vmatmul.mubr.f32.vlgmr.msra.gmra.mrb[14].mxu0 %v15644_v33 }
 0x574   :  { %12615 = vmatpush1.bf16.msra.mxu0 %v16988_v59  ;;  %6817 = vmatprep.mubr.f32.mxu0 %v16983_v12 }
 0x575   :  { %12617 = vmatprep.subr.bf16.mxu0 %v16989_v2 }
 0x578   :  { %12619 = vmatpush1.bf16.msra.mxu0 %v16990_v63 }
 0x579   :  { %12621 = vmatprep.subr.bf16.mxu0 %v16991_v5 }
 0x57c   :  { %12623 = vmatpush1.bf16.msra.mxu0 %v16992_v7 }
 0x57d   :  { %12625 = vmatprep.subr.bf16.mxu0 %v16993_v17 }
 0x580   :  { %12627 = vmatpush1.bf16.msra.mxu0 %v16994_v53 }
 0x581   :  { %12629 = vmatprep.subr.bf16.mxu0 %v16995_v20 }
 0x584   :  { %12631 = vmatpush1.bf16.msra.mxu0 %v16996_v10 }
 0x585   :  { %12633 = vmatprep.subr.bf16.mxu0 %v16997_v16 }
 0x588   :  { %12635 = vmatpush1.bf16.msra.mxu0 %v16998_v60 }
 0x589   :  { %12637 = vmatprep.subr.bf16.mxu0 %v16999_v37 }
 0x58c   :  { %12639 = vmatpush1.bf16.msra.mxu0 %v17000_v0 }
 0x58d   :  { %12641 = vmatprep.subr.bf16.mxu0 %v17001_v34 }
 0x590   :  { %12643 = vmatpush1.bf16.msra.mxu0 %v17004_v50 }
 0x591   :  { %12645 = vmatprep.subr.bf16.mxu0 %v15499_v41 }
 0x593   :  { %6821 = vmatmul.mubr.f32.vlgmr.msra.gmra.mrb[14].mxu0 %v6343_v44 }
 0x594   :  { %12647 = vmatpush1.bf16.msra.mxu0 %v15506_v54  ;;  %6987 = vmatprep.mubr.f32.mxu0 %v16983_v12 }
 0x595   :  { %12649 = vmatprep.subr.bf16.mxu0 %v15513_v42  ;;  %v7099_v42 = vld [vmem:[%s16396_s4] sm:$0xf] }
 0x598   :  { %12651 = vmatpush1.bf16.msra.mxu0 %v15522_v36 }
 0x599   :  { %12653 = vmatprep.subr.bf16.mxu0 %v15530_v56 }
 0x59c   :  { %12655 = vmatpush1.bf16.msra.mxu0 %v15537_v39 }
 0x59d   :  { %12657 = vmatprep.subr.bf16.mxu0 %v15544_v43 }
 0x5a0   :  { %12659 = vmatpush1.bf16.msra.mxu0 %v15551_v38 }
 0x5a1   :  { %12661 = vmatprep.subr.bf16.mxu0 %v15558_v47 }
 0x5a4   :  { %12663 = vmatpush1.bf16.msra.mxu0 %v15565_v8 }
 0x5a5   :  { %12665 = vmatprep.subr.bf16.mxu0 %v15572_v51 }
 0x5a8   :  { %12667 = vmatpush1.bf16.msra.mxu0 %v15579_v21 }
 0x5a9   :  { %12669 = vmatprep.subr.bf16.mxu0 %v15586_v29 }
 0x5ac   :  { %12671 = vmatpush1.bf16.msra.mxu0 %v15593_v25 }
 0x5ad   :  { %12673 = vmatprep.subr.bf16.mxu0 %v15600_v19 }
 0x5b0   :  { %12675 = vmatpush1.bf16.msra.mxu0 %v15607_v28 }
 0x5b1   :  { %12677 = vmatprep.subr.bf16.mxu0 %v16987_v49 }
 0x5b3   :  { %6989 = vmatmul.mubr.f32.vlgmr.msra.gmra.mrb[14].mxu0 %v15639_v58 }
 0x5b4   :  { %12679 = vmatpush1.bf16.msra.mxu0 %v16988_v59  ;;  %7091 = vmatprep.mubr.f32.mxu0 %v16983_v12 }
 0x5b5   :  { %12681 = vmatprep.subr.bf16.mxu0 %v16989_v2 }
 0x5b8   :  { %12683 = vmatpush1.bf16.msra.mxu0 %v16990_v63 }
 0x5b9   :  { %12685 = vmatprep.subr.bf16.mxu0 %v16991_v5 }
 0x5bc   :  { %12687 = vmatpush1.bf16.msra.mxu0 %v16992_v7 }
 0x5bd   :  { %12689 = vmatprep.subr.bf16.mxu0 %v16993_v17 }
 0x5c0   :  { %12691 = vmatpush1.bf16.msra.mxu0 %v16994_v53 }
 0x5c1   :  { %12693 = vmatprep.subr.bf16.mxu0 %v16995_v20 }
 0x5c4   :  { %12695 = vmatpush1.bf16.msra.mxu0 %v16996_v10 }
 0x5c5   :  { %12697 = vmatprep.subr.bf16.mxu0 %v16997_v16  ;;  %v7101_v16 = vsel %vm2653_vm11, %v7099_v42, 0 }
 0x5c6   :  { %v15748_v54 = vand.u32 4294901760, %v7101_v16 }
 0x5c8   :  { %12699 = vmatpush1.bf16.msra.mxu0 %v16998_v60 }
 0x5c9   :  { %12701 = vmatprep.subr.bf16.mxu0 %v16999_v37  ;;  %v15751_v37 = vsub.f32 %v7101_v16, %v15748_v54 }
 0x5cc   :  { %12703 = vmatpush1.bf16.msra.mxu0 %v17000_v0  ;;  %v15754_v0 = vand.u32 4294901760, %v15751_v37 }
 0x5cd   :  { %12705 = vmatprep.subr.bf16.mxu0 %v17001_v34 }
 0x5d0   :  { %12707 = vmatpush1.bf16.msra.mxu0 %v17004_v50  ;;  %v7185_v50 = vsub.f32 %v15751_v37, %v15754_v0 }
 0x5d2   :  { %v7186_v49 = vand.u32 4294901760, %v7185_v50 }
 0x5d3   :  { %7093 = vmatmul.mubr.f32.vlgmr.msra.gmra.mrb[14].mxu0 %v15639_v58 }
 0x5d4   :  { %10527 = vmatprep.mubr.f32.mxu0 %v16983_v12 }
 0x5e6   :  { %v5376_v60 = vpop.f32.mrb[12].mxu0 }
 0x5e7   :  { %v7104_v10 = vsel %vm1493_vm10, %v5376_v60, 0  ;;  %v5378_v20 = vpop.f32.mrb[13].mxu0 }
 0x5e8   :  { %v7117_v18 = vand.u32 4294901760, %v7104_v10  ;;  %v7107_v32 = vsel %vm1493_vm10, %v5378_v20, 0 }
 0x5e9   :  { %v7115_v35 = vand.u32 4294901760, %v7107_v32 }
 0x5ea   :  { %v7200_v59 = vsub.f32 %v7104_v10, %v7117_v18 }
 0x5eb   :  { %v7194_v2 = vsub.f32 %v7107_v32, %v7115_v35  ;;  %7116 = vmatprep.subr.mxu1 %v7115_v35 }
 0x5ec   :  { %v7201_v63 = vand.u32 4294901760, %v7200_v59  ;;  %7118 = vmatpush1.msra.mxu1 %v7117_v18 }
 0x5ed   :  { %v7195_v5 = vand.u32 4294901760, %v7194_v2  ;;  %7187 = vmatmul.mubr.f32.vlgmr.msra.gmra.mrb[26].mxu1 %v7186_v49 }
 0x5ee   :  { %v7202_v7 = vsub.f32 %v7200_v59, %v7201_v63  ;;  %7267 = vmatprep.mubr.f32.mxu1 %v16983_v12 }
 0x5ef   :  { %v7196_v17 = vsub.f32 %v7194_v2, %v7195_v5 }
 0x5f0   :  { %v7203_v34 = vand.u32 4294901760, %v7202_v7 }
 0x5f1   :  { %v7197_v53 = vand.u32 4294901760, %v7196_v17  ;;  %v17070_v17 = vld [vmem:[#allocation24_spill] sm:$0xff] }
 0x5f3   :  { %7198 = vmatprep.subr.mxu1 %v7197_v53 }
 0x5f4   :  { %7204 = vmatpush1.msra.mxu1 %v7203_v34 }
 0x5f5   :  { %7269 = vmatmul.mubr.f32.vlgmr.msra.gmra.mrb[26].mxu1 %v15748_v54  ;;  %7277 = vmatprep.subr.mxu1 %v7194_v2 }
 0x5f6   :  { %7280 = vmatpush1.msra.mxu1 %v7200_v59  ;;  %7343 = vmatprep.mubr.f32.mxu1 %v16983_v12 }
 0x5f7   :  { %7353 = vmatprep.subr.mxu1 %v7115_v35 }
 0x5fd   :  { %7346 = vmatmul.mubr.f32.vlgmr.msra.gmra.mrb[26].mxu1 %v15751_v37 }
 0x5fe   :  { %7355 = vmatpush1.msra.mxu1 %v7117_v18  ;;  %7418 = vmatprep.mubr.f32.mxu1 %v16983_v12 }
 0x5ff   :  { %7431 = vmatprep.subr.mxu1 %v7195_v5  ;;  %v17069_v5 = vld [vmem:[#allocation22_spill] sm:$0xff] }
 0x605   :  { %7422 = vmatmul.mubr.f32.vlgmr.msra.gmra.mrb[26].mxu1 %v15754_v0 }
 0x606   :  { %7435 = vmatpush1.msra.mxu1 %v7201_v63  ;;  %7498 = vmatprep.mubr.f32.mxu1 %v16983_v12 }
 0x607   :  { %7507 = vmatprep.subr.mxu1 %v7115_v35 }
 0x60d   :  { %7500 = vmatmul.mubr.f32.vlgmr.msra.gmra.mrb[26].mxu1 %v15748_v54 }
 0x60e   :  { %7509 = vmatpush1.msra.mxu1 %v7117_v18  ;;  %7572 = vmatprep.mubr.f32.mxu1 %v16983_v12 }
 0x615   :  { %7574 = vmatmul.mubr.f32.vlgmr.msra.gmra.mrb[26].mxu1 %v15748_v54 }
 0x616   :  { %7646 = vmatprep.mubr.f32.mxu1 %v16983_v12 }
 0x6a6   :  { %v7094_v41 = vpop.f32.mrb[14].mxu0 }
 0x6a7   :  { %v7110_v36 = vsel %vm1493_vm10, %v7094_v41, 0  ;;  %v7096_v56 = vpop.f32.mrb[15].mxu0 }
 0x6a8   :  { %v7582_v39 = vand.u32 4294901760, %v7110_v36  ;;  %v7113_v43 = vsel %vm1493_vm10, %v7096_v56, 0 }
 0x6a9   :  { %v7580_v38 = vand.u32 4294901760, %v7113_v43 }
 0x6aa   :  { %v7665_v47 = vsub.f32 %v7110_v36, %v7582_v39 }
 0x6ab   :  { %v7659_v8 = vsub.f32 %v7113_v43, %v7580_v38  ;;  %7581 = vmatprep.subr.mxu1 %v7580_v38 }
 0x6ac   :  { %v7666_v51 = vand.u32 4294901760, %v7665_v47  ;;  %7583 = vmatpush1.msra.mxu1 %v7582_v39 }
 0x6ad   :  { %v7660_v21 = vand.u32 4294901760, %v7659_v8  ;;  %7652 = vmatmul.mubr.f32.vlgmr.msra.gmra.mrb[28].mxu1 %v7186_v49 }
 0x6ae   :  { %v7667_v29 = vsub.f32 %v7665_v47, %v7666_v51  ;;  %7732 = vmatprep.mubr.f32.mxu1 %v16983_v12 }
 0x6af   :  { %v7661_v25 = vsub.f32 %v7659_v8, %v7660_v21 }
 0x6b0   :  { %v7668_v28 = vand.u32 4294901760, %v7667_v29 }
 0x6b1   :  { %v7662_v19 = vand.u32 4294901760, %v7661_v25  ;;  %v15831_v25 = vpop.permute.xlu1 %8077 }
 0x6b3   :  { %7663 = vmatprep.subr.mxu1 %v7662_v19 }
 0x6b4   :  { %7669 = vmatpush1.msra.mxu1 %v7668_v28 }
 0x6b5   :  { %7734 = vmatmul.mubr.f32.vlgmr.msra.gmra.mrb[28].mxu1 %v15748_v54  ;;  %7742 = vmatprep.subr.mxu1 %v7659_v8 }
 0x6b6   :  { %7745 = vmatpush1.msra.mxu1 %v7665_v47  ;;  %7808 = vmatprep.mubr.f32.mxu1 %v16983_v12 }
 0x6b7   :  { %7818 = vmatprep.subr.mxu1 %v7580_v38 }
 0x6bd   :  { %7811 = vmatmul.mubr.f32.vlgmr.msra.gmra.mrb[28].mxu1 %v15751_v37 }
 0x6be   :  { %7820 = vmatpush1.msra.mxu1 %v7582_v39  ;;  %7883 = vmatprep.mubr.f32.mxu1 %v16983_v12 }
 0x6bf   :  { %7896 = vmatprep.subr.mxu1 %v7660_v21 }
 0x6c5   :  { %7887 = vmatmul.mubr.f32.vlgmr.msra.gmra.mrb[28].mxu1 %v15754_v0 }
 0x6c6   :  { %7900 = vmatpush1.msra.mxu1 %v7666_v51  ;;  %7963 = vmatprep.mubr.f32.mxu1 %v16983_v12 }
 0x6c7   :  { %7972 = vmatprep.subr.mxu1 %v7580_v38 }
 0x6cd   :  { %7965 = vmatmul.mubr.f32.vlgmr.msra.gmra.mrb[28].mxu1 %v15748_v54 }
 0x6ce   :  { %7974 = vmatpush1.msra.mxu1 %v7582_v39  ;;  %8037 = vmatprep.mubr.f32.mxu1 %v16983_v12 }
 0x6d5   :  { %8039 = vmatmul.mubr.f32.vlgmr.msra.gmra.mrb[28].mxu1 %v15748_v54 }
 0x6d6   :  { %8161 = vmatprep.mubr.f32.mxu1 %v16983_v12 }
 0x6e8   :  { %v7575_v14 = vpop.f32.mrb[26].mxu1 }
 0x6e9   :  { %v11416_v23 = vmul.f32 -1.442695, %v7575_v14  ;;  %v7577_v55 = vpop.f32.mrb[27].mxu1 }
 0x6ea   :  { %v11417_v57 = vmul.f32 -1.442695, %v7577_v55 }
 0x6eb   :  { %12996 = vpow2.f32 %v11416_v23 }
 0x6ec   :  { %12998 = vpow2.f32 %v11417_v57 }
 0x6f5   :  { %v12997_v46 = vpop.eup %12996 }
 0x6f6   :  { %v12999_v58 = vpop.eup %12998  ;;  %v8057_v33 = vadd.f32 1.0, %v12997_v46 }
 0x6f7   :  { %v8058_v44 = vadd.f32 1.0, %v12999_v58 }
 0x6f8   :  { %13000 = vrcp.f32 %v8057_v33 }
 0x6f9   :  { %13002 = vrcp.f32 %v8058_v44  ;;  %v17071_v44 = vld [vmem:[#allocation101_spill] sm:$0xff] }
 0x702   :  { %v13001_v22 = vpop.eup %13000 }
 0x703   :  { %v13003_v9 = vpop.eup %13002  ;;  %v8069_v61 = vmul.f32 %v13001_v22, %v17067_v30  ;;  %v17073_v22 = vld [vmem:[#allocation17_spill] sm:$0xff]  ;;  %v17074_v30 = vld [vmem:[#allocation19_spill] sm:$0xff] }
 0x704   :  { %v8070_v40 = vmul.f32 %v13003_v9, %v17068_v1 }
 0x705   :  { %v8084_v3 = vsel %vm1493_vm10, %v8069_v61, 0 }
 0x706   :  { %v8087_v26 = vsel %vm1493_vm10, %v8070_v40, 0  ;;  %v8097_v62 = vand.u32 4294901760, %v8084_v3 }
 0x707   :  { %v8095_v45 = vand.u32 4294901760, %v8087_v26 }
 0x708   :  { %v8180_v52 = vsub.f32 %v8084_v3, %v8097_v62 }
 0x709   :  { %8096 = vmatprep.subr.mxu1 %v8095_v45  ;;  %v8174_v4 = vsub.f32 %v8087_v26, %v8095_v45 }
 0x70a   :  { %8098 = vmatpush1.msra.mxu1 %v8097_v62  ;;  %v8181_v42 = vand.u32 4294901760, %v8180_v52 }
 0x70b   :  { %8167 = vmatmul.mubr.f32.vlgmr.msra.gmra.mrb[30].mxu1 %v8166_v31  ;;  %v8175_v16 = vand.u32 4294901760, %v8174_v4 }
 0x70c   :  { %v8182_v54 = vsub.f32 %v8180_v52, %v8181_v42  ;;  %8247 = vmatprep.mubr.f32.mxu1 %v16983_v12 }
 0x70d   :  { %v8176_v37 = vsub.f32 %v8174_v4, %v8175_v16 }
 0x70e   :  { %v8183_v50 = vand.u32 4294901760, %v8182_v54  ;;  %v17077_v54 = vld [vmem:[#allocation27_spill] sm:$0xff] }
 0x70f   :  { %v8177_v0 = vand.u32 4294901760, %v8176_v37 }
 0x711   :  { %8178 = vmatprep.subr.mxu1 %v8177_v0 }
 0x712   :  { %8184 = vmatpush1.msra.mxu1 %v8183_v50 }
 0x713   :  { %8249 = vmatmul.mubr.f32.vlgmr.msra.gmra.mrb[30].mxu1 %v15791_v27  ;;  %8257 = vmatprep.subr.mxu1 %v8174_v4 }
 0x714   :  { %8260 = vmatpush1.msra.mxu1 %v8180_v52  ;;  %8323 = vmatprep.mubr.f32.mxu1 %v16983_v12 }
 0x715   :  { %8333 = vmatprep.subr.mxu1 %v8095_v45 }
 0x71b   :  { %8326 = vmatmul.mubr.f32.vlgmr.msra.gmra.mrb[30].mxu1 %v15794_v48 }
 0x71c   :  { %8335 = vmatpush1.msra.mxu1 %v8097_v62  ;;  %8398 = vmatprep.mubr.f32.mxu1 %v16983_v12 }
 0x71d   :  { %8411 = vmatprep.subr.mxu1 %v8175_v16 }
 0x723   :  { %8402 = vmatmul.mubr.f32.vlgmr.msra.gmra.mrb[30].mxu1 %v15797_v13 }
 0x724   :  { %8415 = vmatpush1.msra.mxu1 %v8181_v42  ;;  %8478 = vmatprep.mubr.f32.mxu1 %v16983_v12 }
 0x725   :  { %8487 = vmatprep.subr.mxu1 %v8095_v45  ;;  %v17076_v45 = vld [vmem:[#allocation26_spill] sm:$0xff] }
 0x72b   :  { %8480 = vmatmul.mubr.f32.vlgmr.msra.gmra.mrb[30].mxu1 %v15791_v27 }
 0x72c   :  { %8489 = vmatpush1.msra.mxu1 %v8097_v62  ;;  %8552 = vmatprep.mubr.f32.mxu1 %v16983_v12 }
 0x733   :  { %8554 = vmatmul.mubr.f32.vlgmr.msra.gmra.mrb[30].mxu1 %v15791_v27 }
 0x734   :  { %8626 = vmatprep.mubr.f32.mxu1 %v16983_v12 }
 0x7a8   :  { %v8040_v60 = vpop.f32.mrb[28].mxu1 }
 0x7a9   :  { %v11418_v10 = vmul.f32 -1.442695, %v8040_v60  ;;  %v8042_v20 = vpop.f32.mrb[29].mxu1 }
 0x7aa   :  { %v11419_v18 = vmul.f32 -1.442695, %v8042_v20  ;;  %v17078_v20 = vld [vmem:[#allocation31_spill] sm:$0xff] }
 0x7ab   :  { %13004 = vpow2.f32 %v11418_v10 }
 0x7ac   :  { %13006 = vpow2.f32 %v11419_v18 }
 0x7b5   :  { %v13005_v32 = vpop.eup %13004 }
 0x7b6   :  { %v13007_v35 = vpop.eup %13006  ;;  %v8059_v49 = vadd.f32 1.0, %v13005_v32 }
 0x7b7   :  { %v8060_v59 = vadd.f32 1.0, %v13007_v35 }
 0x7b8   :  { %13008 = vrcp.f32 %v8059_v49 }
 0x7b9   :  { %13010 = vrcp.f32 %v8060_v59  ;;  %v17079_v59 = vld [vmem:[#allocation34_spill] sm:$0xff] }
 0x7c2   :  { %v13009_v2 = vpop.eup %13008 }
 0x7c3   :  { %v13011_v63 = vpop.eup %13010  ;;  %v8071_v7 = vmul.f32 %v13009_v2, %v17069_v5 }
 0x7c4   :  { %v8072_v53 = vmul.f32 %v13011_v63, %v17070_v17 }
 0x7c5   :  { %v8090_v34 = vsel %vm1493_vm10, %v8071_v7, 0  ;;  %v17080_v7 = vld [vmem:[#allocation32_spill] sm:$0xff] }
 0x7c6   :  { %v8093_v41 = vsel %vm1493_vm10, %v8072_v53, 0  ;;  %v8562_v36 = vand.u32 4294901760, %v8090_v34 }
 0x7c7   :  { %v8560_v56 = vand.u32 4294901760, %v8093_v41 }
 0x7c8   :  { %v8645_v39 = vsub.f32 %v8090_v34, %v8562_v36 }
 0x7c9   :  { %8561 = vmatprep.subr.mxu1 %v8560_v56  ;;  %v8639_v43 = vsub.f32 %v8093_v41, %v8560_v56 }
 0x7ca   :  { %8563 = vmatpush1.msra.mxu1 %v8562_v36  ;;  %v8646_v38 = vand.u32 4294901760, %v8645_v39 }
 0x7cb   :  { %8632 = vmatmul.mubr.f32.vlgmr.msra.gmra.mrb[32].mxu1 %v8166_v31  ;;  %v8640_v47 = vand.u32 4294901760, %v8639_v43 }
 0x7cc   :  { %v8647_v8 = vsub.f32 %v8645_v39, %v8646_v38  ;;  %8712 = vmatprep.mubr.f32.mxu1 %v16983_v12 }
 0x7cd   :  { %v8641_v51 = vsub.f32 %v8639_v43, %v8640_v47 }
 0x7ce   :  { %v8648_v29 = vand.u32 4294901760, %v8647_v8 }
 0x7cf   :  { %v8642_v21 = vand.u32 4294901760, %v8641_v51 }
 0x7d1   :  { %8643 = vmatprep.subr.mxu1 %v8642_v21 }
 0x7d2   :  { %8649 = vmatpush1.msra.mxu1 %v8648_v29 }
 0x7d3   :  { %8714 = vmatmul.mubr.f32.vlgmr.msra.gmra.mrb[32].mxu1 %v15791_v27  ;;  %8722 = vmatprep.subr.mxu1 %v8639_v43 }
 0x7d4   :  { %8725 = vmatpush1.msra.mxu1 %v8645_v39  ;;  %8788 = vmatprep.mubr.f32.mxu1 %v16983_v12  ;;  %v17081_v39 = vld [vmem:[#allocation35_spill] sm:$0xff] }
 0x7d5   :  { %8798 = vmatprep.subr.mxu1 %v8560_v56 }
 0x7db   :  { %8791 = vmatmul.mubr.f32.vlgmr.msra.gmra.mrb[32].mxu1 %v15794_v48  ;;  %v17072_v48 = vld [vmem:[#allocation102_spill] sm:$0xff] }
 0x7dc   :  { %8800 = vmatpush1.msra.mxu1 %v8562_v36  ;;  %8863 = vmatprep.mubr.f32.mxu1 %v16983_v12 }
 0x7dd   :  { %8876 = vmatprep.subr.mxu1 %v8640_v47 }
 0x7e3   :  { %8867 = vmatmul.mubr.f32.vlgmr.msra.gmra.mrb[32].mxu1 %v15797_v13 }
 0x7e4   :  { %8880 = vmatpush1.msra.mxu1 %v8646_v38  ;;  %8943 = vmatprep.mubr.f32.mxu1 %v16983_v12 }
 0x7e5   :  { %8952 = vmatprep.subr.mxu1 %v8560_v56 }
 0x7eb   :  { %8945 = vmatmul.mubr.f32.vlgmr.msra.gmra.mrb[32].mxu1 %v15791_v27 }
 0x7ec   :  { %8954 = vmatpush1.msra.mxu1 %v8562_v36  ;;  %9017 = vmatprep.mubr.f32.mxu1 %v16983_v12 }
 0x7f3   :  { %9019 = vmatmul.mubr.f32.vlgmr.msra.gmra.mrb[32].mxu1 %v15791_v27 }
 0x7f4   :  { %9379 = vmatprep.mubr.f32.mxu1 %v16983_v12 }
 0x806   :  { %v8555_v19 = vpop.f32.mrb[30].mxu1 }
 0x807   :  { %v12810_v28 = vadd.f32 %v8555_v19, %v15831_v25  ;;  %v8557_v24 = vpop.f32.mrb[31].mxu1 }
 0x808   :  { %v12811_v14 = vadd.f32 %v8557_v24, %v15831_v25 }
 0x809   :  { %v11420_v23 = vmul.f32 -1.442695, %v12810_v28 }
 0x80a   :  { %v11421_v55 = vmul.f32 -1.442695, %v12811_v14 }
 0x80b   :  { %13012 = vpow2.f32 %v11420_v23 }
 0x80c   :  { %13014 = vpow2.f32 %v11421_v55 }
 0x815   :  { %v13013_v57 = vpop.eup %13012 }
 0x816   :  { %v13015_v6 = vpop.eup %13014  ;;  %v9037_v15 = vadd.f32 1.0, %v13013_v57 }
 0x817   :  { %v9038_v46 = vadd.f32 1.0, %v13015_v6 }
 0x818   :  { %13016 = vrcp.f32 %v9037_v15 }
 0x819   :  { %13018 = vrcp.f32 %v9038_v46 }
 0x822   :  { %v13017_v58 = vpop.eup %13016 }
 0x823   :  { %v13019_v33 = vpop.eup %13018  ;;  %v15836_v27 = vmul.f32 %v13017_v58, %v17071_v44 }
 0x824   :  { %v15839_v13 = vmul.f32 %v13019_v33, %v17072_v48 }
 0x825   :  { %9217 = vrot.lane.b32.xlu1 %v15836_v27, %s13164_s8  ;;  %9073 = vrot.lane.b32.xlu0 %v15836_v27, %s13157_s22  ;;  %v9157_v9 = vmul.f32 %v15836_v27, %v17073_v22 }
 0x826   :  { %v9158_v61 = vmul.f32 %v15839_v13, %v17074_v30 }
 0x827   :  { %9161 = vst [vmem:[#allocation2 + $0x40] sm:$0xf] %v9157_v9 }
 0x828   :  { %9162 = vst [vmem:[#allocation2 + $0x48] sm:$0xf] %v9158_v61 }
 0x829   :  { %9125 = vrot.lane.b32.xlu0 %v15836_v27, %s13160_s17  ;;  %9075 = vrot.lane.b32.xlu1 %v15839_v13, %s13157_s22 }
 0x82d   :  { %9053 = vrot.lane.b32.xlu0 %v15836_v27, %s13161_s18  ;;  %9127 = vrot.lane.b32.xlu1 %v15839_v13, %s13160_s17 }
 0x831   :  { %9105 = vrot.lane.b32.xlu0 %v15836_v27, %s13163_s20  ;;  %9055 = vrot.lane.b32.xlu1 %v15839_v13, %s13161_s18 }
 0x835   :  { %9165 = vrot.lane.b32.xlu0 %v15836_v27, %s13162_s19  ;;  %9107 = vrot.lane.b32.xlu1 %v15839_v13, %s13163_s20 }
 0x839   :  { %9167 = vrot.lane.b32.xlu0 %v15839_v13, %s13162_s19 }
 0x83d   :  { %9219 = vrot.lane.b32.xlu0 %v15839_v13, %s13164_s8 }
 0x841   :  { %9199 = vrot.lane.b32.xlu0 %v15839_v13, %s13165_s30 }
 0x897   :  { %v15871_v11 = vpop.permute.xlu1 %9217  ;;  %v15873_v1 = vpop.permute.xlu0 %9073 }
 0x89b   :  { %v15875_v40 = vpop.permute.xlu0 %9125  ;;  %v15877_v3 = vpop.permute.xlu1 %9075 }
 0x89c   :  { %v9083_v62 = vsel %vm1105_vm1, %v15873_v1, %v15877_v3 }
 0x89d   :  { %v9086_v31 = vmul.f32 %v9083_v62, %v17076_v45 }
 0x89f   :  { %v9094_v52 = vrot.slane %v9086_v31, 4  ;;  %v15884_v4 = vpop.permute.xlu0 %9053  ;;  %v15886_v42 = vpop.permute.xlu1 %9127 }
 0x8a0   :  { %v9135_v16 = vsel %vm1201_vm2, %v15875_v40, %v15886_v42 }
 0x8a1   :  { %9102 = vst [vmem:[#allocation2 + $0x8] sm:$0xf0] %v9094_v52  ;;  %v9138_v37 = vmul.f32 %v9135_v16, %v17077_v54  ;;  %v17082_v52 = vld [vmem:[#allocation103_spill] sm:$0xff]  ;;  %v17083_v54 = vld [vmem:[#allocation104_spill] sm:$0xff] }
 0x8a3   :  { %v9146_v0 = vrot.slane %v9138_v37, 4  ;;  %v15893_v50 = vpop.permute.xlu0 %9105  ;;  %v15895_v60 = vpop.permute.xlu1 %9055 }
 0x8a4   :  { %v9063_v10 = vsel %vm1063_vm3, %v15884_v4, %v15895_v60 }
 0x8a5   :  { %9154 = vst [vmem:[#allocation2 + $0x28] sm:$0xf0] %v9146_v0  ;;  %v9066_v18 = vmul.f32 %v9063_v10, %v17078_v20  ;;  %v17084_v0 = vld [vmem:[#allocation18_spill] sm:$0xff]  ;;  %v17085_v10 = vld [vmem:[#allocation20_spill] sm:$0xff] }
 0x8a7   :  { %9070 = vst [vmem:[#allocation2 + $0x8] sm:$0xf] %v9066_v18  ;;  %v15902_v32 = vpop.permute.xlu0 %9165  ;;  %v15904_v35 = vpop.permute.xlu1 %9107  ;;  %v10452_v18 = vld [vmem:[%s16402_s10] sm:$0xff] }
 0x8a8   :  { %v9115_v49 = vsel %vm1159_vm6, %v15893_v50, %v15904_v35 }
 0x8a9   :  { %v9118_v2 = vmul.f32 %v9115_v49, %v17079_v59 }
 0x8ab   :  { %9122 = vst [vmem:[#allocation2 + $0x28] sm:$0xf] %v9118_v2  ;;  %v15911_v63 = vpop.permute.xlu0 %9167  ;;  %v17086_v2 = vld [vmem:[#allocation33_spill] sm:$0xff] }
 0x8ac   :  { %v9175_v5 = vsel %vm1284_vm4, %v15902_v32, %v15911_v63 }
 0x8ad   :  { %v9177_v17 = vmul.f32 %v9175_v5, %v17080_v7 }
 0x8ae   :  { %v9271_v53 = vld [vmem:[#allocation2 + $0x8] sm:$0xff] }
 0x8af   :  { %v9185_v34 = vrot.slane %v9177_v17, 4  ;;  %v15918_v41 = vpop.permute.xlu0 %9219  ;;  %v9305_v36 = vand.u32 4294901760, %v9271_v53  ;;  %v17087_v17 = vld [vmem:[#allocation28_spill] sm:$0xff] }
 0x8b0   :  { %v9227_v56 = vsel %vm1380_vm7, %v15871_v11, %v15918_v41 }
 0x8b1   :  { %9193 = vst [vmem:[#allocation2 + $0x40] sm:$0xf0] %v9185_v34  ;;  %v9229_v43 = vmul.f32 %v9227_v56, %v17081_v39  ;;  %v15925_v38 = vsub.f32 %v9271_v53, %v9305_v36 }
 0x8b2   :  { %v9275_v47 = vld [vmem:[#allocation2 + $0x28] sm:$0xff] }
 0x8b3   :  { %v9237_v8 = vrot.slane %v9229_v43, 4  ;;  %v9309_v51 = vand.u32 4294901760, %v9275_v47  ;;  %v9393_v21 = vand.u32 4294901760, %v15925_v38 }
 0x8b5   :  { %9245 = vst [vmem:[#allocation2 + $0x60] sm:$0xf0] %v9237_v8  ;;  %v15928_v29 = vpack.c.bf16 %v9309_v51, %v9305_v36  ;;  %v15930_v19 = vsub.f32 %v9275_v47, %v9309_v51  ;;  %v9394_v28 = vsub.f32 %v15925_v38, %v9393_v21  ;;  %v17089_v51 = vld [vmem:[#allocation30_spill] sm:$0xff] }
 0x8b7   :  { %12709 = vmatprep.subr.bf16.mxu1 %v15928_v29  ;;  %v9405_v24 = vand.u32 4294901760, %v15930_v19  ;;  %v12724_v14 = vpack.c.bf16 %v15930_v19, %v15925_v38  ;;  %v9395_v57 = vand.u32 4294901760, %v9394_v28 }
 0x8b9   :  { %v9406_v23 = vsub.f32 %v15930_v19, %v9405_v24  ;;  %v15938_v55 = vpack.c.bf16 %v9405_v24, %v9393_v21 }
 0x8bb   :  { %v9407_v6 = vand.u32 4294901760, %v9406_v23 }
 0x8bd   :  { %v15940_v15 = vpack.c.bf16 %v9407_v6, %v9395_v57  ;;  %v17090_v6 = vld [vmem:[#allocation29_spill] sm:$0xff] }
 0x8c6   :  { %v9020_v46 = vpop.f32.mrb[32].mxu1 }
 0x8c7   :  { %v12812_v58 = vadd.f32 %v9020_v46, %v15831_v25  ;;  %v9022_v33 = vpop.f32.mrb[33].mxu1 }
 0x8c8   :  { %v12813_v44 = vadd.f32 %v9022_v33, %v15831_v25 }
 0x8c9   :  { %v11422_v48 = vmul.f32 -1.442695, %v12812_v58  ;;  %v17091_v58 = vld [vmem:[#allocation39_spill] sm:$0xff] }
 0x8ca   :  { %v11423_v22 = vmul.f32 -1.442695, %v12813_v44 }
 0x8cb   :  { %13020 = vpow2.f32 %v11422_v48 }
 0x8cc   :  { %13022 = vpow2.f32 %v11423_v22 }
 0x8d5   :  { %v13021_v9 = vpop.eup %13020 }
 0x8d6   :  { %v13023_v30 = vpop.eup %13022  ;;  %v9039_v61 = vadd.f32 1.0, %v13021_v9 }
 0x8d7   :  { %v9040_v62 = vadd.f32 1.0, %v13023_v30  ;;  %v9278_v30 = vld [vmem:[#allocation2 + $0x40] sm:$0xff] }
 0x8d8   :  { %13024 = vrcp.f32 %v9039_v61  ;;  %v17092_v61 = vld [vmem:[#allocation37_spill] sm:$0xff] }
 0x8d9   :  { %13026 = vrcp.f32 %v9040_v62 }
 0x8e2   :  { %v13025_v45 = vpop.eup %13024 }
 0x8e3   :  { %v13027_v31 = vpop.eup %13026  ;;  %v9051_v16 = vmul.f32 %v13025_v45, %v17082_v52 }
 0x8e4   :  { %v9052_v37 = vmul.f32 %v13027_v31, %v17083_v54 }
 0x8e5   :  { %9169 = vrot.lane.b32.xlu1 %v9051_v16, %s13162_s19  ;;  %v9159_v25 = vmul.f32 %v9051_v16, %v17084_v0 }
 0x8e6   :  { %9079 = vrot.lane.b32.xlu0 %v9052_v37, %s13157_s22  ;;  %v9160_v20 = vmul.f32 %v9052_v37, %v17085_v10 }
 0x8e7   :  { %9163 = vst [vmem:[#allocation2 + $0x50] sm:$0xf] %v9159_v25  ;;  %v17093_v25 = vld [vmem:[#allocation38_spill] sm:$0xff] }
 0x8e8   :  { %9164 = vst [vmem:[#allocation2 + $0x58] sm:$0xf] %v9160_v20 }
 0x8e9   :  { %9221 = vrot.lane.b32.xlu1 %v9051_v16, %s13164_s8 }
 0x8ea   :  { %9059 = vrot.lane.b32.xlu0 %v9052_v37, %s13161_s18 }
 0x8ed   :  { %9131 = vrot.lane.b32.xlu1 %v9052_v37, %s13160_s17 }
 0x8ee   :  { %9197 = vrot.lane.b32.xlu0 %v15836_v27, %s13165_s30 }
 0x8f1   :  { %9111 = vrot.lane.b32.xlu1 %v9052_v37, %s13163_s20 }
 0x8f2   :  { %9253 = vrot.lane.b32.xlu0 %v9051_v16, %s13166_s21 }
 0x8f5   :  { %9201 = vrot.lane.b32.xlu1 %v9051_v16, %s13165_s30 }
 0x8f6   :  { %9077 = vrot.lane.b32.xlu0 %v9051_v16, %s13157_s22 }
 0x8f9   :  { %9251 = vrot.lane.b32.xlu1 %v15839_v13, %s13166_s21  ;;  %v9200_v13 = vpop.permute.xlu0 %9199 }
 0x8fa   :  { %9057 = vrot.lane.b32.xlu0 %v9051_v16, %s13161_s18 }
 0x8fd   :  { %9249 = vrot.lane.b32.xlu1 %v15836_v27, %s13166_s21 }
 0x8fe   :  { %9171 = vrot.lane.b32.xlu0 %v9052_v37, %s13162_s19 }
 0x901   :  { %9129 = vrot.lane.b32.xlu1 %v9051_v16, %s13160_s17 }
 0x902   :  { %9203 = vrot.lane.b32.xlu0 %v9052_v37, %s13165_s30 }
 0x905   :  { %9109 = vrot.lane.b32.xlu1 %v9051_v16, %s13163_s20  ;;  %v9315_v16 = vand.u32 4294901760, %v9278_v30 }
 0x906   :  { %10455 = vperm.xlu0 %12994, %v10452_v18  }
 0x909   :  { %9223 = vrot.lane.b32.xlu1 %v9052_v37, %s13164_s8 }
 0x90d   :  { %9255 = vrot.lane.b32.xlu1 %v9052_v37, %s13166_s21 }
 0x957   :  { %v15973_v49 = vpop.permute.xlu1 %9169 }
 0x958   :  { %v9174_v27 = vsel %vm1284_vm4, %v15911_v63, %v15973_v49  ;;  %v9080_v59 = vpop.permute.xlu0 %9079  ;;  %v17088_v63 = vld [vmem:[#allocation36_spill] sm:$0xff] }
 0x959   :  { %v9178_v5 = vmul.f32 %v9174_v27, %v17086_v2  ;;  %v9084_v7 = vsel %vm1105_vm1, %v9080_v59, %v15873_v1  ;;  %v9269_v1 = vld [vmem:[#allocation7] sm:$0xf]  ;;  %v17094_v27 = vld [vmem:[#allocation42_spill] sm:$0xff] }
 0x95a   :  { %v9085_v53 = vmul.f32 %v9084_v7, %v17087_v17  ;;  %v9291_v57 = vsel %vm1489_vm5, %v9269_v1, 0  ;;  %v17096_v1 = vld [vmem:[#allocation40_spill] sm:$0xff] }
 0x95b   :  { %v9186_v34 = vrot.slane %v9178_v5, 4  ;;  %v15984_v36 = vpop.permute.xlu1 %9221  ;;  %v16011_v22 = vand.u32 4294901760, %v9291_v57  ;;  %v17095_v5 = vld [vmem:[#allocation43_spill] sm:$0xff] }
 0x95c   :  { %v9093_v56 = vrot.slane %v9085_v53, 4  ;;  %v9226_v39 = vsel %vm1380_vm7, %v15918_v41, %v15984_v36  ;;  %v9060_v43 = vpop.permute.xlu0 %9059 }
 0x95d   :  { %9194 = vst [vmem:[#allocation2 + $0x48] sm:$0xf0] %v9186_v34  ;;  %v9230_v47 = vmul.f32 %v9226_v39, %v17088_v63  ;;  %v9064_v8 = vsel %vm1063_vm3, %v9060_v43, %v15884_v4  ;;  %v16025_v54 = vsub.f32 %v9291_v57, %v16011_v22 }
 0x95e   :  { %9101 = vst [vmem:[#allocation2] sm:$0xf0] %v9093_v56  ;;  %v9065_v21 = vmul.f32 %v9064_v8, %v17089_v51  ;;  %v16041_v56 = vsub.f32 %v9278_v30, %v9315_v16 }
 0x95f   :  { %v9238_v28 = vrot.slane %v9230_v47, 4  ;;  %v15995_v24 = vpop.permute.xlu1 %9131  ;;  %v16044_v39 = vand.u32 4294901760, %v16025_v54 }
 0x960   :  { %9069 = vst [vmem:[#allocation2] sm:$0xf] %v9065_v21  ;;  %v9136_v41 = vsel %vm1201_vm2, %v15995_v24, %v15875_v40  ;;  %v16001_v23 = vpop.permute.xlu0 %9197 }
 0x961   :  { %9246 = vst [vmem:[#allocation2 + $0x68] sm:$0xf0] %v9238_v28  ;;  %v9137_v4 = vmul.f32 %v9136_v41, %v17090_v6  ;;  %v9207_v46 = vsel %vm1338_vm8, %v16001_v23, %v9200_v13  ;;  %v17097_v41 = vld [vmem:[#allocation46_spill] sm:$0xff]  ;;  %v17098_v6 = vld [vmem:[#allocation47_spill] sm:$0xff] }
 0x962   :  { %v9209_v33 = vmul.f32 %v9207_v46, %v17091_v58 }
 0x963   :  { %v9145_v44 = vrot.slane %v9137_v4, 4  ;;  %v16009_v48 = vpop.permute.xlu1 %9111 }
 0x964   :  { %9213 = vst [vmem:[#allocation2 + $0x60] sm:$0xf] %v9209_v33  ;;  %v9116_v40 = vsel %vm1159_vm6, %v16009_v48, %v15893_v50  ;;  %v16017_v9 = vpop.permute.xlu0 %9253  ;;  %v16022_v52 = vld [vmem:[#allocation2 + $0x48] sm:$0xff] }
 0x965   :  { %9153 = vst [vmem:[#allocation2 + $0x20] sm:$0xf0] %v9145_v44  ;;  %v9117_v62 = vmul.f32 %v9116_v40, %v17092_v61  ;;  %v9313_v17 = vand.u32 4294901760, %v16022_v52  ;;  %v9383_v61 = vsub.f32 %v16025_v54, %v16044_v39 }
 0x967   :  { %9121 = vst [vmem:[#allocation2 + $0x20] sm:$0xf] %v9117_v62  ;;  %v16020_v45 = vpop.permute.xlu1 %9201  ;;  %v9270_v31 = vld [vmem:[#allocation2] sm:$0xff]  ;;  %v16058_v58 = vsub.f32 %v16022_v52, %v9313_v17  ;;  %v9423_v62 = vand.u32 4294901760, %v16041_v56 }
 0x968   :  { %v9206_v50 = vsel %vm1338_vm8, %v9200_v13, %v16020_v45  ;;  %v9078_v37 = vpop.permute.xlu0 %9077  ;;  %v9307_v0 = vand.u32 4294901760, %v9270_v31 }
 0x969   :  { %v9210_v10 = vmul.f32 %v9206_v50, %v17093_v25  ;;  %v9081_v20 = vsel %vm1105_vm1, %v9078_v37, %v9080_v59  ;;  %v9082_v18 = vsel %vm1105_vm1, %v15877_v3, %v9078_v37 }
 0x96a   :  { %v9087_v2 = vmul.f32 %v9082_v18, %v17094_v27  ;;  %v9088_v7 = vmul.f32 %v9081_v20, %v17095_v5  ;;  %v16039_v13 = vsub.f32 %v9270_v31, %v9307_v0  ;;  %v17099_v31 = vld [vmem:[#allocation41_spill] sm:$0xff]  ;;  %v17101_v18 = vld [vmem:[#allocation52_spill] sm:$0xff] }
 0x96b   :  { %9214 = vst [vmem:[#allocation2 + $0x68] sm:$0xf] %v9210_v10  ;;  %v9252_v53 = vpop.permute.xlu1 %9251  ;;  %v9282_v34 = vld [vmem:[#allocation2 + $0x60] sm:$0xff]  ;;  %v17100_v10 = vld [vmem:[#allocation50_spill] sm:$0xff] }
 0x96c   :  { %v9095_v59 = vrot.slane %v9087_v2, 4  ;;  %v9096_v63 = vrot.slane %v9088_v7, 4  ;;  %v9258_v3 = vsel %vm1434_vm9, %v9252_v53, %v16017_v9  ;;  %v9058_v47 = vpop.permute.xlu0 %9057  ;;  %v9319_v8 = vand.u32 4294901760, %v9282_v34 }
 0x96d   :  { %v9262_v51 = vmul.f32 %v9258_v3, %v17096_v1  ;;  %v9061_v21 = vsel %vm1063_vm3, %v9058_v47, %v9060_v43  ;;  %v9062_v28 = vsel %vm1063_vm3, %v15895_v60, %v9058_v47  ;;  %v9399_v43 = vand.u32 4294901760, %v16039_v13 }
 0x96e   :  { %9103 = vst [vmem:[#allocation2 + $0x10] sm:$0xf0] %v9095_v59  ;;  %9104 = vst [vmem:[#allocation2 + $0x18] sm:$0xf0] %v9096_v63  ;;  %v9067_v57 = vmul.f32 %v9062_v28, %v17097_v41  ;;  %v9068_v4 = vmul.f32 %v9061_v21, %v17098_v6  ;;  %v9274_v46 = vld [vmem:[#allocation2 + $0x20] sm:$0xff]  ;;  %v16062_v40 = vsub.f32 %v9282_v34, %v9319_v8  ;;  %v9417_v7 = vand.u32 4294901760, %v16058_v58 }
 0x96f   :  { %9266 = vst [vmem:[#allocation2 + $0x88] sm:$0xf] %v9262_v51  ;;  %v16060_v33 = vpop.permute.xlu1 %9249  ;;  %v9311_v44 = vand.u32 4294901760, %v9274_v46  ;;  %v16082_v5 = vpack.c.bf16 %v9319_v8, %v9315_v16  ;;  %v17102_v8 = vld [vmem:[#allocation44_spill] sm:$0xff]  ;;  %v17103_v51 = vld [vmem:[#allocation45_spill] sm:$0xff] }
 0x970   :  { %9071 = vst [vmem:[#allocation2 + $0x10] sm:$0xf] %v9067_v57  ;;  %9072 = vst [vmem:[#allocation2 + $0x18] sm:$0xf] %v9068_v4  ;;  %v9259_v60 = vsel %vm1434_vm9, %v16060_v33, %v9252_v53  ;;  %v9172_v30 = vpop.permute.xlu0 %9171  ;;  %v17105_v6 = vld [vmem:[#allocation56_spill] sm:$0xff] }
 0x971   :  { %v9261_v52 = vmul.f32 %v9259_v60, %v17099_v31  ;;  %v9173_v50 = vsel %vm1284_vm4, %v15973_v49, %v9172_v30  ;;  %v9176_v37 = vsel %vm1284_vm4, %v9172_v30, %v15902_v32  ;;  %v16078_v25 = vpack.c.bf16 %v9311_v44, %v9307_v0 }
 0x972   :  { %v9179_v20 = vmul.f32 %v9173_v50, %v17100_v10  ;;  %v9180_v27 = vmul.f32 %v9176_v37, %v17101_v18  ;;  %v9283_v2 = vld [vmem:[#allocation2 + $0x68] sm:$0xff]  ;;  %v16086_v53 = vsub.f32 %v9274_v46, %v9311_v44  ;;  %v9400_v32 = vsub.f32 %v16039_v13, %v9399_v43  ;;  %v17106_v10 = vld [vmem:[#allocation48_spill] sm:$0xff] }
 0x973   :  { %9265 = vst [vmem:[#allocation2 + $0x80] sm:$0xf] %v9261_v52  ;;  %12711 = vmatpush1.bf16.msra.mxu1 %v16078_v25  ;;  %v9130_v49 = vpop.permute.xlu1 %9129  ;;  %v9317_v34 = vand.u32 4294901760, %v9283_v2  ;;  %v9435_v0 = vand.u32 4294901760, %v16062_v40  ;;  %v17107_v18 = vld [vmem:[#allocation49_spill] sm:$0xff] }
 0x974   :  { %v9187_v59 = vrot.slane %v9179_v20, 4  ;;  %v9188_v63 = vrot.slane %v9180_v27, 4  ;;  %v9133_v16 = vsel %vm1201_vm2, %v9130_v49, %v15995_v24  ;;  %v9134_v3 = vsel %vm1201_vm2, %v15886_v42, %v9130_v49  ;;  %v9204_v47 = vpop.permute.xlu0 %9203  ;;  %v17104_v24 = vld [vmem:[#allocation55_spill] sm:$0xff] }
 0x975   :  { %v9139_v1 = vmul.f32 %v9134_v3, %v17102_v8  ;;  %v9140_v21 = vmul.f32 %v9133_v16, %v17103_v51  ;;  %v9205_v28 = vsel %vm1338_vm8, %v16020_v45, %v9204_v47  ;;  %v9208_v41 = vsel %vm1338_vm8, %v9204_v47, %v16001_v23 }
 0x976   :  { %9195 = vst [vmem:[#allocation2 + $0x50] sm:$0xf0] %v9187_v59  ;;  %9196 = vst [vmem:[#allocation2 + $0x58] sm:$0xf0] %v9188_v63  ;;  %v9211_v57 = vmul.f32 %v9205_v28, %v17104_v24  ;;  %v9212_v4 = vmul.f32 %v9208_v41, %v17105_v6  ;;  %v16108_v42 = vpack.c.bf16 %v9317_v34, %v9313_v17  ;;  %v9287_v44 = vld [vmem:[#allocation2 + $0x88] sm:$0xf] }
 0x977   :  { %v16110_v46 = vsub.f32 %v9283_v2, %v9317_v34  ;;  %v9147_v60 = vrot.slane %v9139_v1, 4  ;;  %v9148_v30 = vrot.slane %v9140_v21, 4  ;;  %v9110_v31 = vpop.permute.xlu1 %9109  ;;  %v9297_v45 = vsel %vm1493_vm10, %v9287_v44, 0  ;;  %v17108_v24 = vld [vmem:[#allocation53_spill] sm:$0xff]  ;;  %v17109_v6 = vld [vmem:[#allocation54_spill] sm:$0xff] }
 0x978   :  { %v9411_v52 = vand.u32 4294901760, %v16086_v53  ;;  %9215 = vst [vmem:[#allocation2 + $0x70] sm:$0xf] %v9211_v57  ;;  %9216 = vst [vmem:[#allocation2 + $0x78] sm:$0xf] %v9212_v4  ;;  %v9113_v23 = vsel %vm1159_vm6, %v9110_v31, %v16009_v48  ;;  %v9114_v17 = vsel %vm1159_vm6, %v15904_v35, %v9110_v31  ;;  %12713 = vmatprep.subr.bf16.mxu1 %v16108_v42  ;;  %v16121_v50 = vand.u32 4294901760, %v9297_v45 }
 0x979   :  { %v9429_v37 = vand.u32 4294901760, %v16110_v46  ;;  %9155 = vst [vmem:[#allocation2 + $0x30] sm:$0xf0] %v9147_v60  ;;  %9156 = vst [vmem:[#allocation2 + $0x38] sm:$0xf0] %v9148_v30  ;;  %v9119_v20 = vmul.f32 %v9114_v17, %v17106_v10  ;;  %v9120_v27 = vmul.f32 %v9113_v23, %v17107_v18  ;;  %12715 = vmatpush1.bf16.msra.mxu1 %v16082_v5  ;;  %v16150_v47 = vand.u32 4294901760, %v9383_v61 }
 0x97a   :  { %v9412_v48 = vsub.f32 %v16086_v53, %v9411_v52  ;;  %v9418_v35 = vsub.f32 %v16058_v58, %v9417_v7  ;;  %9322 = vmatprep.subr.mxu1 %v16121_v50  ;;  %v9286_v2 = vld [vmem:[#allocation2 + $0x80] sm:$0xf]  ;;  %v9424_v34 = vsub.f32 %v16041_v56, %v9423_v62  ;;  %v9436_v59 = vsub.f32 %v16062_v40, %v9435_v0 }
 0x97b   :  { %v9430_v49 = vsub.f32 %v16110_v46, %v9429_v37  ;;  %v16144_v63 = vsub.f32 %v9297_v45, %v16121_v50  ;;  %9123 = vst [vmem:[#allocation2 + $0x30] sm:$0xf] %v9119_v20  ;;  %9124 = vst [vmem:[#allocation2 + $0x38] sm:$0xf] %v9120_v27  ;;  %v9224_v16 = vpop.permute.xlu1 %9223  ;;  %v9294_v3 = vsel %vm1493_vm10, %v9286_v2, 0  ;;  %v9401_v8 = vand.u32 4294901760, %v9400_v32 }
 0x97c   :  { %v9413_v1 = vand.u32 4294901760, %v9412_v48  ;;  %v9225_v51 = vsel %vm1380_vm7, %v15984_v36, %v9224_v16  ;;  %v9228_v21 = vsel %vm1380_vm7, %v9224_v16, %v15871_v11  ;;  %v16158_v28 = vand.u32 4294901760, %v9294_v3  ;;  %v17111_v48 = vld [vmem:[#allocation58_spill] sm:$0xff] }
 0x97d   :  { %v9431_v41 = vand.u32 4294901760, %v9430_v49  ;;  %v9231_v57 = vmul.f32 %v9225_v51, %v17108_v24  ;;  %v9232_v4 = vmul.f32 %v9228_v21, %v17109_v6  ;;  %v9419_v44 = vand.u32 4294901760, %v9418_v35  ;;  %v9280_v16 = vld [vmem:[#allocation2 + $0x50] sm:$0xff] }
 0x97e   :  { %v9441_v61 = vand.u32 4294901760, %v16144_v63  ;;  %9324 = vmatpush1.msra.mxu1 %v16158_v28  ;;  %v16165_v32 = vsub.f32 %v9294_v3, %v16158_v28  ;;  %v12718_v36 = vpack.c.bf16 %v9413_v1, %v9401_v8  ;;  %v9437_v60 = vand.u32 4294901760, %v9436_v59 }
 0x97f   :  { %v9239_v30 = vrot.slane %v9231_v57, 4  ;;  %v9240_v31 = vrot.slane %v9232_v4, 4  ;;  %v9256_v11 = vpop.permute.xlu1 %9255  ;;  %12717 = vmatprep.subr.bf16.mxu1 %v15940_v15  ;;  %9385 = vmatmul.mubr.f32.vlgmr.msra.gmra.mrb[34].mxu1 %v16150_v47  ;;  %v12720_v45 = vpack.c.bf16 %v9431_v41, %v9419_v44  ;;  %v9425_v20 = vand.u32 4294901760, %v9424_v34  ;;  %v17110_v15 = vld [vmem:[#allocation57_spill] sm:$0xff] }
 0x980   :  { %v9442_v23 = vsub.f32 %v16144_v63, %v9441_v61  ;;  %v9257_v17 = vsel %vm1434_vm9, %v16017_v9, %v9256_v11  ;;  %v9260_v10 = vsel %vm1434_vm9, %v9256_v11, %v16060_v33  ;;  %12719 = vmatpush1.bf16.msra.mxu1 %v12718_v36  ;;  %v9447_v18 = vand.u32 4294901760, %v16165_v32  ;;  %9505 = vmatprep.mubr.f32.mxu1 %v16983_v12 }
 0x981   :  { %9247 = vst [vmem:[#allocation2 + $0x70] sm:$0xf0] %v9239_v30  ;;  %9248 = vst [vmem:[#allocation2 + $0x78] sm:$0xf0] %v9240_v31  ;;  %v9263_v27 = vmul.f32 %v9257_v17, %v17110_v15  ;;  %v9264_v35 = vmul.f32 %v9260_v10, %v17111_v48  ;;  %12721 = vmatprep.subr.bf16.mxu1 %v12720_v45  ;;  %v12722_v2 = vpack.c.bf16 %v9437_v60, %v9425_v20 }
 0x982   :  { %v9448_v9 = vsub.f32 %v16165_v32, %v9447_v18  ;;  %v9443_v26 = vand.u32 4294901760, %v9442_v23  ;;  %v12726_v49 = vpack.c.bf16 %v16086_v53, %v16039_v13  ;;  %v12728_v34 = vpack.c.bf16 %v16110_v46, %v16058_v58  ;;  %v9277_v13 = vld [vmem:[#allocation2 + $0x38] sm:$0xff]  ;;  %v9272_v58 = vld [vmem:[#allocation2 + $0x10] sm:$0xff] }
 0x983   :  { %9267 = vst [vmem:[#allocation2 + $0x90] sm:$0xf] %v9263_v27  ;;  %9268 = vst [vmem:[#allocation2 + $0x98] sm:$0xf] %v9264_v35  ;;  %v12730_v59 = vpack.c.bf16 %v16062_v40, %v16041_v56  ;;  %v12742_v38 = vpack.c.bf16 %v9411_v52, %v9399_v43  ;;  %v12744_v19 = vpack.c.bf16 %v9429_v37, %v9417_v7  ;;  %v9276_v43 = vld [vmem:[#allocation2 + $0x30] sm:$0xff]  ;;  %v9878_v52 = vand.u32 4294901760, %v9277_v13 }
 0x984   :  { %12723 = vmatpush1.bf16.msra.mxu1 %v12722_v2  ;;  %v9449_v33 = vand.u32 4294901760, %v9448_v9  ;;  %v9880_v7 = vand.u32 4294901760, %v9276_v43  ;;  %v9281_v37 = vld [vmem:[#allocation2 + $0x58] sm:$0xff]  ;;  %v9876_v40 = vand.u32 4294901760, %v9272_v58  ;;  %v9884_v21 = vand.u32 4294901760, %v9280_v16 }
 0x985   :  { %9444 = vmatprep.subr.mxu1 %v9443_v26 }
 0x986   :  { %v16226_v1 = vsub.f32 %v9276_v43, %v9880_v7  ;;  %v16251_v60 = vsub.f32 %v9280_v16, %v9884_v21 }
 0x988   :  { %9450 = vmatpush1.msra.mxu1 %v9449_v33  ;;  %v9285_v53 = vld [vmem:[#allocation2 + $0x78] sm:$0xff]  ;;  %v9980_v44 = vand.u32 4294901760, %v16226_v1  ;;  %v9992_v48 = vand.u32 4294901760, %v16251_v60 }
 0x989   :  { %12725 = vmatprep.subr.bf16.mxu1 %v12724_v14  ;;  %9507 = vmatmul.mubr.f32.vlgmr.msra.gmra.mrb[34].mxu1 %v16011_v22  ;;  %v12746_v14 = vpack.c.bf16 %v9435_v0, %v9423_v62  ;;  %v9886_v56 = vand.u32 4294901760, %v9285_v53  ;;  %v16222_v62 = vsub.f32 %v9277_v13, %v9878_v52  ;;  %v9882_v0 = vand.u32 4294901760, %v9281_v37 }
 0x98a   :  { %12727 = vmatpush1.bf16.msra.mxu1 %v12726_v49  ;;  %9597 = vmatprep.mubr.f32.mxu1 %v16983_v12  ;;  %v9289_v3 = vld [vmem:[#allocation2 + $0x98] sm:$0xf]  ;;  %v9981_v23 = vsub.f32 %v16226_v1, %v9980_v44 }
 0x98b   :  { %12729 = vmatprep.subr.bf16.mxu1 %v12728_v34  ;;  %v16228_v51 = vsub.f32 %v9285_v53, %v9886_v56  ;;  %v9303_v41 = vsel %vm1493_vm10, %v9289_v3, 0  ;;  %v16235_v24 = vsub.f32 %v9281_v37, %v9882_v0  ;;  %v9974_v57 = vand.u32 4294901760, %v16222_v62 }
 0x98c   :  { %v16256_v31 = vpack.c.bf16 %v9886_v56, %v9882_v0  ;;  %v9982_v26 = vand.u32 4294901760, %v9981_v23 }
 0x98d   :  { %v9998_v36 = vand.u32 4294901760, %v16228_v51  ;;  %v9975_v11 = vsub.f32 %v16222_v62, %v9974_v57  ;;  %v9986_v45 = vand.u32 4294901760, %v16235_v24  ;;  %v12776_v0 = vpack.c.bf16 %v16228_v51, %v16235_v24 }
 0x98e   :  { %12731 = vmatpush1.bf16.msra.mxu1 %v12730_v59 }
 0x98f   :  { %9539 = vmatprep.subr.mxu1 %v16144_v63  ;;  %v9284_v63 = vld [vmem:[#allocation2 + $0x70] sm:$0xff]  ;;  %v9999_v20 = vsub.f32 %v16228_v51, %v9998_v36  ;;  %v9976_v35 = vand.u32 4294901760, %v9975_v11  ;;  %v9987_v2 = vsub.f32 %v16235_v24, %v9986_v45 }
 0x991   :  { %v10000_v34 = vand.u32 4294901760, %v9999_v20  ;;  %v9988_v13 = vand.u32 4294901760, %v9987_v2 }
 0x992   :  { %9542 = vmatpush1.msra.mxu1 %v16165_v32 }
 0x993   :  { %12733 = vmatprep.subr.bf16.mxu1 %v15928_v29  ;;  %9600 = vmatmul.mubr.f32.vlgmr.msra.gmra.mrb[34].mxu1 %v16025_v54 }
 0x994   :  { %12735 = vmatpush1.bf16.msra.mxu1 %v16078_v25  ;;  %9680 = vmatprep.mubr.f32.mxu1 %v16983_v12 }
 0x995   :  { %12737 = vmatprep.subr.bf16.mxu1 %v16108_v42 }
 0x998   :  { %12739 = vmatpush1.bf16.msra.mxu1 %v16082_v5 }
 0x999   :  { %9623 = vmatprep.subr.mxu1 %v16121_v50 }
 0x99c   :  { %9625 = vmatpush1.msra.mxu1 %v16158_v28 }
 0x99d   :  { %12741 = vmatprep.subr.bf16.mxu1 %v15938_v55  ;;  %9684 = vmatmul.mubr.f32.vlgmr.msra.gmra.mrb[34].mxu1 %v16044_v39  ;;  %v9273_v55 = vld [vmem:[#allocation2 + $0x18] sm:$0xff] }
 0x99e   :  { %12743 = vmatpush1.bf16.msra.mxu1 %v12742_v38  ;;  %9784 = vmatprep.mubr.f32.mxu1 %v16983_v12  ;;  %v9874_v46 = vand.u32 4294901760, %v9273_v55 }
 0x99f   :  { %12745 = vmatprep.subr.bf16.mxu1 %v12744_v19  ;;  %v9993_v19 = vsub.f32 %v16251_v60, %v9992_v48 }
 0x9a0   :  { %v16224_v8 = vsub.f32 %v9273_v55, %v9874_v46 }
 0x9a2   :  { %12747 = vmatpush1.bf16.msra.mxu1 %v12746_v14  ;;  %v9962_v4 = vand.u32 4294901760, %v16224_v8 }
 0x9a3   :  { %9725 = vmatprep.subr.mxu1 %v9441_v61  ;;  %v16242_v61 = vpack.c.bf16 %v9878_v52, %v9874_v46  ;;  %v12768_v52 = vpack.c.bf16 %v10000_v34, %v9988_v13  ;;  %v9994_v46 = vand.u32 4294901760, %v9993_v19  ;;  %v13029_v19 = vld [vmem:[#allocation4 + $0x8] sm:$0xff] }
 0x9a4   :  { %v9963_v10 = vsub.f32 %v16224_v8, %v9962_v4  ;;  %v12788_v3 = vpack.c.bf16 %v9974_v57, %v9962_v4 }
 0x9a6   :  { %9729 = vmatpush1.msra.mxu1 %v9447_v18  ;;  %v9964_v49 = vand.u32 4294901760, %v9963_v10 }
 0x9a7   :  { %12749 = vmatprep.subr.bf16.mxu1 %v15928_v29  ;;  %9786 = vmatmul.mubr.f32.vlgmr.msra.gmra.mrb[34].mxu1 %v16011_v22  ;;  %v9888_v29 = vand.u32 4294901760, %v9284_v63 }
 0x9a8   :  { %12751 = vmatpush1.bf16.msra.mxu1 %v16078_v25  ;;  %9866 = vmatprep.mubr.f32.mxu1 %v16983_v12  ;;  %v16231_v25 = vsub.f32 %v9272_v58, %v9876_v40  ;;  %v12764_v14 = vpack.c.bf16 %v9976_v35, %v9964_v49 }
 0x9a9   :  { %12753 = vmatprep.subr.bf16.mxu1 %v16108_v42  ;;  %v9288_v42 = vld [vmem:[#allocation2 + $0x90] sm:$0xf]  ;;  %v16238_v6 = vsub.f32 %v9284_v63, %v9888_v29  ;;  %v16280_v15 = vpack.c.bf16 %v9888_v29, %v9884_v21  ;;  %v12792_v29 = vpack.c.bf16 %v9998_v36, %v9986_v45 }
 0x9aa   :  { %v9300_v32 = vsel %vm1493_vm10, %v9288_v42, 0  ;;  %v9968_v30 = vand.u32 4294901760, %v16231_v25 }
 0x9ab   :  { %v10004_v17 = vand.u32 4294901760, %v16238_v6  ;;  %v12778_v16 = vpack.c.bf16 %v16238_v6, %v16251_v60 }
 0x9ac   :  { %12755 = vmatpush1.bf16.msra.mxu1 %v16082_v5  ;;  %v16244_v5 = vand.u32 4294901760, %v9303_v41  ;;  %v9969_v27 = vsub.f32 %v16231_v25, %v9968_v30 }
 0x9ad   :  { %9809 = vmatprep.subr.mxu1 %v16121_v50  ;;  %v16249_v50 = vpack.c.bf16 %v9880_v7, %v9876_v40  ;;  %v10005_v33 = vsub.f32 %v16238_v6, %v10004_v17  ;;  %v12772_v40 = vpack.c.bf16 %v16222_v62, %v16224_v8  ;;  %v12794_v62 = vpack.c.bf16 %v10004_v17, %v9992_v48 }
 0x9ae   :  { %v16278_v18 = vsub.f32 %v9303_v41, %v16244_v5  ;;  %v9970_v38 = vand.u32 4294901760, %v9969_v27 }
 0x9af   :  { %v10006_v43 = vand.u32 4294901760, %v10005_v33 }
 0x9b0   :  { %9811 = vmatpush1.msra.mxu1 %v16158_v28  ;;  %v16263_v28 = vand.u32 4294901760, %v9300_v32  ;;  %v10010_v59 = vand.u32 4294901760, %v16278_v18  ;;  %v12766_v55 = vpack.c.bf16 %v9982_v26, %v9970_v38 }
 0x9b1   :  { %9868 = vmatmul.mubr.f32.vlgmr.msra.gmra.mrb[34].mxu1 %v16011_v22  ;;  %12757 = vmatprep.subr.bf16.mxu1 %v16242_v61  ;;  %v12770_v7 = vpack.c.bf16 %v10006_v43, %v9994_v46 }
 0x9b2   :  { %12759 = vmatpush1.bf16.msra.mxu1 %v16249_v50  ;;  %9948 = vmatprep.mubr.f32.mxu1 %v16983_v12  ;;  %v10015_v9 = vsub.f32 %v9300_v32, %v16263_v28  ;;  %v10011_v58 = vsub.f32 %v16278_v18, %v10010_v59 }
 0x9b3   :  { %12761 = vmatprep.subr.bf16.mxu1 %v16256_v31 }
 0x9b4   :  { %v10016_v53 = vand.u32 4294901760, %v10015_v9  ;;  %v10012_v56 = vand.u32 4294901760, %v10011_v58  ;;  %v13031_v58 = vld [vmem:[#allocation4 + $0x18] sm:$0xff] }
 0x9b6   :  { %12763 = vmatpush1.bf16.msra.mxu1 %v16280_v15  ;;  %v10017_v37 = vsub.f32 %v10015_v9, %v10016_v53 }
 0x9b7   :  { %9891 = vmatprep.subr.mxu1 %v16244_v5 }
 0x9b8   :  { %v10018_v63 = vand.u32 4294901760, %v10017_v37 }
 0x9ba   :  { %9893 = vmatpush1.msra.mxu1 %v16263_v28 }
 0x9bb   :  { %12765 = vmatprep.subr.bf16.mxu1 %v12764_v14  ;;  %9954 = vmatmul.mubr.f32.vlgmr.msra.gmra.mrb[36].mxu1 %v16150_v47  ;;  %v12774_v47 = vpack.c.bf16 %v16226_v1, %v16231_v25 }
 0x9bc   :  { %12767 = vmatpush1.bf16.msra.mxu1 %v12766_v55  ;;  %10074 = vmatprep.mubr.f32.mxu1 %v16983_v12 }
 0x9bd   :  { %12769 = vmatprep.subr.bf16.mxu1 %v12768_v52 }
 0x9c0   :  { %12771 = vmatpush1.bf16.msra.mxu1 %v12770_v7 }
 0x9c1   :  { %10013 = vmatprep.subr.mxu1 %v10012_v56 }
 0x9c4   :  { %10019 = vmatpush1.msra.mxu1 %v10018_v63 }
 0x9c5   :  { %12773 = vmatprep.subr.bf16.mxu1 %v12772_v40  ;;  %10076 = vmatmul.mubr.f32.vlgmr.msra.gmra.mrb[36].mxu1 %v16011_v22 }
 0x9c6   :  { %12775 = vmatpush1.bf16.msra.mxu1 %v12774_v47  ;;  %10166 = vmatprep.mubr.f32.mxu1 %v16983_v12 }
 0x9c7   :  { %12777 = vmatprep.subr.bf16.mxu1 %v12776_v0 }
 0x9ca   :  { %12779 = vmatpush1.bf16.msra.mxu1 %v12778_v16 }
 0x9cb   :  { %10108 = vmatprep.subr.mxu1 %v16278_v18 }
 0x9ce   :  { %10111 = vmatpush1.msra.mxu1 %v10015_v9  ;;  %v10456_v9 = vpop.permute.xlu0 %10455 }
 0x9cf   :  { %12781 = vmatprep.subr.bf16.mxu1 %v16242_v61  ;;  %10169 = vmatmul.mubr.f32.vlgmr.msra.gmra.mrb[36].mxu1 %v16025_v54  ;;  %v12790_v54 = vpack.c.bf16 %v9980_v44, %v9968_v30 }
 0x9d0   :  { %12783 = vmatpush1.bf16.msra.mxu1 %v16249_v50  ;;  %10249 = vmatprep.mubr.f32.mxu1 %v16983_v12 }
 0x9d1   :  { %12785 = vmatprep.subr.bf16.mxu1 %v16256_v31 }
 0x9d4   :  { %12787 = vmatpush1.bf16.msra.mxu1 %v16280_v15 }
 0x9d5   :  { %10192 = vmatprep.subr.mxu1 %v16244_v5 }
 0x9d8   :  { %10194 = vmatpush1.msra.mxu1 %v16263_v28 }
 0x9d9   :  { %12789 = vmatprep.subr.bf16.mxu1 %v12788_v3  ;;  %10253 = vmatmul.mubr.f32.vlgmr.msra.gmra.mrb[36].mxu1 %v16044_v39  ;;  %v10447_v39 = vld [vmem:[%s16401_s9] sm:$0xff]  ;;  %s13167_s9 = smov [#allocation12]  }
 0x9da   :  { %12791 = vmatpush1.bf16.msra.mxu1 %v12790_v54  ;;  %10353 = vmatprep.mubr.f32.mxu1 %v16983_v12  ;;  %v10459_v8 = vsel %vm119_vm0, %v10447_v39, 0  ;;  %s11405_s17 = sshll.u32 %s13167_s9, 4  ;;  %s11406_s17 = int_to_ptr.vmem [resolvable:$true] %s11405_s17 }
 0x9db   :  { %12793 = vmatprep.subr.bf16.mxu1 %v12792_v29  ;;  %v16349_v1 = vand.u32 4294901760, %v10459_v8  ;;  %s13120_s18 = scalar_lea.vmem %s11406_s17, 512  ;;  %p13125_p5 = scmp.lt.s32.totalorder %s11406_s17, %s11406_s17 }
 0x9dc   :  { %p13121_p4 = scmp.ne.s32.totalorder %s11406_s17, %s13120_s18  ;;  %p13126_p6 = scmp.lt.s32.totalorder %s13120_s18, %s13120_s18 }
 0x9dd   :  { %v16352_v51 = vsub.f32 %v10459_v8, %v16349_v1 }
 0x9de   :  { %12795 = vmatpush1.bf16.msra.mxu1 %v12794_v62  ;;  %p13127_p7 = por %p13126_p6, %p13125_p5 }
 0x9df   :  { %10294 = vmatprep.subr.mxu1 %v10010_v59  ;;  %v16355_v41 = vand.u32 4294901760, %v16352_v51  ;;  %v13028_v59 = vld [vmem:[#allocation4] sm:$0xff] }
 0x9e0   :  { %p13128_p8 = pnand %p13127_p7, %p13121_p4 }
 0x9e2   :  { %10298 = vmatpush1.msra.mxu1 %v10016_v53 }
 0x9e3   :  { %12797 = vmatprep.subr.bf16.mxu1 %v16242_v61  ;;  %10355 = vmatmul.mubr.f32.vlgmr.msra.gmra.mrb[36].mxu1 %v16011_v22 }
 0x9e4   :  { %12799 = vmatpush1.bf16.msra.mxu1 %v16249_v50  ;;  %10435 = vmatprep.mubr.f32.mxu1 %v16983_v12 }
 0x9e5   :  { %12801 = vmatprep.subr.bf16.mxu1 %v16256_v31 }
 0x9e8   :  { %12803 = vmatpush1.bf16.msra.mxu1 %v16280_v15 }
 0x9e9   :  { %10378 = vmatprep.subr.mxu1 %v16244_v5 }
 0x9ec   :  { %10380 = vmatpush1.msra.mxu1 %v16263_v28 }
 0x9ed   :  { %10437 = vmatmul.mubr.f32.vlgmr.msra.gmra.mrb[36].mxu1 %v16011_v22  ;;  %v10531_v22 = vsub.f32 %v16352_v51, %v16355_v41 }
 0x9ef   :  { %v10532_v4 = vand.u32 4294901760, %v10531_v22 }
 0xa84   :  { %v9869_v25 = vpop.f32.mrb[34].mxu1 }
 0xa85   :  { %10443 = vst [vmem:[#allocation3] sm:$0xf] %v9869_v25  ;;  %v9871_v21 = vpop.f32.mrb[35].mxu1 }
 0xa86   :  { %10444 = vst [vmem:[#allocation3 + $0x8] sm:$0xf] %v9871_v21 }
 0xa8c   :  { %v10448_v42 = vld [vmem:[#allocation3] sm:$0xff] }
 0xa8d   :  { %v10449_v24 = vld [vmem:[#allocation3 + $0x8] sm:$0xff]  ;;  %v10463_v57 = vand.u32 4294901760, %v10448_v42 }
 0xa8e   :  { %v10461_v6 = vand.u32 4294901760, %v10449_v24 }
 0xa8f   :  { %v10546_v44 = vsub.f32 %v10448_v42, %v10463_v57 }
 0xa90   :  { %10462 = vmatprep.subr.mxu0 %v10461_v6  ;;  %v10540_v61 = vsub.f32 %v10449_v24, %v10461_v6 }
 0xa91   :  { %10464 = vmatpush1.msra.mxu0 %v10463_v57  ;;  %v10547_v5 = vand.u32 4294901760, %v10546_v44 }
 0xa92   :  { %10533 = vmatmul.mubr.f32.vlgmr.msra.gmra.mrb[16].mxu0 %v10532_v4  ;;  %v10541_v32 = vand.u32 4294901760, %v10540_v61 }
 0xa93   :  { %v10548_v36 = vsub.f32 %v10546_v44, %v10547_v5  ;;  %10613 = vmatprep.mubr.f32.mxu0 %v16983_v12 }
 0xa94   :  { %v10542_v50 = vsub.f32 %v10540_v61, %v10541_v32 }
 0xa95   :  { %v10549_v30 = vand.u32 4294901760, %v10548_v36 }
 0xa96   :  { %v10543_v60 = vand.u32 4294901760, %v10542_v50 }
 0xa98   :  { %10544 = vmatprep.subr.mxu0 %v10543_v60 }
 0xa99   :  { %10550 = vmatpush1.msra.mxu0 %v10549_v30 }
 0xa9a   :  { %10615 = vmatmul.mubr.f32.vlgmr.msra.gmra.mrb[16].mxu0 %v16349_v1  ;;  %10623 = vmatprep.subr.mxu0 %v10540_v61 }
 0xa9b   :  { %10626 = vmatpush1.msra.mxu0 %v10546_v44  ;;  %10689 = vmatprep.mubr.f32.mxu0 %v16983_v12 }
 0xa9c   :  { %10699 = vmatprep.subr.mxu0 %v10461_v6 }
 0xaa2   :  { %10692 = vmatmul.mubr.f32.vlgmr.msra.gmra.mrb[16].mxu0 %v16352_v51 }
 0xaa3   :  { %10701 = vmatpush1.msra.mxu0 %v10463_v57  ;;  %10764 = vmatprep.mubr.f32.mxu0 %v16983_v12 }
 0xaa4   :  { %10777 = vmatprep.subr.mxu0 %v10541_v32 }
 0xaaa   :  { %10768 = vmatmul.mubr.f32.vlgmr.msra.gmra.mrb[16].mxu0 %v16355_v41 }
 0xaab   :  { %10781 = vmatpush1.msra.mxu0 %v10547_v5  ;;  %10844 = vmatprep.mubr.f32.mxu0 %v16983_v12 }
 0xaac   :  { %10853 = vmatprep.subr.mxu0 %v10461_v6 }
 0xab2   :  { %10846 = vmatmul.mubr.f32.vlgmr.msra.gmra.mrb[16].mxu0 %v16349_v1 }
 0xab3   :  { %10855 = vmatpush1.msra.mxu0 %v10463_v57  ;;  %10918 = vmatprep.mubr.f32.mxu0 %v16983_v12 }
 0xaba   :  { %10920 = vmatmul.mubr.f32.vlgmr.msra.gmra.mrb[16].mxu0 %v16349_v1 }
 0xabb   :  { %10992 = vmatprep.mubr.f32.mxu0 %v16983_v12 }
 0xac0   :  { %v10438_v31 = vpop.f32.mrb[36].mxu1 }
 0xac1   :  { %10445 = vst [vmem:[#allocation3 + $0x10] sm:$0xf] %v10438_v31  ;;  %v10440_v11 = vpop.f32.mrb[37].mxu1 }
 0xac2   :  { %10446 = vst [vmem:[#allocation3 + $0x18] sm:$0xf] %v10440_v11 }
 0xac8   :  { %v10450_v45 = vld [vmem:[#allocation3 + $0x10] sm:$0xff] }
 0xac9   :  { %v10451_v28 = vld [vmem:[#allocation3 + $0x18] sm:$0xff]  ;;  %v10928_v23 = vand.u32 4294901760, %v10450_v45 }
 0xaca   :  { %v10926_v17 = vand.u32 4294901760, %v10451_v28 }
 0xacb   :  { %v11011_v10 = vsub.f32 %v10450_v45, %v10928_v23 }
 0xacc   :  { %10927 = vmatprep.subr.mxu0 %v10926_v17  ;;  %v11005_v20 = vsub.f32 %v10451_v28, %v10926_v17 }
 0xacd   :  { %10929 = vmatpush1.msra.mxu0 %v10928_v23  ;;  %v11012_v18 = vand.u32 4294901760, %v11011_v10 }
 0xace   :  { %10998 = vmatmul.mubr.f32.vlgmr.msra.gmra.mrb[18].mxu0 %v10532_v4  ;;  %v11006_v15 = vand.u32 4294901760, %v11005_v20 }
 0xacf   :  { %v11013_v27 = vsub.f32 %v11011_v10, %v11012_v18  ;;  %11078 = vmatprep.mubr.f32.mxu0 %v16983_v12 }
 0xad0   :  { %v11007_v48 = vsub.f32 %v11005_v20, %v11006_v15 }
 0xad1   :  { %v11014_v2 = vand.u32 4294901760, %v11013_v27 }
 0xad2   :  { %v11008_v35 = vand.u32 4294901760, %v11007_v48 }
 0xad4   :  { %11009 = vmatprep.subr.mxu0 %v11008_v35 }
 0xad5   :  { %11015 = vmatpush1.msra.mxu0 %v11014_v2 }
 0xad6   :  { %11080 = vmatmul.mubr.f32.vlgmr.msra.gmra.mrb[18].mxu0 %v16349_v1  ;;  %11088 = vmatprep.subr.mxu0 %v11005_v20 }
 0xad7   :  { %11091 = vmatpush1.msra.mxu0 %v11011_v10  ;;  %11154 = vmatprep.mubr.f32.mxu0 %v16983_v12 }
 0xad8   :  { %11164 = vmatprep.subr.mxu0 %v10926_v17 }
 0xade   :  { %11157 = vmatmul.mubr.f32.vlgmr.msra.gmra.mrb[18].mxu0 %v16352_v51 }
 0xadf   :  { %11166 = vmatpush1.msra.mxu0 %v10928_v23  ;;  %11229 = vmatprep.mubr.f32.mxu0 %v16983_v12 }
 0xae0   :  { %11242 = vmatprep.subr.mxu0 %v11006_v15 }
 0xae6   :  { %11233 = vmatmul.mubr.f32.vlgmr.msra.gmra.mrb[18].mxu0 %v16355_v41 }
 0xae7   :  { %11246 = vmatpush1.msra.mxu0 %v11012_v18  ;;  %11309 = vmatprep.mubr.f32.mxu0 %v16983_v12 }
 0xae8   :  { %11318 = vmatprep.subr.mxu0 %v10926_v17 }
 0xaee   :  { %11311 = vmatmul.mubr.f32.vlgmr.msra.gmra.mrb[18].mxu0 %v16349_v1 }
 0xaef   :  { %11320 = vmatpush1.msra.mxu0 %v10928_v23  ;;  %11383 = vmatprep.mubr.f32.mxu0 %v16983_v12  ;;  %v13030_v12 = vld [vmem:[#allocation4 + $0x10] sm:$0xff] }
 0xaf6   :  { %11385 = vmatmul.mubr.f32.vlgmr.msra.gmra.mrb[18].mxu0 %v16349_v1 }
 0xb8d   :  { %v10921_v26 = vpop.f32.mrb[16].mxu0 }
 0xb8e   :  { %v12814_v33 = vadd.f32 %v10921_v26, %v10456_v9  ;;  %v10923_v49 = vpop.f32.mrb[17].mxu0 }
 0xb8f   :  { %v12815_v34 = vadd.f32 %v10923_v49, %v10456_v9 }
 0xb90   :  { %v11391_v38 = vadd.f32 %v13028_v59, %v12814_v33 }
 0xb91   :  { %v11392_v14 = vadd.f32 %v13029_v19, %v12815_v34 }
 0xb92   :  { %11395 = vst [vmem:[#allocation12] sm:$0xff] %v11391_v38 }
 0xb93   :  { %11396 = vst [vmem:[#allocation12 + $0x8] sm:$0xff] %v11392_v14 }
 0xbc9   :  { %v11386_v13 = vpop.f32.mrb[18].mxu0 }
 0xbca   :  { %v12816_v55 = vadd.f32 %v11386_v13, %v10456_v9  ;;  %v11388_v43 = vpop.f32.mrb[19].mxu0 }
 0xbcb   :  { %v12817_v53 = vadd.f32 %v11388_v43, %v10456_v9 }
 0xbcc   :  { %v11393_v52 = vadd.f32 %v13030_v12, %v12816_v55 }
 0xbcd   :  { %v11394_v46 = vadd.f32 %v13031_v58, %v12817_v53 }
 0xbce   :  { %11397 = vst [vmem:[#allocation12 + $0x10] sm:$0xff] %v11393_v52 }
 0xbcf   :  { %11398 = vst [vmem:[#allocation12 + $0x18] sm:$0xff] %v11394_v46 }
 0xbd0   :  { %13131 = shalt.err (!%p13128_p8)
}
 0xbd1   :  { %s13132_s8 = scalar_lea.hbm %s16406_s14, 512 }
 0xbd2   :  { %p13133_p9 = scmp.ne.s32.totalorder %s16406_s14, %s13132_s8  ;;  %p13136_p10 = scmp.lt.u32.totalorder %s13132_s8, %s16406_s14 }
 0xbd4   :  { %p13138_p11 = pnand %p13136_p10, %p13133_p9 }
 0xbd6   :  { %13141 = shalt.err (!%p13138_p11)
}
 0xbd7   :  { %11408 = dma.vmem_to_hbm [thread:$0]  %s11406_s17, 512, %s16406_s14, [#allocation6]  }
 0xbd8   :  { %13148 = dma.done.wait [#allocation6], 512  }
 0xbd9   :  { %13149 = vsyncadd [#allocation6], 4294966784 }
 0xbda   :  { %11412 = vsyncpa [#allocation5], 1 }
 0xbdb   :  { %11413 = vsyncpa [#allocation8], 1 }
 0xbdc   :  { %11414 = vsyncpa [#allocation11], 1 }
 0xbdd   :  { %11415 = vsyncpa [#allocation6], 1 }

</bundles_post_ra>
